<compile_context>
chip_gen: v7x
topology: tpu7x:2x2x1
jax: 0.10.0
libtpu: 0.0.40
codegen_flags: <defaults>
</compile_context>

<pallas_src>
import functools
import math

import jax
import jax.numpy as jnp
from jax import lax
from jax.experimental import pallas as pl
from jax.experimental.pallas import tpu as pltpu


# ---------------------------------------------------------------------------
# Helpers
# ---------------------------------------------------------------------------

def _pick_tile(dim, targets=(512, 256, 128)):
    """Largest target tile that divides `dim`, else the full dim (small shapes)."""
    for t in targets:
        if dim >= t and dim % t == 0:
            return t
    return dim


def _ln_torch(x_f32, gamma, beta, eps):
    """Reference LayerNorm: unbiased std (n-1), eps added to std. f32 math."""
    n = x_f32.shape[-1]
    mean = jnp.mean(x_f32, axis=-1, keepdims=True)
    var = jnp.sum((x_f32 - mean) ** 2, axis=-1, keepdims=True) / (n - 1)
    inv = 1.0 / (jnp.sqrt(var) + eps)
    return gamma * (x_f32 - mean) * inv + beta


# ---------------------------------------------------------------------------
# Kernel 1: tiled matmul + bias (+ optional ReLU)
# ---------------------------------------------------------------------------

def _matmul_bias_kernel(relu, x_ref, w_ref, b_ref, o_ref, acc_ref):
    k = pl.program_id(2)

    @pl.when(k == 0)
    def _():
        acc_ref[...] = jnp.zeros_like(acc_ref)

    acc_ref[...] += jnp.dot(x_ref[...], w_ref[...],
                            preferred_element_type=jnp.float32)

    @pl.when(k == pl.num_programs(2) - 1)
    def _():
        y = acc_ref[...] + b_ref[...]
        if relu:
            y = jnp.maximum(y, 0.0)
        o_ref[...] = y.astype(o_ref.dtype)


def matmul_bias(x, w, b, relu=False, out_dtype=jnp.bfloat16):
    """x:(M,K) @ w:(K,N) + b:(N,). bf16 MXU operands, f32 accumulator scratch."""
    M, K = x.shape
    N = w.shape[1]
    tm = _pick_tile(M, (256, 128))
    tn = _pick_tile(N, (512, 256, 128))
    tk = _pick_tile(K, (512, 256, 128))
    return pl.pallas_call(
        functools.partial(_matmul_bias_kernel, relu),
        grid=(M // tm, N // tn, K // tk),
        in_specs=[
            pl.BlockSpec((tm, tk), lambda i, j, k: (i, k)),
            pl.BlockSpec((tk, tn), lambda i, j, k: (k, j)),
            pl.BlockSpec((1, tn), lambda i, j, k: (0, j)),
        ],
        out_specs=pl.BlockSpec((tm, tn), lambda i, j, k: (i, j)),
        out_shape=jax.ShapeDtypeStruct((M, N), out_dtype),
        scratch_shapes=[pltpu.VMEM((tm, tn), jnp.float32)],
        compiler_params=pltpu.CompilerParams(
            dimension_semantics=("parallel", "parallel", "arbitrary")),
    )(x, w, b.reshape(1, N).astype(jnp.float32))


# ---------------------------------------------------------------------------
# Kernel 2: fused linear + residual + LayerNorm   (MHAtt merge projection)
# ---------------------------------------------------------------------------

def _linear_res_ln_kernel(eps, x_ref, w_ref, b_ref, res_ref, g_ref, be_ref,
                          o_ref, acc_ref):
    k = pl.program_id(1)

    @pl.when(k == 0)
    def _():
        acc_ref[...] = jnp.zeros_like(acc_ref)

    acc_ref[...] += jnp.dot(x_ref[...], w_ref[...],
                            preferred_element_type=jnp.float32)

    @pl.when(k == pl.num_programs(1) - 1)
    def _():
        z = acc_ref[...] + b_ref[...]
        t = z + res_ref[...].astype(jnp.float32)
        o_ref[...] = _ln_torch(t, g_ref[...], be_ref[...], eps).astype(o_ref.dtype)


def linear_residual_layernorm(x, w, b, residual, gamma, beta,
                              eps=1e-6, out_dtype=jnp.bfloat16):
    M, K = x.shape
    N = w.shape[1]
    tm = _pick_tile(M, (256, 128))
    tk = _pick_tile(K, (512, 256, 128))
    return pl.pallas_call(
        functools.partial(_linear_res_ln_kernel, eps),
        grid=(M // tm, K // tk),
        in_specs=[
            pl.BlockSpec((tm, tk), lambda i, k: (i, k)),
            pl.BlockSpec((tk, N), lambda i, k: (k, 0)),
            pl.BlockSpec((1, N), lambda i, k: (0, 0)),
            pl.BlockSpec((tm, N), lambda i, k: (i, 0)),
            pl.BlockSpec((1, N), lambda i, k: (0, 0)),
            pl.BlockSpec((1, N), lambda i, k: (0, 0)),
        ],
        out_specs=pl.BlockSpec((tm, N), lambda i, k: (i, 0)),
        out_shape=jax.ShapeDtypeStruct((M, N), out_dtype),
        scratch_shapes=[pltpu.VMEM((tm, N), jnp.float32)],
        compiler_params=pltpu.CompilerParams(
            dimension_semantics=("parallel", "arbitrary")),
    )(x, w, b.reshape(1, N).astype(jnp.float32), residual,
      gamma.reshape(1, N).astype(jnp.float32),
      beta.reshape(1, N).astype(jnp.float32))


# ---------------------------------------------------------------------------
# Kernel 3: fused linear + (out + dropout(out) -> 2*out in eval) + LayerNorm
#           (Crossattention output projections)
# ---------------------------------------------------------------------------

def _linear_double_ln_kernel(eps, x_ref, w_ref, b_ref, g_ref, be_ref,
                             o_ref, acc_ref):
    k = pl.program_id(1)

    @pl.when(k == 0)
    def _():
        acc_ref[...] = jnp.zeros_like(acc_ref)

    acc_ref[...] += jnp.dot(x_ref[...], w_ref[...],
                            preferred_element_type=jnp.float32)

    @pl.when(k == pl.num_programs(1) - 1)
    def _():
        z = acc_ref[...] + b_ref[...]
        # Reference: norm(out + dropout(out)); dropout=identity in eval -> 2*out.
        t = z + z
        o_ref[...] = _ln_torch(t, g_ref[...], be_ref[...], eps).astype(o_ref.dtype)


def linear_double_layernorm(x, w, b, gamma, beta, eps=1e-6,
                            out_dtype=jnp.float32):
    M, K = x.shape
    N = w.shape[1]
    tm = _pick_tile(M, (256, 128))
    tk = _pick_tile(K, (512, 256, 128))
    return pl.pallas_call(
        functools.partial(_linear_double_ln_kernel, eps),
        grid=(M // tm, K // tk),
        in_specs=[
            pl.BlockSpec((tm, tk), lambda i, k: (i, k)),
            pl.BlockSpec((tk, N), lambda i, k: (k, 0)),
            pl.BlockSpec((1, N), lambda i, k: (0, 0)),
            pl.BlockSpec((1, N), lambda i, k: (0, 0)),
            pl.BlockSpec((1, N), lambda i, k: (0, 0)),
        ],
        out_specs=pl.BlockSpec((tm, N), lambda i, k: (i, 0)),
        out_shape=jax.ShapeDtypeStruct((M, N), out_dtype),
        scratch_shapes=[pltpu.VMEM((tm, N), jnp.float32)],
        compiler_params=pltpu.CompilerParams(
            dimension_semantics=("parallel", "arbitrary")),
    )(x, w, b.reshape(1, N).astype(jnp.float32),
      gamma.reshape(1, N).astype(jnp.float32),
      beta.reshape(1, N).astype(jnp.float32))


# ---------------------------------------------------------------------------
# Kernel 4: fused FFN  (linear + ReLU + linear + residual + LayerNorm)
#           The intermediate activation `h` never leaves VMEM.
# ---------------------------------------------------------------------------

def _ffn_kernel(eps, y_ref, w1_ref, b1_ref, w2_ref, b2_ref, g_ref, be_ref, o_ref):
    y = y_ref[...]                                                   # bf16 (tm, D)
    h = jnp.dot(y, w1_ref[...], preferred_element_type=jnp.float32) + b1_ref[...]
    h = jnp.maximum(h, 0.0).astype(y.dtype)                          # bf16 (tm, F)
    f = jnp.dot(h, w2_ref[...], preferred_element_type=jnp.float32) + b2_ref[...]
    t = f + y.astype(jnp.float32)
    o_ref[...] = _ln_torch(t, g_ref[...], be_ref[...], eps).astype(o_ref.dtype)


def ffn_fused(y, w1, b1, w2, b2, gamma, beta, eps=1e-6, out_dtype=jnp.bfloat16):
    M, D = y.shape
    F = w1.shape[1]
    tm = _pick_tile(M, (256, 128))
    return pl.pallas_call(
        functools.partial(_ffn_kernel, eps),
        grid=(M // tm,),
        in_specs=[
            pl.BlockSpec((tm, D), lambda i: (i, 0)),
            pl.BlockSpec((D, F), lambda i: (0, 0)),
            pl.BlockSpec((1, F), lambda i: (0, 0)),
            pl.BlockSpec((F, D), lambda i: (0, 0)),
            pl.BlockSpec((1, D), lambda i: (0, 0)),
            pl.BlockSpec((1, D), lambda i: (0, 0)),
            pl.BlockSpec((1, D), lambda i: (0, 0)),
        ],
        out_specs=pl.BlockSpec((tm, D), lambda i: (i, 0)),
        out_shape=jax.ShapeDtypeStruct((M, D), out_dtype),
        compiler_params=pltpu.CompilerParams(dimension_semantics=("parallel",)),
    )(y, w1, b1.reshape(1, F).astype(jnp.float32), w2,
      b2.reshape(1, D).astype(jnp.float32),
      gamma.reshape(1, D).astype(jnp.float32),
      beta.reshape(1, D).astype(jnp.float32))


# ---------------------------------------------------------------------------
# Kernel 5: flash-style self-attention.
#   q:  (B, L, D)  lane-dense, heads packed along the lane axis
#   kv: (B, L, 2D) packed [k | v]
#   Grid (B, Lq tiles, KV tiles); online softmax with per-head f32 VMEM
#   accumulators so only a (tkv, 2D) KV tile is resident at a time.
# ---------------------------------------------------------------------------

def _mha_flash_kernel(n_head, dk, scale, q_ref, kv_ref, o_ref,
                      m_ref, l_ref, acc_ref):
    kv_i = pl.program_id(2)

    @pl.when(kv_i == 0)
    def _():
        m_ref[...] = jnp.full_like(m_ref, -jnp.inf)
        l_ref[...] = jnp.zeros_like(l_ref)
        acc_ref[...] = jnp.zeros_like(acc_ref)

    D = n_head * dk
    q_blk = q_ref[0]                           # (tq, D)   bf16
    kv_blk = kv_ref[0]                         # (tkv, 2D) bf16
    scale_c = jnp.asarray(scale, q_blk.dtype)

    for h in range(n_head):
        s0 = h * dk
        q_h = q_blk[:, s0:s0 + dk] * scale_c               # scale folded into q
        k_h = kv_blk[:, s0:s0 + dk]
        v_h = kv_blk[:, D + s0:D + s0 + dk]
        # contract over dk directly (no k.T materialized)
        s = lax.dot_general(q_h, k_h, (((1,), (1,)), ((), ())),
                            preferred_element_type=jnp.float32)      # (tq, tkv)
        m_prev = m_ref[h]                                            # (tq, 1)
        m_new = jnp.maximum(m_prev, jnp.max(s, axis=-1, keepdims=True))
        alpha = jnp.exp(m_prev - m_new)
        p = jnp.exp(s - m_new)
        l_ref[h] = alpha * l_ref[h] + jnp.sum(p, axis=-1, keepdims=True)
        acc_ref[h] = alpha * acc_ref[h] + jnp.dot(
            p.astype(v_h.dtype), v_h, preferred_element_type=jnp.float32)
        m_ref[h] = m_new

    @pl.when(kv_i == pl.num_programs(2) - 1)
    def _():
        outs = []
        for h in range(n_head):
            inv = pl.reciprocal(l_ref[h], approx=True)
            outs.append(acc_ref[h] * inv)
        o_ref[0] = jnp.concatenate(outs, axis=-1).astype(o_ref.dtype)


def mha_flash(q, kv, n_head, out_dtype=jnp.bfloat16):
    """q: (B, L, D); kv: (B, L, 2D) packed [k|v]; returns (B, L, D)."""
    B, L, D = q.shape
    dk = D // n_head
    scale = 1.0 / math.sqrt(dk)
    tq = _pick_tile(L, (512, 256, 128))
    tkv = _pick_tile(L, (512, 256, 128))
    return pl.pallas_call(
        functools.partial(_mha_flash_kernel, n_head, dk, scale),
        grid=(B, L // tq, L // tkv),
        in_specs=[
            pl.BlockSpec((1, tq, D), lambda b, qi, ki: (b, qi, 0)),
            pl.BlockSpec((1, tkv, 2 * D), lambda b, qi, ki: (b, ki, 0)),
        ],
        out_specs=pl.BlockSpec((1, tq, D), lambda b, qi, ki: (b, qi, 0)),
        out_shape=jax.ShapeDtypeStruct((B, L, D), out_dtype),
        scratch_shapes=[pltpu.VMEM((n_head, tq, 1), jnp.float32),    # m
                        pltpu.VMEM((n_head, tq, 1), jnp.float32),    # l
                        pltpu.VMEM((n_head, tq, dk), jnp.float32)],  # acc
        compiler_params=pltpu.CompilerParams(
            dimension_semantics=("parallel", "parallel", "arbitrary")),
    )(q, kv)


# ---------------------------------------------------------------------------
# Kernel 6: bidirectional cross-attention, packed [qk|v] per modality
# ---------------------------------------------------------------------------

def _bidir_kernel(n_head, dh, scale, img_ref, aud_ref, oi_ref, oa_ref):
    inner = n_head * dh
    img = img_ref[0]                           # (Li, 2*inner): [qk | v]
    aud = aud_ref[0]                           # (La, 2*inner)
    scale_c = jnp.asarray(scale, img.dtype)
    oi_heads, oa_heads = [], []
    for h in range(n_head):
        s0 = h * dh
        qk_i = img[:, s0:s0 + dh]
        v_i = img[:, inner + s0:inner + s0 + dh]
        qk_a = aud[:, s0:s0 + dh] * scale_c    # scale applied once (shared sim)
        v_a = aud[:, inner + s0:inner + s0 + dh]
        # image attends to audio: softmax over the audio (lane) axis
        sim_ia = lax.dot_general(qk_i, qk_a, (((1,), (1,)), ((), ())),
                                 preferred_element_type=jnp.float32)  # (Li, La)
        p_i = jax.nn.softmax(sim_ia, axis=-1)
        oi_heads.append(jnp.dot(p_i.astype(v_a.dtype), v_a,
                                preferred_element_type=jnp.float32))
        # audio attends to image: compute the (La, Li) product directly so the
        # softmax reduction stays on the lane axis (no sublane reduce / .T).
        sim_ai = lax.dot_general(qk_a, qk_i, (((1,), (1,)), ((), ())),
                                 preferred_element_type=jnp.float32)  # (La, Li)
        p_a = jax.nn.softmax(sim_ai, axis=-1)
        oa_heads.append(jnp.dot(p_a.astype(v_i.dtype), v_i,
                                preferred_element_type=jnp.float32))
    oi_ref[0] = jnp.concatenate(oi_heads, axis=-1).astype(oi_ref.dtype)
    oa_ref[0] = jnp.concatenate(oa_heads, axis=-1).astype(oa_ref.dtype)


def bidir_cross_attn_fused(img_qkv, aud_qkv, n_head, dim_head,
                           out_dtype=jnp.bfloat16):
    """img_qkv: (B, Li, 2*inner) [qk|v]; aud_qkv: (B, La, 2*inner)."""
    B, Li, two_inner = img_qkv.shape
    La = aud_qkv.shape[1]
    inner = two_inner // 2
    scale = dim_head ** -0.5
    return pl.pallas_call(
        functools.partial(_bidir_kernel, n_head, dim_head, scale),
        grid=(B,),
        in_specs=[
            pl.BlockSpec((1, Li, two_inner), lambda b: (b, 0, 0)),
            pl.BlockSpec((1, La, two_inner), lambda b: (b, 0, 0)),
        ],
        out_specs=(pl.BlockSpec((1, Li, inner), lambda b: (b, 0, 0)),
                   pl.BlockSpec((1, La, inner), lambda b: (b, 0, 0))),
        out_shape=(jax.ShapeDtypeStruct((B, Li, inner), out_dtype),
                   jax.ShapeDtypeStruct((B, La, inner), out_dtype)),
        compiler_params=pltpu.CompilerParams(dimension_semantics=("parallel",)),
    )(img_qkv, aud_qkv)


# ---------------------------------------------------------------------------
# Parameters + forward (wrapper glue has NO transposes, only free reshapes)
# ---------------------------------------------------------------------------

def init_params(key, d_img, d_aud, n_head, head_dim):
    ks = jax.random.split(key, 16)
    s = 0.05
    wdt = jnp.bfloat16

    def w(k, shape):
        return (jax.random.normal(k, shape, jnp.float32) * s).astype(wdt)

    inner = n_head * head_dim
    ff = head_dim  # SA2 passes head_dim as ff_dim (FFN mid size, cross dim_head)
    return {
        # --- SA block: q projection + packed [k|v] projection, merge, FFN, LNs ---
        "q_w": w(ks[0], (d_img, d_img)), "q_b": jnp.zeros((d_img,), jnp.float32),
        "kv_w": jnp.concatenate([w(ks[1], (d_img, d_img)),
                                 w(ks[2], (d_img, d_img))], axis=1),
        "kv_b": jnp.zeros((2 * d_img,), jnp.float32),
        "m_w": w(ks[3], (d_img, d_img)), "m_b": jnp.zeros((d_img,), jnp.float32),
        "ffn_w1": w(ks[4], (d_img, ff)), "ffn_b1": jnp.zeros((ff,), jnp.float32),
        "ffn_w2": w(ks[5], (ff, d_img)), "ffn_b2": jnp.zeros((d_img,), jnp.float32),
        "sa_ln1_a": jnp.ones((d_img,), jnp.float32),
        "sa_ln1_b": jnp.zeros((d_img,), jnp.float32),
        "sa_ln2_a": jnp.ones((d_img,), jnp.float32),
        "sa_ln2_b": jnp.zeros((d_img,), jnp.float32),
        # --- Cross-attention block: fused [qk|v] projections per modality ---
        "img_qkv_w": jnp.concatenate([w(ks[6], (d_img, inner)),
                                      w(ks[8], (d_img, inner))], axis=1),
        "aud_qkv_w": jnp.concatenate([w(ks[7], (d_aud, inner)),
                                      w(ks[9], (d_aud, inner))], axis=1),
        "to_out_w": w(ks[10], (inner, d_img)),
        "to_out_b": jnp.zeros((d_img,), jnp.float32),
        "ctx_to_out_w": w(ks[11], (inner, d_aud)),
        "ctx_to_out_b": jnp.zeros((d_aud,), jnp.float32),
        "c_ln1_a": jnp.ones((d_img,), jnp.float32),
        "c_ln1_b": jnp.zeros((d_img,), jnp.float32),
        "c_ln2_a": jnp.ones((d_aud,), jnp.float32),
        "c_ln2_b": jnp.zeros((d_aud,), jnp.float32),
    }


def sa2_forward(p, image, audio, n_head, head_dim):
    B, Li, Di = image.shape
    _, La, Da = audio.shape
    inner = n_head * head_dim
    cdt = jnp.bfloat16

    x2 = image.reshape(B * Li, Di).astype(cdt)
    a2 = audio.reshape(B * La, Da).astype(cdt)

    # ---- SA: y = norm1(y + MHAtt(y,y,y)); y = norm2(y + FFN(y)) ----
    q = matmul_bias(x2, p["q_w"], p["q_b"])                  # (B*Li, Di)   bf16
    kv = matmul_bias(x2, p["kv_w"], p["kv_b"])               # (B*Li, 2*Di) bf16
    att = mha_flash(q.reshape(B, Li, Di),
                    kv.reshape(B, Li, 2 * Di), n_head)       # (B, Li, Di)  bf16
    y = linear_residual_layernorm(att.reshape(B * Li, Di),   # merge+res+LN fused
                                  p["m_w"], p["m_b"], x2,
                                  p["sa_ln1_a"], p["sa_ln1_b"])
    y = ffn_fused(y, p["ffn_w1"], p["ffn_b1"], p["ffn_w2"], p["ffn_b2"],
                  p["sa_ln2_a"], p["sa_ln2_b"])               # (B*Li, Di) bf16

    # ---- Bidirectional cross-attention ----
    zeros_2i = jnp.zeros((2 * inner,), jnp.float32)           # bias-free projections
    img_qk_v = matmul_bias(y, p["img_qkv_w"], zeros_2i)       # (B*Li, 2*inner)
    aud_qk_v = matmul_bias(a2, p["aud_qkv_w"], zeros_2i)      # (B*La, 2*inner)

    img_o, aud_o = bidir_cross_attn_fused(
        img_qk_v.reshape(B, Li, 2 * inner),
        aud_qk_v.reshape(B, La, 2 * inner),
        n_head, head_dim)

    # Crossattention wrapper: norm(out + dropout(out)) -> norm(2*out) in eval,
    # fused with the output projections.
    image_out = linear_double_layernorm(img_o.reshape(B * Li, inner),
                                        p["to_out_w"], p["to_out_b"],
                                        p["c_ln1_a"], p["c_ln1_b"],
                                        out_dtype=jnp.float32)
    audio_out = linear_double_layernorm(aud_o.reshape(B * La, inner),
                                        p["ctx_to_out_w"], p["ctx_to_out_b"],
                                        p["c_ln2_a"], p["c_ln2_b"],
                                        out_dtype=jnp.float32)

    return image_out.reshape(B, Li, Di), audio_out.reshape(B, La, Da)


# ---------------------------------------------------------------------------
# Main
# ---------------------------------------------------------------------------

if __name__ == "__main__":
    # Small shapes consistent with the module (scaled down from 2048/1920 defaults).
    B = 2
    Li, La = 8, 6
    D_IMG, D_AUD = 32, 24
    N_HEAD = 4
    HEAD_DIM = 16   # SA2's `head_dim` -> FFN mid size and cross-attn dim_head

    key = jax.random.PRNGKey(0)
    k_img, k_aud, k_par = jax.random.split(key, 3)

    image = jax.random.normal(k_img, (B, Li, D_IMG), jnp.float32)
    audio = jax.random.normal(k_aud, (B, La, D_AUD), jnp.float32)

    params = init_params(k_par, D_IMG, D_AUD, N_HEAD, HEAD_DIM)

    fwd = jax.jit(functools.partial(sa2_forward, n_head=N_HEAD, head_dim=HEAD_DIM))
    image_out, audio_out = fwd(params, image, audio)
    jax.block_until_ready((image_out, audio_out))

    assert image_out.shape == (B, Li, D_IMG), image_out.shape
    assert audio_out.shape == (B, La, D_AUD), audio_out.shape
    assert bool(jnp.all(jnp.isfinite(image_out)))
    assert bool(jnp.all(jnp.isfinite(audio_out)))

    print("KERNEL_OK")
</pallas_src>

<mosaic_0001>
module attributes {stable_mosaic.version = 11 : i64} {
  func.func @_matmul_bias_kernel(%arg0: i32, %arg1: i32, %arg2: i32, %arg3: memref<12x24xbf16, #tpu.memory_space<vmem>>, %arg4: memref<24x128xbf16, #tpu.memory_space<vmem>>, %arg5: memref<1x128xf32, #tpu.memory_space<vmem>>, %arg6: memref<12x128xbf16, #tpu.memory_space<vmem>>, %arg7: memref<12x128xf32, #tpu.memory_space<vmem>>) attributes {dimension_semantics = [#tpu.dimension_semantics<parallel>, #tpu.dimension_semantics<parallel>, #tpu.dimension_semantics<arbitrary>], iteration_bounds = array<i64: 1, 1, 1>, scalar_prefetch = 0 : i64, scratch_operands = 1 : i64, tpu.core_type = #tpu.core_type<tc>, window_params = [{transform_indices = @transform_0, window_bounds = array<i64: 12, 24>}, {transform_indices = @transform_1, window_bounds = array<i64: 24, 128>}, {transform_indices = @transform_2, window_bounds = array<i64: 1, 128>}, {transform_indices = @transform_3, window_bounds = array<i64: 12, 128>}]} {
    %c0_i32 = arith.constant 0 : i32
    %0 = arith.cmpi eq, %arg2, %c0_i32 : i32
    %1 = arith.extui %0 : i1 to i32
    %c0_i32_0 = arith.constant 0 : i32
    %2 = arith.cmpi ne, %1, %c0_i32_0 : i32
    scf.if %2 {
      %cst_10 = arith.constant 0.000000e+00 : f32
      %12 = vector.broadcast %cst_10 : f32 to vector<12x128xf32>
      %c0_11 = arith.constant 0 : index
      %c0_12 = arith.constant 0 : index
      %13 = vector.load %arg7[%c0_11, %c0_12] : memref<12x128xf32, #tpu.memory_space<vmem>>, vector<12x128xf32>
      tpu.vector_store %arg7[%c0_11, %c0_12], %12 {strides = array<i32>} : memref<12x128xf32, #tpu.memory_space<vmem>>, vector<12x128xf32>,
    } else {
    }
    %c0 = arith.constant 0 : index
    %c0_1 = arith.constant 0 : index
    %3 = vector.load %arg7[%c0, %c0_1] : memref<12x128xf32, #tpu.memory_space<vmem>>, vector<12x128xf32>
    %c0_2 = arith.constant 0 : index
    %c0_3 = arith.constant 0 : index
    %4 = vector.load %arg3[%c0_2, %c0_3] : memref<12x24xbf16, #tpu.memory_space<vmem>>, vector<12x24xbf16>
    %c0_4 = arith.constant 0 : index
    %c0_5 = arith.constant 0 : index
    %5 = vector.load %arg4[%c0_4, %c0_5] : memref<24x128xbf16, #tpu.memory_space<vmem>>, vector<24x128xbf16>
    %cst = arith.constant dense<0.000000e+00> : vector<12x128xf32>
    %6 = tpu.matmul %4, %5, %cst {dimension_numbers = #tpu.dot_dimension_numbers<[1], [0], [0], [1], [0, 0, 1, 1], [], []>} : vector<12x24xbf16>, vector<24x128xbf16>, vector<12x128xf32> -> vector<12x128xf32>
    %7 = arith.addf %3, %6 : vector<12x128xf32>
    %c0_6 = arith.constant 0 : index
    %c0_7 = arith.constant 0 : index
    %8 = vector.load %arg7[%c0_6, %c0_7] : memref<12x128xf32, #tpu.memory_space<vmem>>, vector<12x128xf32>
    tpu.vector_store %arg7[%c0_6, %c0_7], %7 {strides = array<i32>} : memref<12x128xf32, #tpu.memory_space<vmem>>, vector<12x128xf32>,
    %c0_i32_8 = arith.constant 0 : i32
    %9 = arith.cmpi eq, %arg2, %c0_i32_8 : i32
    %10 = arith.extui %9 : i1 to i32
    %c0_i32_9 = arith.constant 0 : i32
    %11 = arith.cmpi ne, %10, %c0_i32_9 : i32
    scf.if %11 {
      %c0_10 = arith.constant 0 : index
      %c0_11 = arith.constant 0 : index
      %12 = vector.load %arg7[%c0_10, %c0_11] : memref<12x128xf32, #tpu.memory_space<vmem>>, vector<12x128xf32>
      %c0_12 = arith.constant 0 : index
      %c0_13 = arith.constant 0 : index
      %13 = vector.load %arg5[%c0_12, %c0_13] : memref<1x128xf32, #tpu.memory_space<vmem>>, vector<1x128xf32>
      %14 = vector.broadcast %13 : vector<1x128xf32> to vector<12x128xf32>
      %15 = arith.addf %12, %14 : vector<12x128xf32>
      %16 = arith.truncf %15 : vector<12x128xf32> to vector<12x128xbf16>
      %c0_14 = arith.constant 0 : index
      %c0_15 = arith.constant 0 : index
      %17 = vector.load %arg6[%c0_14, %c0_15] : memref<12x128xbf16, #tpu.memory_space<vmem>>, vector<12x128xbf16>
      tpu.vector_store %arg6[%c0_14, %c0_15], %16 {strides = array<i32>} : memref<12x128xbf16, #tpu.memory_space<vmem>>, vector<12x128xbf16>,
    } else {
    }
    return
  }
  func.func @transform_0(%arg0: i32, %arg1: i32, %arg2: i32) -> (i32, i32) {
    %c0_i32 = arith.constant 0 : i32
    return %arg0, %arg2 : i32, i32
  }
  func.func @transform_1(%arg0: i32, %arg1: i32, %arg2: i32) -> (i32, i32) {
    %c0_i32 = arith.constant 0 : i32
    return %arg2, %arg1 : i32, i32
  }
  func.func @transform_2(%arg0: i32, %arg1: i32, %arg2: i32) -> (i32, i32) {
    %c0_i32 = arith.constant 0 : i32
    %c0_i32_0 = arith.constant 0 : i32
    return %c0_i32, %arg1 : i32, i32
  }
  func.func @transform_3(%arg0: i32, %arg1: i32, %arg2: i32) -> (i32, i32) {
    %c0_i32 = arith.constant 0 : i32
    return %arg0, %arg1 : i32, i32
  }
}

module attributes {stable_mosaic.version = 11 : i64} {
  func.func @_matmul_bias_kernel(%arg0: i32, %arg1: i32, %arg2: i32, %arg3: memref<16x32xbf16, #tpu.memory_space<vmem>>, %arg4: memref<32x32xbf16, #tpu.memory_space<vmem>>, %arg5: memref<1x32xf32, #tpu.memory_space<vmem>>, %arg6: memref<16x32xbf16, #tpu.memory_space<vmem>>, %arg7: memref<16x32xf32, #tpu.memory_space<vmem>>) attributes {dimension_semantics = [#tpu.dimension_semantics<parallel>, #tpu.dimension_semantics<parallel>, #tpu.dimension_semantics<arbitrary>], iteration_bounds = array<i64: 1, 1, 1>, scalar_prefetch = 0 : i64, scratch_operands = 1 : i64, tpu.core_type = #tpu.core_type<tc>, window_params = [{transform_indices = @transform_0, window_bounds = array<i64: 16, 32>}, {transform_indices = @transform_1, window_bounds = array<i64: 32, 32>}, {transform_indices = @transform_2, window_bounds = array<i64: 1, 32>}, {transform_indices = @transform_3, window_bounds = array<i64: 16, 32>}]} {
    %c0_i32 = arith.constant 0 : i32
    %0 = arith.cmpi eq, %arg2, %c0_i32 : i32
    %1 = arith.extui %0 : i1 to i32
    %c0_i32_0 = arith.constant 0 : i32
    %2 = arith.cmpi ne, %1, %c0_i32_0 : i32
    scf.if %2 {
      %cst_10 = arith.constant 0.000000e+00 : f32
      %12 = vector.broadcast %cst_10 : f32 to vector<16x32xf32>
      %c0_11 = arith.constant 0 : index
      %c0_12 = arith.constant 0 : index
      %13 = vector.load %arg7[%c0_11, %c0_12] : memref<16x32xf32, #tpu.memory_space<vmem>>, vector<16x32xf32>
      tpu.vector_store %arg7[%c0_11, %c0_12], %12 {strides = array<i32>} : memref<16x32xf32, #tpu.memory_space<vmem>>, vector<16x32xf32>,
    } else {
    }
    %c0 = arith.constant 0 : index
    %c0_1 = arith.constant 0 : index
    %3 = vector.load %arg7[%c0, %c0_1] : memref<16x32xf32, #tpu.memory_space<vmem>>, vector<16x32xf32>
    %c0_2 = arith.constant 0 : index
    %c0_3 = arith.constant 0 : index
    %4 = vector.load %arg3[%c0_2, %c0_3] : memref<16x32xbf16, #tpu.memory_space<vmem>>, vector<16x32xbf16>
    %c0_4 = arith.constant 0 : index
    %c0_5 = arith.constant 0 : index
    %5 = vector.load %arg4[%c0_4, %c0_5] : memref<32x32xbf16, #tpu.memory_space<vmem>>, vector<32x32xbf16>
    %cst = arith.constant dense<0.000000e+00> : vector<16x32xf32>
    %6 = tpu.matmul %4, %5, %cst {dimension_numbers = #tpu.dot_dimension_numbers<[1], [0], [0], [1], [0, 0, 1, 1], [], []>} : vector<16x32xbf16>, vector<32x32xbf16>, vector<16x32xf32> -> vector<16x32xf32>
    %7 = arith.addf %3, %6 : vector<16x32xf32>
    %c0_6 = arith.constant 0 : index
    %c0_7 = arith.constant 0 : index
    %8 = vector.load %arg7[%c0_6, %c0_7] : memref<16x32xf32, #tpu.memory_space<vmem>>, vector<16x32xf32>
    tpu.vector_store %arg7[%c0_6, %c0_7], %7 {strides = array<i32>} : memref<16x32xf32, #tpu.memory_space<vmem>>, vector<16x32xf32>,
    %c0_i32_8 = arith.constant 0 : i32
    %9 = arith.cmpi eq, %arg2, %c0_i32_8 : i32
    %10 = arith.extui %9 : i1 to i32
    %c0_i32_9 = arith.constant 0 : i32
    %11 = arith.cmpi ne, %10, %c0_i32_9 : i32
    scf.if %11 {
      %c0_10 = arith.constant 0 : index
      %c0_11 = arith.constant 0 : index
      %12 = vector.load %arg7[%c0_10, %c0_11] : memref<16x32xf32, #tpu.memory_space<vmem>>, vector<16x32xf32>
      %c0_12 = arith.constant 0 : index
      %c0_13 = arith.constant 0 : index
      %13 = vector.load %arg5[%c0_12, %c0_13] : memref<1x32xf32, #tpu.memory_space<vmem>>, vector<1x32xf32>
      %14 = vector.broadcast %13 : vector<1x32xf32> to vector<16x32xf32>
      %15 = arith.addf %12, %14 : vector<16x32xf32>
      %16 = arith.truncf %15 : vector<16x32xf32> to vector<16x32xbf16>
      %c0_14 = arith.constant 0 : index
      %c0_15 = arith.constant 0 : index
      %17 = vector.load %arg6[%c0_14, %c0_15] : memref<16x32xbf16, #tpu.memory_space<vmem>>, vector<16x32xbf16>
      tpu.vector_store %arg6[%c0_14, %c0_15], %16 {strides = array<i32>} : memref<16x32xbf16, #tpu.memory_space<vmem>>, vector<16x32xbf16>,
    } else {
    }
    return
  }
  func.func @transform_0(%arg0: i32, %arg1: i32, %arg2: i32) -> (i32, i32) {
    %c0_i32 = arith.constant 0 : i32
    return %arg0, %arg2 : i32, i32
  }
  func.func @transform_1(%arg0: i32, %arg1: i32, %arg2: i32) -> (i32, i32) {
    %c0_i32 = arith.constant 0 : i32
    return %arg2, %arg1 : i32, i32
  }
  func.func @transform_2(%arg0: i32, %arg1: i32, %arg2: i32) -> (i32, i32) {
    %c0_i32 = arith.constant 0 : i32
    %c0_i32_0 = arith.constant 0 : i32
    return %c0_i32, %arg1 : i32, i32
  }
  func.func @transform_3(%arg0: i32, %arg1: i32, %arg2: i32) -> (i32, i32) {
    %c0_i32 = arith.constant 0 : i32
    return %arg0, %arg1 : i32, i32
  }
}

module attributes {stable_mosaic.version = 11 : i64} {
  func.func @_matmul_bias_kernel(%arg0: i32, %arg1: i32, %arg2: i32, %arg3: memref<16x32xbf16, #tpu.memory_space<vmem>>, %arg4: memref<32x64xbf16, #tpu.memory_space<vmem>>, %arg5: memref<1x64xf32, #tpu.memory_space<vmem>>, %arg6: memref<16x64xbf16, #tpu.memory_space<vmem>>, %arg7: memref<16x64xf32, #tpu.memory_space<vmem>>) attributes {dimension_semantics = [#tpu.dimension_semantics<parallel>, #tpu.dimension_semantics<parallel>, #tpu.dimension_semantics<arbitrary>], iteration_bounds = array<i64: 1, 1, 1>, scalar_prefetch = 0 : i64, scratch_operands = 1 : i64, tpu.core_type = #tpu.core_type<tc>, window_params = [{transform_indices = @transform_0, window_bounds = array<i64: 16, 32>}, {transform_indices = @transform_1, window_bounds = array<i64: 32, 64>}, {transform_indices = @transform_2, window_bounds = array<i64: 1, 64>}, {transform_indices = @transform_3, window_bounds = array<i64: 16, 64>}]} {
    %c0_i32 = arith.constant 0 : i32
    %0 = arith.cmpi eq, %arg2, %c0_i32 : i32
    %1 = arith.extui %0 : i1 to i32
    %c0_i32_0 = arith.constant 0 : i32
    %2 = arith.cmpi ne, %1, %c0_i32_0 : i32
    scf.if %2 {
      %cst_10 = arith.constant 0.000000e+00 : f32
      %12 = vector.broadcast %cst_10 : f32 to vector<16x64xf32>
      %c0_11 = arith.constant 0 : index
      %c0_12 = arith.constant 0 : index
      %13 = vector.load %arg7[%c0_11, %c0_12] : memref<16x64xf32, #tpu.memory_space<vmem>>, vector<16x64xf32>
      tpu.vector_store %arg7[%c0_11, %c0_12], %12 {strides = array<i32>} : memref<16x64xf32, #tpu.memory_space<vmem>>, vector<16x64xf32>,
    } else {
    }
    %c0 = arith.constant 0 : index
    %c0_1 = arith.constant 0 : index
    %3 = vector.load %arg7[%c0, %c0_1] : memref<16x64xf32, #tpu.memory_space<vmem>>, vector<16x64xf32>
    %c0_2 = arith.constant 0 : index
    %c0_3 = arith.constant 0 : index
    %4 = vector.load %arg3[%c0_2, %c0_3] : memref<16x32xbf16, #tpu.memory_space<vmem>>, vector<16x32xbf16>
    %c0_4 = arith.constant 0 : index
    %c0_5 = arith.constant 0 : index
    %5 = vector.load %arg4[%c0_4, %c0_5] : memref<32x64xbf16, #tpu.memory_space<vmem>>, vector<32x64xbf16>
    %cst = arith.constant dense<0.000000e+00> : vector<16x64xf32>
    %6 = tpu.matmul %4, %5, %cst {dimension_numbers = #tpu.dot_dimension_numbers<[1], [0], [0], [1], [0, 0, 1, 1], [], []>} : vector<16x32xbf16>, vector<32x64xbf16>, vector<16x64xf32> -> vector<16x64xf32>
    %7 = arith.addf %3, %6 : vector<16x64xf32>
    %c0_6 = arith.constant 0 : index
    %c0_7 = arith.constant 0 : index
    %8 = vector.load %arg7[%c0_6, %c0_7] : memref<16x64xf32, #tpu.memory_space<vmem>>, vector<16x64xf32>
    tpu.vector_store %arg7[%c0_6, %c0_7], %7 {strides = array<i32>} : memref<16x64xf32, #tpu.memory_space<vmem>>, vector<16x64xf32>,
    %c0_i32_8 = arith.constant 0 : i32
    %9 = arith.cmpi eq, %arg2, %c0_i32_8 : i32
    %10 = arith.extui %9 : i1 to i32
    %c0_i32_9 = arith.constant 0 : i32
    %11 = arith.cmpi ne, %10, %c0_i32_9 : i32
    scf.if %11 {
      %c0_10 = arith.constant 0 : index
      %c0_11 = arith.constant 0 : index
      %12 = vector.load %arg7[%c0_10, %c0_11] : memref<16x64xf32, #tpu.memory_space<vmem>>, vector<16x64xf32>
      %c0_12 = arith.constant 0 : index
      %c0_13 = arith.constant 0 : index
      %13 = vector.load %arg5[%c0_12, %c0_13] : memref<1x64xf32, #tpu.memory_space<vmem>>, vector<1x64xf32>
      %14 = vector.broadcast %13 : vector<1x64xf32> to vector<16x64xf32>
      %15 = arith.addf %12, %14 : vector<16x64xf32>
      %16 = arith.truncf %15 : vector<16x64xf32> to vector<16x64xbf16>
      %c0_14 = arith.constant 0 : index
      %c0_15 = arith.constant 0 : index
      %17 = vector.load %arg6[%c0_14, %c0_15] : memref<16x64xbf16, #tpu.memory_space<vmem>>, vector<16x64xbf16>
      tpu.vector_store %arg6[%c0_14, %c0_15], %16 {strides = array<i32>} : memref<16x64xbf16, #tpu.memory_space<vmem>>, vector<16x64xbf16>,
    } else {
    }
    return
  }
  func.func @transform_0(%arg0: i32, %arg1: i32, %arg2: i32) -> (i32, i32) {
    %c0_i32 = arith.constant 0 : i32
    return %arg0, %arg2 : i32, i32
  }
  func.func @transform_1(%arg0: i32, %arg1: i32, %arg2: i32) -> (i32, i32) {
    %c0_i32 = arith.constant 0 : i32
    return %arg2, %arg1 : i32, i32
  }
  func.func @transform_2(%arg0: i32, %arg1: i32, %arg2: i32) -> (i32, i32) {
    %c0_i32 = arith.constant 0 : i32
    %c0_i32_0 = arith.constant 0 : i32
    return %c0_i32, %arg1 : i32, i32
  }
  func.func @transform_3(%arg0: i32, %arg1: i32, %arg2: i32) -> (i32, i32) {
    %c0_i32 = arith.constant 0 : i32
    return %arg0, %arg1 : i32, i32
  }
}

module attributes {stable_mosaic.version = 11 : i64} {
  func.func @_mha_flash_kernel(%arg0: i32, %arg1: i32, %arg2: i32, %arg3: memref<1x8x32xbf16, #tpu.memory_space<vmem>>, %arg4: memref<1x8x64xbf16, #tpu.memory_space<vmem>>, %arg5: memref<1x8x32xbf16, #tpu.memory_space<vmem>>, %arg6: memref<4x8x1xf32, #tpu.memory_space<vmem>>, %arg7: memref<4x8x1xf32, #tpu.memory_space<vmem>>, %arg8: memref<4x8x8xf32, #tpu.memory_space<vmem>>) attributes {dimension_semantics = [#tpu.dimension_semantics<parallel>, #tpu.dimension_semantics<parallel>, #tpu.dimension_semantics<arbitrary>], iteration_bounds = array<i64: 2, 1, 1>, scalar_prefetch = 0 : i64, scratch_operands = 3 : i64, tpu.core_type = #tpu.core_type<tc>, window_params = [{transform_indices = @transform_0, window_bounds = array<i64: 1, 8, 32>}, {transform_indices = @transform_1, window_bounds = array<i64: 1, 8, 64>}, {transform_indices = @transform_2, window_bounds = array<i64: 1, 8, 32>}]} {
    %c0_i32 = arith.constant 0 : i32
    %0 = arith.cmpi eq, %arg2, %c0_i32 : i32
    %1 = arith.extui %0 : i1 to i32
    %c0_i32_0 = arith.constant 0 : i32
    %2 = arith.cmpi ne, %1, %c0_i32_0 : i32
    scf.if %2 {
      %cst_96 = arith.constant 0xFF800000 : f32
      %162 = vector.broadcast %cst_96 : f32 to vector<4x8x1xf32>
      %c0_97 = arith.constant 0 : index
      %c0_98 = arith.constant 0 : index
      %c0_99 = arith.constant 0 : index
      %163 = vector.load %arg6[%c0_97, %c0_98, %c0_99] : memref<4x8x1xf32, #tpu.memory_space<vmem>>, vector<4x8x1xf32>
      tpu.vector_store %arg6[%c0_97, %c0_98, %c0_99], %162 {strides = array<i32>} : memref<4x8x1xf32, #tpu.memory_space<vmem>>, vector<4x8x1xf32>,
      %cst_100 = arith.constant 0.000000e+00 : f32
      %164 = vector.broadcast %cst_100 : f32 to vector<4x8x1xf32>
      %c0_101 = arith.constant 0 : index
      %c0_102 = arith.constant 0 : index
      %c0_103 = arith.constant 0 : index
      %165 = vector.load %arg7[%c0_101, %c0_102, %c0_103] : memref<4x8x1xf32, #tpu.memory_space<vmem>>, vector<4x8x1xf32>
      tpu.vector_store %arg7[%c0_101, %c0_102, %c0_103], %164 {strides = array<i32>} : memref<4x8x1xf32, #tpu.memory_space<vmem>>, vector<4x8x1xf32>,
      %cst_104 = arith.constant 0.000000e+00 : f32
      %166 = vector.broadcast %cst_104 : f32 to vector<4x8x8xf32>
      %c0_105 = arith.constant 0 : index
      %c0_106 = arith.constant 0 : index
      %c0_107 = arith.constant 0 : index
      %167 = vector.load %arg8[%c0_105, %c0_106, %c0_107] : memref<4x8x8xf32, #tpu.memory_space<vmem>>, vector<4x8x8xf32>
      tpu.vector_store %arg8[%c0_105, %c0_106, %c0_107], %166 {strides = array<i32>} : memref<4x8x8xf32, #tpu.memory_space<vmem>>, vector<4x8x8xf32>,
    } else {
    }
    %c0 = arith.constant 0 : index
    %c0_1 = arith.constant 0 : index
    %c0_2 = arith.constant 0 : index
    %3 = vector.load %arg3[%c0, %c0_1, %c0_2] : memref<1x8x32xbf16, #tpu.memory_space<vmem>>, vector<1x8x32xbf16>
    %4 = vector.shape_cast %3 : vector<1x8x32xbf16> to vector<8x32xbf16>
    %c0_3 = arith.constant 0 : index
    %c0_4 = arith.constant 0 : index
    %c0_5 = arith.constant 0 : index
    %5 = vector.load %arg4[%c0_3, %c0_4, %c0_5] : memref<1x8x64xbf16, #tpu.memory_space<vmem>>, vector<1x8x64xbf16>
    %6 = vector.shape_cast %5 : vector<1x8x64xbf16> to vector<8x64xbf16>
    %7 = vector.extract_strided_slice %4 {offsets = [0, 0], sizes = [8, 8], strides = [1, 1]} : vector<8x32xbf16> to vector<8x8xbf16>
    %cst = arith.constant 3.535160e-01 : bf16
    %8 = vector.broadcast %cst : bf16 to vector<8x8xbf16>
    %9 = arith.mulf %7, %8 : vector<8x8xbf16>
    %10 = vector.extract_strided_slice %6 {offsets = [0, 0], sizes = [8, 8], strides = [1, 1]} : vector<8x64xbf16> to vector<8x8xbf16>
    %11 = vector.extract_strided_slice %6 {offsets = [0, 32], sizes = [8, 8], strides = [1, 1]} : vector<8x64xbf16> to vector<8x8xbf16>
    %cst_6 = arith.constant dense<0.000000e+00> : vector<8x8xf32>
    %12 = tpu.matmul %9, %10, %cst_6 {dimension_numbers = #tpu.dot_dimension_numbers<[1], [1], [0], [0], [0, 0, 1, 0], [], []>} : vector<8x8xbf16>, vector<8x8xbf16>, vector<8x8xf32> -> vector<8x8xf32>
    %c0_7 = arith.constant 0 : index
    %c0_8 = arith.constant 0 : index
    %c0_9 = arith.constant 0 : index
    %13 = vector.load %arg6[%c0_7, %c0_8, %c0_9] : memref<4x8x1xf32, #tpu.memory_space<vmem>>, vector<1x8x1xf32>
    %14 = vector.shape_cast %13 : vector<1x8x1xf32> to vector<8x1xf32>
    %cst_10 = arith.constant dense<0xFF800000> : vector<8xf32>
    %15 = vector.multi_reduction <maximumf>, %12, %cst_10 [1] : vector<8x8xf32> to vector<8xf32>
    %16 = vector.shape_cast %15 : vector<8xf32> to vector<8x1xf32>
    %17 = arith.maximumf %14, %16 : vector<8x1xf32>
    %18 = arith.subf %14, %17 : vector<8x1xf32>
    %19 = math.exp %18 : vector<8x1xf32>
    %20 = vector.broadcast %17 : vector<8x1xf32> to vector<8x8xf32>
    %21 = arith.subf %12, %20 : vector<8x8xf32>
    %22 = math.exp %21 : vector<8x8xf32>
    %c0_11 = arith.constant 0 : index
    %c0_12 = arith.constant 0 : index
    %c0_13 = arith.constant 0 : index
    %23 = vector.load %arg7[%c0_11, %c0_12, %c0_13] : memref<4x8x1xf32, #tpu.memory_space<vmem>>, vector<1x8x1xf32>
    %24 = vector.shape_cast %23 : vector<1x8x1xf32> to vector<8x1xf32>
    %25 = arith.mulf %19, %24 : vector<8x1xf32>
    %cst_14 = arith.constant dense<0.000000e+00> : vector<8xf32>
    %26 = vector.multi_reduction <add>, %22, %cst_14 [1] : vector<8x8xf32> to vector<8xf32>
    %27 = vector.shape_cast %26 : vector<8xf32> to vector<8x1xf32>
    %28 = arith.addf %25, %27 : vector<8x1xf32>
    %c0_15 = arith.constant 0 : index
    %c0_16 = arith.constant 0 : index
    %c0_17 = arith.constant 0 : index
    %29 = vector.load %arg7[%c0_15, %c0_16, %c0_17] : memref<4x8x1xf32, #tpu.memory_space<vmem>>, vector<1x8x1xf32>
    %30 = vector.shape_cast %29 : vector<1x8x1xf32> to vector<8x1xf32>
    %31 = vector.shape_cast %28 : vector<8x1xf32> to vector<1x8x1xf32>
    tpu.vector_store %arg7[%c0_15, %c0_16, %c0_17], %31 {strides = array<i32>} : memref<4x8x1xf32, #tpu.memory_space<vmem>>, vector<1x8x1xf32>,
    %c0_18 = arith.constant 0 : index
    %c0_19 = arith.constant 0 : index
    %c0_20 = arith.constant 0 : index
    %32 = vector.load %arg8[%c0_18, %c0_19, %c0_20] : memref<4x8x8xf32, #tpu.memory_space<vmem>>, vector<1x8x8xf32>
    %33 = vector.shape_cast %32 : vector<1x8x8xf32> to vector<8x8xf32>
    %34 = vector.broadcast %19 : vector<8x1xf32> to vector<8x8xf32>
    %35 = arith.mulf %34, %33 : vector<8x8xf32>
    %36 = arith.truncf %22 : vector<8x8xf32> to vector<8x8xbf16>
    %cst_21 = arith.constant dense<0.000000e+00> : vector<8x8xf32>
    %37 = tpu.matmul %36, %11, %cst_21 {dimension_numbers = #tpu.dot_dimension_numbers<[1], [0], [0], [1], [0, 0, 1, 1], [], []>} : vector<8x8xbf16>, vector<8x8xbf16>, vector<8x8xf32> -> vector<8x8xf32>
    %38 = arith.addf %35, %37 : vector<8x8xf32>
    %c0_22 = arith.constant 0 : index
    %c0_23 = arith.constant 0 : index
    %c0_24 = arith.constant 0 : index
    %39 = vector.load %arg8[%c0_22, %c0_23, %c0_24] : memref<4x8x8xf32, #tpu.memory_space<vmem>>, vector<1x8x8xf32>
    %40 = vector.shape_cast %39 : vector<1x8x8xf32> to vector<8x8xf32>
    %41 = vector.shape_cast %38 : vector<8x8xf32> to vector<1x8x8xf32>
    tpu.vector_store %arg8[%c0_22, %c0_23, %c0_24], %41 {strides = array<i32>} : memref<4x8x8xf32, #tpu.memory_space<vmem>>, vector<1x8x8xf32>,
    %c0_25 = arith.constant 0 : index
    %c0_26 = arith.constant 0 : index
    %c0_27 = arith.constant 0 : index
    %42 = vector.load %arg6[%c0_25, %c0_26, %c0_27] : memref<4x8x1xf32, #tpu.memory_space<vmem>>, vector<1x8x1xf32>
    %43 = vector.shape_cast %42 : vector<1x8x1xf32> to vector<8x1xf32>
    %44 = vector.shape_cast %17 : vector<8x1xf32> to vector<1x8x1xf32>
    tpu.vector_store %arg6[%c0_25, %c0_26, %c0_27], %44 {strides = array<i32>} : memref<4x8x1xf32, #tpu.memory_space<vmem>>, vector<1x8x1xf32>,
    %45 = vector.extract_strided_slice %4 {offsets = [0, 8], sizes = [8, 8], strides = [1, 1]} : vector<8x32xbf16> to vector<8x8xbf16>
    %cst_28 = arith.constant 3.535160e-01 : bf16
    %46 = vector.broadcast %cst_28 : bf16 to vector<8x8xbf16>
    %47 = arith.mulf %45, %46 : vector<8x8xbf16>
    %48 = vector.extract_strided_slice %6 {offsets = [0, 8], sizes = [8, 8], strides = [1, 1]} : vector<8x64xbf16> to vector<8x8xbf16>
    %49 = vector.extract_strided_slice %6 {offsets = [0, 40], sizes = [8, 8], strides = [1, 1]} : vector<8x64xbf16> to vector<8x8xbf16>
    %cst_29 = arith.constant dense<0.000000e+00> : vector<8x8xf32>
    %50 = tpu.matmul %47, %48, %cst_29 {dimension_numbers = #tpu.dot_dimension_numbers<[1], [1], [0], [0], [0, 0, 1, 0], [], []>} : vector<8x8xbf16>, vector<8x8xbf16>, vector<8x8xf32> -> vector<8x8xf32>
    %c1 = arith.constant 1 : index
    %c0_30 = arith.constant 0 : index
    %c0_31 = arith.constant 0 : index
    %51 = vector.load %arg6[%c1, %c0_30, %c0_31] : memref<4x8x1xf32, #tpu.memory_space<vmem>>, vector<1x8x1xf32>
    %52 = vector.shape_cast %51 : vector<1x8x1xf32> to vector<8x1xf32>
    %cst_32 = arith.constant dense<0xFF800000> : vector<8xf32>
    %53 = vector.multi_reduction <maximumf>, %50, %cst_32 [1] : vector<8x8xf32> to vector<8xf32>
    %54 = vector.shape_cast %53 : vector<8xf32> to vector<8x1xf32>
    %55 = arith.maximumf %52, %54 : vector<8x1xf32>
    %56 = arith.subf %52, %55 : vector<8x1xf32>
    %57 = math.exp %56 : vector<8x1xf32>
    %58 = vector.broadcast %55 : vector<8x1xf32> to vector<8x8xf32>
    %59 = arith.subf %50, %58 : vector<8x8xf32>
    %60 = math.exp %59 : vector<8x8xf32>
    %c1_33 = arith.constant 1 : index
    %c0_34 = arith.constant 0 : index
    %c0_35 = arith.constant 0 : index
    %61 = vector.load %arg7[%c1_33, %c0_34, %c0_35] : memref<4x8x1xf32, #tpu.memory_space<vmem>>, vector<1x8x1xf32>
    %62 = vector.shape_cast %61 : vector<1x8x1xf32> to vector<8x1xf32>
    %63 = arith.mulf %57, %62 : vector<8x1xf32>
    %cst_36 = arith.constant dense<0.000000e+00> : vector<8xf32>
    %64 = vector.multi_reduction <add>, %60, %cst_36 [1] : vector<8x8xf32> to vector<8xf32>
    %65 = vector.shape_cast %64 : vector<8xf32> to vector<8x1xf32>
    %66 = arith.addf %63, %65 : vector<8x1xf32>
    %c1_37 = arith.constant 1 : index
    %c0_38 = arith.constant 0 : index
    %c0_39 = arith.constant 0 : index
    %67 = vector.load %arg7[%c1_37, %c0_38, %c0_39] : memref<4x8x1xf32, #tpu.memory_space<vmem>>, vector<1x8x1xf32>
    %68 = vector.shape_cast %67 : vector<1x8x1xf32> to vector<8x1xf32>
    %69 = vector.shape_cast %66 : vector<8x1xf32> to vector<1x8x1xf32>
    tpu.vector_store %arg7[%c1_37, %c0_38, %c0_39], %69 {strides = array<i32>} : memref<4x8x1xf32, #tpu.memory_space<vmem>>, vector<1x8x1xf32>,
    %c1_40 = arith.constant 1 : index
    %c0_41 = arith.constant 0 : index
    %c0_42 = arith.constant 0 : index
    %70 = vector.load %arg8[%c1_40, %c0_41, %c0_42] : memref<4x8x8xf32, #tpu.memory_space<vmem>>, vector<1x8x8xf32>
    %71 = vector.shape_cast %70 : vector<1x8x8xf32> to vector<8x8xf32>
    %72 = vector.broadcast %57 : vector<8x1xf32> to vector<8x8xf32>
    %73 = arith.mulf %72, %71 : vector<8x8xf32>
    %74 = arith.truncf %60 : vector<8x8xf32> to vector<8x8xbf16>
    %cst_43 = arith.constant dense<0.000000e+00> : vector<8x8xf32>
    %75 = tpu.matmul %74, %49, %cst_43 {dimension_numbers = #tpu.dot_dimension_numbers<[1], [0], [0], [1], [0, 0, 1, 1], [], []>} : vector<8x8xbf16>, vector<8x8xbf16>, vector<8x8xf32> -> vector<8x8xf32>
    %76 = arith.addf %73, %75 : vector<8x8xf32>
    %c1_44 = arith.constant 1 : index
    %c0_45 = arith.constant 0 : index
    %c0_46 = arith.constant 0 : index
    %77 = vector.load %arg8[%c1_44, %c0_45, %c0_46] : memref<4x8x8xf32, #tpu.memory_space<vmem>>, vector<1x8x8xf32>
    %78 = vector.shape_cast %77 : vector<1x8x8xf32> to vector<8x8xf32>
    %79 = vector.shape_cast %76 : vector<8x8xf32> to vector<1x8x8xf32>
    tpu.vector_store %arg8[%c1_44, %c0_45, %c0_46], %79 {strides = array<i32>} : memref<4x8x8xf32, #tpu.memory_space<vmem>>, vector<1x8x8xf32>,
    %c1_47 = arith.constant 1 : index
    %c0_48 = arith.constant 0 : index
    %c0_49 = arith.constant 0 : index
    %80 = vector.load %arg6[%c1_47, %c0_48, %c0_49] : memref<4x8x1xf32, #tpu.memory_space<vmem>>, vector<1x8x1xf32>
    %81 = vector.shape_cast %80 : vector<1x8x1xf32> to vector<8x1xf32>
    %82 = vector.shape_cast %55 : vector<8x1xf32> to vector<1x8x1xf32>
    tpu.vector_store %arg6[%c1_47, %c0_48, %c0_49], %82 {strides = array<i32>} : memref<4x8x1xf32, #tpu.memory_space<vmem>>, vector<1x8x1xf32>,
    %83 = vector.extract_strided_slice %4 {offsets = [0, 16], sizes = [8, 8], strides = [1, 1]} : vector<8x32xbf16> to vector<8x8xbf16>
    %cst_50 = arith.constant 3.535160e-01 : bf16
    %84 = vector.broadcast %cst_50 : bf16 to vector<8x8xbf16>
    %85 = arith.mulf %83, %84 : vector<8x8xbf16>
    %86 = vector.extract_strided_slice %6 {offsets = [0, 16], sizes = [8, 8], strides = [1, 1]} : vector<8x64xbf16> to vector<8x8xbf16>
    %87 = vector.extract_strided_slice %6 {offsets = [0, 48], sizes = [8, 8], strides = [1, 1]} : vector<8x64xbf16> to vector<8x8xbf16>
    %cst_51 = arith.constant dense<0.000000e+00> : vector<8x8xf32>
    %88 = tpu.matmul %85, %86, %cst_51 {dimension_numbers = #tpu.dot_dimension_numbers<[1], [1], [0], [0], [0, 0, 1, 0], [], []>} : vector<8x8xbf16>, vector<8x8xbf16>, vector<8x8xf32> -> vector<8x8xf32>
    %c2 = arith.constant 2 : index
    %c0_52 = arith.constant 0 : index
    %c0_53 = arith.constant 0 : index
    %89 = vector.load %arg6[%c2, %c0_52, %c0_53] : memref<4x8x1xf32, #tpu.memory_space<vmem>>, vector<1x8x1xf32>
    %90 = vector.shape_cast %89 : vector<1x8x1xf32> to vector<8x1xf32>
    %cst_54 = arith.constant dense<0xFF800000> : vector<8xf32>
    %91 = vector.multi_reduction <maximumf>, %88, %cst_54 [1] : vector<8x8xf32> to vector<8xf32>
    %92 = vector.shape_cast %91 : vector<8xf32> to vector<8x1xf32>
    %93 = arith.maximumf %90, %92 : vector<8x1xf32>
    %94 = arith.subf %90, %93 : vector<8x1xf32>
    %95 = math.exp %94 : vector<8x1xf32>
    %96 = vector.broadcast %93 : vector<8x1xf32> to vector<8x8xf32>
    %97 = arith.subf %88, %96 : vector<8x8xf32>
    %98 = math.exp %97 : vector<8x8xf32>
    %c2_55 = arith.constant 2 : index
    %c0_56 = arith.constant 0 : index
    %c0_57 = arith.constant 0 : index
    %99 = vector.load %arg7[%c2_55, %c0_56, %c0_57] : memref<4x8x1xf32, #tpu.memory_space<vmem>>, vector<1x8x1xf32>
    %100 = vector.shape_cast %99 : vector<1x8x1xf32> to vector<8x1xf32>
    %101 = arith.mulf %95, %100 : vector<8x1xf32>
    %cst_58 = arith.constant dense<0.000000e+00> : vector<8xf32>
    %102 = vector.multi_reduction <add>, %98, %cst_58 [1] : vector<8x8xf32> to vector<8xf32>
    %103 = vector.shape_cast %102 : vector<8xf32> to vector<8x1xf32>
    %104 = arith.addf %101, %103 : vector<8x1xf32>
    %c2_59 = arith.constant 2 : index
    %c0_60 = arith.constant 0 : index
    %c0_61 = arith.constant 0 : index
    %105 = vector.load %arg7[%c2_59, %c0_60, %c0_61] : memref<4x8x1xf32, #tpu.memory_space<vmem>>, vector<1x8x1xf32>
    %106 = vector.shape_cast %105 : vector<1x8x1xf32> to vector<8x1xf32>
    %107 = vector.shape_cast %104 : vector<8x1xf32> to vector<1x8x1xf32>
    tpu.vector_store %arg7[%c2_59, %c0_60, %c0_61], %107 {strides = array<i32>} : memref<4x8x1xf32, #tpu.memory_space<vmem>>, vector<1x8x1xf32>,
    %c2_62 = arith.constant 2 : index
    %c0_63 = arith.constant 0 : index
    %c0_64 = arith.constant 0 : index
    %108 = vector.load %arg8[%c2_62, %c0_63, %c0_64] : memref<4x8x8xf32, #tpu.memory_space<vmem>>, vector<1x8x8xf32>
    %109 = vector.shape_cast %108 : vector<1x8x8xf32> to vector<8x8xf32>
    %110 = vector.broadcast %95 : vector<8x1xf32> to vector<8x8xf32>
    %111 = arith.mulf %110, %109 : vector<8x8xf32>
    %112 = arith.truncf %98 : vector<8x8xf32> to vector<8x8xbf16>
    %cst_65 = arith.constant dense<0.000000e+00> : vector<8x8xf32>
    %113 = tpu.matmul %112, %87, %cst_65 {dimension_numbers = #tpu.dot_dimension_numbers<[1], [0], [0], [1], [0, 0, 1, 1], [], []>} : vector<8x8xbf16>, vector<8x8xbf16>, vector<8x8xf32> -> vector<8x8xf32>
    %114 = arith.addf %111, %113 : vector<8x8xf32>
    %c2_66 = arith.constant 2 : index
    %c0_67 = arith.constant 0 : index
    %c0_68 = arith.constant 0 : index
    %115 = vector.load %arg8[%c2_66, %c0_67, %c0_68] : memref<4x8x8xf32, #tpu.memory_space<vmem>>, vector<1x8x8xf32>
    %116 = vector.shape_cast %115 : vector<1x8x8xf32> to vector<8x8xf32>
    %117 = vector.shape_cast %114 : vector<8x8xf32> to vector<1x8x8xf32>
    tpu.vector_store %arg8[%c2_66, %c0_67, %c0_68], %117 {strides = array<i32>} : memref<4x8x8xf32, #tpu.memory_space<vmem>>, vector<1x8x8xf32>,
    %c2_69 = arith.constant 2 : index
    %c0_70 = arith.constant 0 : index
    %c0_71 = arith.constant 0 : index
    %118 = vector.load %arg6[%c2_69, %c0_70, %c0_71] : memref<4x8x1xf32, #tpu.memory_space<vmem>>, vector<1x8x1xf32>
    %119 = vector.shape_cast %118 : vector<1x8x1xf32> to vector<8x1xf32>
    %120 = vector.shape_cast %93 : vector<8x1xf32> to vector<1x8x1xf32>
    tpu.vector_store %arg6[%c2_69, %c0_70, %c0_71], %120 {strides = array<i32>} : memref<4x8x1xf32, #tpu.memory_space<vmem>>, vector<1x8x1xf32>,
    %121 = vector.extract_strided_slice %4 {offsets = [0, 24], sizes = [8, 8], strides = [1, 1]} : vector<8x32xbf16> to vector<8x8xbf16>
    %cst_72 = arith.constant 3.535160e-01 : bf16
    %122 = vector.broadcast %cst_72 : bf16 to vector<8x8xbf16>
    %123 = arith.mulf %121, %122 : vector<8x8xbf16>
    %124 = vector.extract_strided_slice %6 {offsets = [0, 24], sizes = [8, 8], strides = [1, 1]} : vector<8x64xbf16> to vector<8x8xbf16>
    %125 = vector.extract_strided_slice %6 {offsets = [0, 56], sizes = [8, 8], strides = [1, 1]} : vector<8x64xbf16> to vector<8x8xbf16>
    %cst_73 = arith.constant dense<0.000000e+00> : vector<8x8xf32>
    %126 = tpu.matmul %123, %124, %cst_73 {dimension_numbers = #tpu.dot_dimension_numbers<[1], [1], [0], [0], [0, 0, 1, 0], [], []>} : vector<8x8xbf16>, vector<8x8xbf16>, vector<8x8xf32> -> vector<8x8xf32>
    %c3 = arith.constant 3 : index
    %c0_74 = arith.constant 0 : index
    %c0_75 = arith.constant 0 : index
    %127 = vector.load %arg6[%c3, %c0_74, %c0_75] : memref<4x8x1xf32, #tpu.memory_space<vmem>>, vector<1x8x1xf32>
    %128 = vector.shape_cast %127 : vector<1x8x1xf32> to vector<8x1xf32>
    %cst_76 = arith.constant dense<0xFF800000> : vector<8xf32>
    %129 = vector.multi_reduction <maximumf>, %126, %cst_76 [1] : vector<8x8xf32> to vector<8xf32>
    %130 = vector.shape_cast %129 : vector<8xf32> to vector<8x1xf32>
    %131 = arith.maximumf %128, %130 : vector<8x1xf32>
    %132 = arith.subf %128, %131 : vector<8x1xf32>
    %133 = math.exp %132 : vector<8x1xf32>
    %134 = vector.broadcast %131 : vector<8x1xf32> to vector<8x8xf32>
    %135 = arith.subf %126, %134 : vector<8x8xf32>
    %136 = math.exp %135 : vector<8x8xf32>
    %c3_77 = arith.constant 3 : index
    %c0_78 = arith.constant 0 : index
    %c0_79 = arith.constant 0 : index
    %137 = vector.load %arg7[%c3_77, %c0_78, %c0_79] : memref<4x8x1xf32, #tpu.memory_space<vmem>>, vector<1x8x1xf32>
    %138 = vector.shape_cast %137 : vector<1x8x1xf32> to vector<8x1xf32>
    %139 = arith.mulf %133, %138 : vector<8x1xf32>
    %cst_80 = arith.constant dense<0.000000e+00> : vector<8xf32>
    %140 = vector.multi_reduction <add>, %136, %cst_80 [1] : vector<8x8xf32> to vector<8xf32>
    %141 = vector.shape_cast %140 : vector<8xf32> to vector<8x1xf32>
    %142 = arith.addf %139, %141 : vector<8x1xf32>
    %c3_81 = arith.constant 3 : index
    %c0_82 = arith.constant 0 : index
    %c0_83 = arith.constant 0 : index
    %143 = vector.load %arg7[%c3_81, %c0_82, %c0_83] : memref<4x8x1xf32, #tpu.memory_space<vmem>>, vector<1x8x1xf32>
    %144 = vector.shape_cast %143 : vector<1x8x1xf32> to vector<8x1xf32>
    %145 = vector.shape_cast %142 : vector<8x1xf32> to vector<1x8x1xf32>
    tpu.vector_store %arg7[%c3_81, %c0_82, %c0_83], %145 {strides = array<i32>} : memref<4x8x1xf32, #tpu.memory_space<vmem>>, vector<1x8x1xf32>,
    %c3_84 = arith.constant 3 : index
    %c0_85 = arith.constant 0 : index
    %c0_86 = arith.constant 0 : index
    %146 = vector.load %arg8[%c3_84, %c0_85, %c0_86] : memref<4x8x8xf32, #tpu.memory_space<vmem>>, vector<1x8x8xf32>
    %147 = vector.shape_cast %146 : vector<1x8x8xf32> to vector<8x8xf32>
    %148 = vector.broadcast %133 : vector<8x1xf32> to vector<8x8xf32>
    %149 = arith.mulf %148, %147 : vector<8x8xf32>
    %150 = arith.truncf %136 : vector<8x8xf32> to vector<8x8xbf16>
    %cst_87 = arith.constant dense<0.000000e+00> : vector<8x8xf32>
    %151 = tpu.matmul %150, %125, %cst_87 {dimension_numbers = #tpu.dot_dimension_numbers<[1], [0], [0], [1], [0, 0, 1, 1], [], []>} : vector<8x8xbf16>, vector<8x8xbf16>, vector<8x8xf32> -> vector<8x8xf32>
    %152 = arith.addf %149, %151 : vector<8x8xf32>
    %c3_88 = arith.constant 3 : index
    %c0_89 = arith.constant 0 : index
    %c0_90 = arith.constant 0 : index
    %153 = vector.load %arg8[%c3_88, %c0_89, %c0_90] : memref<4x8x8xf32, #tpu.memory_space<vmem>>, vector<1x8x8xf32>
    %154 = vector.shape_cast %153 : vector<1x8x8xf32> to vector<8x8xf32>
    %155 = vector.shape_cast %152 : vector<8x8xf32> to vector<1x8x8xf32>
    tpu.vector_store %arg8[%c3_88, %c0_89, %c0_90], %155 {strides = array<i32>} : memref<4x8x8xf32, #tpu.memory_space<vmem>>, vector<1x8x8xf32>,
    %c3_91 = arith.constant 3 : index
    %c0_92 = arith.constant 0 : index
    %c0_93 = arith.constant 0 : index
    %156 = vector.load %arg6[%c3_91, %c0_92, %c0_93] : memref<4x8x1xf32, #tpu.memory_space<vmem>>, vector<1x8x1xf32>
    %157 = vector.shape_cast %156 : vector<1x8x1xf32> to vector<8x1xf32>
    %158 = vector.shape_cast %131 : vector<8x1xf32> to vector<1x8x1xf32>
    tpu.vector_store %arg6[%c3_91, %c0_92, %c0_93], %158 {strides = array<i32>} : memref<4x8x1xf32, #tpu.memory_space<vmem>>, vector<1x8x1xf32>,
    %c0_i32_94 = arith.constant 0 : i32
    %159 = arith.cmpi eq, %arg2, %c0_i32_94 : i32
    %160 = arith.extui %159 : i1 to i32
    %c0_i32_95 = arith.constant 0 : i32
    %161 = arith.cmpi ne, %160, %c0_i32_95 : i32
    scf.if %161 {
      %c0_96 = arith.constant 0 : index
      %c0_97 = arith.constant 0 : index
      %c0_98 = arith.constant 0 : index
      %162 = vector.load %arg7[%c0_96, %c0_97, %c0_98] : memref<4x8x1xf32, #tpu.memory_space<vmem>>, vector<1x8x1xf32>
      %163 = vector.shape_cast %162 : vector<1x8x1xf32> to vector<8x1xf32>
      %164 = tpu.reciprocal %163 {approx = true} : vector<8x1xf32> -> vector<8x1xf32>
      %c0_99 = arith.constant 0 : index
      %c0_100 = arith.constant 0 : index
      %c0_101 = arith.constant 0 : index
      %165 = vector.load %arg8[%c0_99, %c0_100, %c0_101] : memref<4x8x8xf32, #tpu.memory_space<vmem>>, vector<1x8x8xf32>
      %166 = vector.shape_cast %165 : vector<1x8x8xf32> to vector<8x8xf32>
      %167 = vector.broadcast %164 : vector<8x1xf32> to vector<8x8xf32>
      %168 = arith.mulf %166, %167 : vector<8x8xf32>
      %c1_102 = arith.constant 1 : index
      %c0_103 = arith.constant 0 : index
      %c0_104 = arith.constant 0 : index
      %169 = vector.load %arg7[%c1_102, %c0_103, %c0_104] : memref<4x8x1xf32, #tpu.memory_space<vmem>>, vector<1x8x1xf32>
      %170 = vector.shape_cast %169 : vector<1x8x1xf32> to vector<8x1xf32>
      %171 = tpu.reciprocal %170 {approx = true} : vector<8x1xf32> -> vector<8x1xf32>
      %c1_105 = arith.constant 1 : index
      %c0_106 = arith.constant 0 : index
      %c0_107 = arith.constant 0 : index
      %172 = vector.load %arg8[%c1_105, %c0_106, %c0_107] : memref<4x8x8xf32, #tpu.memory_space<vmem>>, vector<1x8x8xf32>
      %173 = vector.shape_cast %172 : vector<1x8x8xf32> to vector<8x8xf32>
      %174 = vector.broadcast %171 : vector<8x1xf32> to vector<8x8xf32>
      %175 = arith.mulf %173, %174 : vector<8x8xf32>
      %c2_108 = arith.constant 2 : index
      %c0_109 = arith.constant 0 : index
      %c0_110 = arith.constant 0 : index
      %176 = vector.load %arg7[%c2_108, %c0_109, %c0_110] : memref<4x8x1xf32, #tpu.memory_space<vmem>>, vector<1x8x1xf32>
      %177 = vector.shape_cast %176 : vector<1x8x1xf32> to vector<8x1xf32>
      %178 = tpu.reciprocal %177 {approx = true} : vector<8x1xf32> -> vector<8x1xf32>
      %c2_111 = arith.constant 2 : index
      %c0_112 = arith.constant 0 : index
      %c0_113 = arith.constant 0 : index
      %179 = vector.load %arg8[%c2_111, %c0_112, %c0_113] : memref<4x8x8xf32, #tpu.memory_space<vmem>>, vector<1x8x8xf32>
      %180 = vector.shape_cast %179 : vector<1x8x8xf32> to vector<8x8xf32>
      %181 = vector.broadcast %178 : vector<8x1xf32> to vector<8x8xf32>
      %182 = arith.mulf %180, %181 : vector<8x8xf32>
      %c3_114 = arith.constant 3 : index
      %c0_115 = arith.constant 0 : index
      %c0_116 = arith.constant 0 : index
      %183 = vector.load %arg7[%c3_114, %c0_115, %c0_116] : memref<4x8x1xf32, #tpu.memory_space<vmem>>, vector<1x8x1xf32>
      %184 = vector.shape_cast %183 : vector<1x8x1xf32> to vector<8x1xf32>
      %185 = tpu.reciprocal %184 {approx = true} : vector<8x1xf32> -> vector<8x1xf32>
      %c3_117 = arith.constant 3 : index
      %c0_118 = arith.constant 0 : index
      %c0_119 = arith.constant 0 : index
      %186 = vector.load %arg8[%c3_117, %c0_118, %c0_119] : memref<4x8x8xf32, #tpu.memory_space<vmem>>, vector<1x8x8xf32>
      %187 = vector.shape_cast %186 : vector<1x8x8xf32> to vector<8x8xf32>
      %188 = vector.broadcast %185 : vector<8x1xf32> to vector<8x8xf32>
      %189 = arith.mulf %187, %188 : vector<8x8xf32>
      %190 = tpu.concatenate %168, %175, %182, %189 in 1 : vector<8x8xf32>, vector<8x8xf32>, vector<8x8xf32>, vector<8x8xf32> -> vector<8x32xf32>
      %191 = arith.truncf %190 : vector<8x32xf32> to vector<8x32xbf16>
      %c0_120 = arith.constant 0 : index
      %c0_121 = arith.constant 0 : index
      %c0_122 = arith.constant 0 : index
      %192 = vector.load %arg5[%c0_120, %c0_121, %c0_122] : memref<1x8x32xbf16, #tpu.memory_space<vmem>>, vector<1x8x32xbf16>
      %193 = vector.shape_cast %192 : vector<1x8x32xbf16> to vector<8x32xbf16>
      %194 = vector.shape_cast %191 : vector<8x32xbf16> to vector<1x8x32xbf16>
      tpu.vector_store %arg5[%c0_120, %c0_121, %c0_122], %194 {strides = array<i32>} : memref<1x8x32xbf16, #tpu.memory_space<vmem>>, vector<1x8x32xbf16>,
    } else {
    }
    return
  }
  func.func @transform_0(%arg0: i32, %arg1: i32, %arg2: i32) -> (i32, i32, i32) {
    %c0_i32 = arith.constant 0 : i32
    %c0_i32_0 = arith.constant 0 : i32
    return %arg0, %arg1, %c0_i32 : i32, i32, i32
  }
  func.func @transform_1(%arg0: i32, %arg1: i32, %arg2: i32) -> (i32, i32, i32) {
    %c0_i32 = arith.constant 0 : i32
    %c0_i32_0 = arith.constant 0 : i32
    return %arg0, %arg2, %c0_i32 : i32, i32, i32
  }
  func.func @transform_2(%arg0: i32, %arg1: i32, %arg2: i32) -> (i32, i32, i32) {
    %c0_i32 = arith.constant 0 : i32
    %c0_i32_0 = arith.constant 0 : i32
    return %arg0, %arg1, %c0_i32 : i32, i32, i32
  }
}

module attributes {stable_mosaic.version = 11 : i64} {
  func.func @_linear_res_ln_kernel(%arg0: i32, %arg1: i32, %arg2: memref<16x32xbf16, #tpu.memory_space<vmem>>, %arg3: memref<32x32xbf16, #tpu.memory_space<vmem>>, %arg4: memref<1x32xf32, #tpu.memory_space<vmem>>, %arg5: memref<16x32xbf16, #tpu.memory_space<vmem>>, %arg6: memref<1x32xf32, #tpu.memory_space<vmem>>, %arg7: memref<1x32xf32, #tpu.memory_space<vmem>>, %arg8: memref<16x32xbf16, #tpu.memory_space<vmem>>, %arg9: memref<16x32xf32, #tpu.memory_space<vmem>>) attributes {dimension_semantics = [#tpu.dimension_semantics<parallel>, #tpu.dimension_semantics<arbitrary>], iteration_bounds = array<i64: 1, 1>, scalar_prefetch = 0 : i64, scratch_operands = 1 : i64, tpu.core_type = #tpu.core_type<tc>, window_params = [{transform_indices = @transform_0, window_bounds = array<i64: 16, 32>}, {transform_indices = @transform_1, window_bounds = array<i64: 32, 32>}, {pipeline_mode = #tpu.pipeline_mode<synchronous>, transform_indices = @transform_2, window_bounds = array<i64: 1, 32>}, {transform_indices = @transform_3, window_bounds = array<i64: 16, 32>}, {pipeline_mode = #tpu.pipeline_mode<synchronous>, transform_indices = @transform_4, window_bounds = array<i64: 1, 32>}, {pipeline_mode = #tpu.pipeline_mode<synchronous>, transform_indices = @transform_5, window_bounds = array<i64: 1, 32>}, {transform_indices = @transform_6, window_bounds = array<i64: 16, 32>}]} {
    %c0_i32 = arith.constant 0 : i32
    %0 = arith.cmpi eq, %arg1, %c0_i32 : i32
    %1 = arith.extui %0 : i1 to i32
    %c0_i32_0 = arith.constant 0 : i32
    %2 = arith.cmpi ne, %1, %c0_i32_0 : i32
    scf.if %2 {
      %cst_10 = arith.constant 0.000000e+00 : f32
      %12 = vector.broadcast %cst_10 : f32 to vector<16x32xf32>
      %c0_11 = arith.constant 0 : index
      %c0_12 = arith.constant 0 : index
      %13 = vector.load %arg9[%c0_11, %c0_12] : memref<16x32xf32, #tpu.memory_space<vmem>>, vector<16x32xf32>
      tpu.vector_store %arg9[%c0_11, %c0_12], %12 {strides = array<i32>} : memref<16x32xf32, #tpu.memory_space<vmem>>, vector<16x32xf32>,
    } else {
    }
    %c0 = arith.constant 0 : index
    %c0_1 = arith.constant 0 : index
    %3 = vector.load %arg9[%c0, %c0_1] : memref<16x32xf32, #tpu.memory_space<vmem>>, vector<16x32xf32>
    %c0_2 = arith.constant 0 : index
    %c0_3 = arith.constant 0 : index
    %4 = vector.load %arg2[%c0_2, %c0_3] : memref<16x32xbf16, #tpu.memory_space<vmem>>, vector<16x32xbf16>
    %c0_4 = arith.constant 0 : index
    %c0_5 = arith.constant 0 : index
    %5 = vector.load %arg3[%c0_4, %c0_5] : memref<32x32xbf16, #tpu.memory_space<vmem>>, vector<32x32xbf16>
    %cst = arith.constant dense<0.000000e+00> : vector<16x32xf32>
    %6 = tpu.matmul %4, %5, %cst {dimension_numbers = #tpu.dot_dimension_numbers<[1], [0], [0], [1], [0, 0, 1, 1], [], []>} : vector<16x32xbf16>, vector<32x32xbf16>, vector<16x32xf32> -> vector<16x32xf32>
    %7 = arith.addf %3, %6 : vector<16x32xf32>
    %c0_6 = arith.constant 0 : index
    %c0_7 = arith.constant 0 : index
    %8 = vector.load %arg9[%c0_6, %c0_7] : memref<16x32xf32, #tpu.memory_space<vmem>>, vector<16x32xf32>
    tpu.vector_store %arg9[%c0_6, %c0_7], %7 {strides = array<i32>} : memref<16x32xf32, #tpu.memory_space<vmem>>, vector<16x32xf32>,
    %c0_i32_8 = arith.constant 0 : i32
    %9 = arith.cmpi eq, %arg1, %c0_i32_8 : i32
    %10 = arith.extui %9 : i1 to i32
    %c0_i32_9 = arith.constant 0 : i32
    %11 = arith.cmpi ne, %10, %c0_i32_9 : i32
    scf.if %11 {
      %c0_10 = arith.constant 0 : index
      %c0_11 = arith.constant 0 : index
      %12 = vector.load %arg9[%c0_10, %c0_11] : memref<16x32xf32, #tpu.memory_space<vmem>>, vector<16x32xf32>
      %c0_12 = arith.constant 0 : index
      %c0_13 = arith.constant 0 : index
      %13 = vector.load %arg4[%c0_12, %c0_13] : memref<1x32xf32, #tpu.memory_space<vmem>>, vector<1x32xf32>
      %14 = vector.broadcast %13 : vector<1x32xf32> to vector<16x32xf32>
      %15 = arith.addf %12, %14 : vector<16x32xf32>
      %c0_14 = arith.constant 0 : index
      %c0_15 = arith.constant 0 : index
      %16 = vector.load %arg5[%c0_14, %c0_15] : memref<16x32xbf16, #tpu.memory_space<vmem>>, vector<16x32xbf16>
      %17 = arith.extf %16 : vector<16x32xbf16> to vector<16x32xf32>
      %18 = arith.addf %15, %17 : vector<16x32xf32>
      %c0_16 = arith.constant 0 : index
      %c0_17 = arith.constant 0 : index
      %19 = vector.load %arg6[%c0_16, %c0_17] : memref<1x32xf32, #tpu.memory_space<vmem>>, vector<1x32xf32>
      %c0_18 = arith.constant 0 : index
      %c0_19 = arith.constant 0 : index
      %20 = vector.load %arg7[%c0_18, %c0_19] : memref<1x32xf32, #tpu.memory_space<vmem>>, vector<1x32xf32>
      %cst_20 = arith.constant dense<0.000000e+00> : vector<16xf32>
      %21 = vector.multi_reduction <add>, %18, %cst_20 [1] : vector<16x32xf32> to vector<16xf32>
      %22 = vector.shape_cast %21 : vector<16xf32> to vector<16x1xf32>
      %cst_21 = arith.constant 3.200000e+01 : f32
      %23 = vector.broadcast %cst_21 : f32 to vector<16x1xf32>
      %24 = arith.divf %22, %23 : vector<16x1xf32>
      %25 = vector.broadcast %24 : vector<16x1xf32> to vector<16x32xf32>
      %26 = arith.subf %18, %25 : vector<16x32xf32>
      %27 = arith.mulf %26, %26 : vector<16x32xf32>
      %cst_22 = arith.constant dense<0.000000e+00> : vector<16xf32>
      %28 = vector.multi_reduction <add>, %27, %cst_22 [1] : vector<16x32xf32> to vector<16xf32>
      %29 = vector.shape_cast %28 : vector<16xf32> to vector<16x1xf32>
      %cst_23 = arith.constant 3.100000e+01 : f32
      %30 = vector.broadcast %cst_23 : f32 to vector<16x1xf32>
      %31 = arith.divf %29, %30 : vector<16x1xf32>
      %32 = math.sqrt %31 : vector<16x1xf32>
      %cst_24 = arith.constant 9.99999997E-7 : f32
      %33 = vector.broadcast %cst_24 : f32 to vector<16x1xf32>
      %34 = arith.addf %32, %33 : vector<16x1xf32>
      %cst_25 = arith.constant 1.000000e+00 : f32
      %35 = vector.broadcast %cst_25 : f32 to vector<16x1xf32>
      %36 = arith.divf %35, %34 : vector<16x1xf32>
      %37 = vector.broadcast %24 : vector<16x1xf32> to vector<16x32xf32>
      %38 = arith.subf %18, %37 : vector<16x32xf32>
      %39 = vector.broadcast %19 : vector<1x32xf32> to vector<16x32xf32>
      %40 = arith.mulf %39, %38 : vector<16x32xf32>
      %41 = vector.broadcast %36 : vector<16x1xf32> to vector<16x32xf32>
      %42 = arith.mulf %40, %41 : vector<16x32xf32>
      %43 = vector.broadcast %20 : vector<1x32xf32> to vector<16x32xf32>
      %44 = arith.addf %42, %43 : vector<16x32xf32>
      %45 = arith.truncf %44 : vector<16x32xf32> to vector<16x32xbf16>
      %c0_26 = arith.constant 0 : index
      %c0_27 = arith.constant 0 : index
      %46 = vector.load %arg8[%c0_26, %c0_27] : memref<16x32xbf16, #tpu.memory_space<vmem>>, vector<16x32xbf16>
      tpu.vector_store %arg8[%c0_26, %c0_27], %45 {strides = array<i32>} : memref<16x32xbf16, #tpu.memory_space<vmem>>, vector<16x32xbf16>,
    } else {
    }
    return
  }
  func.func @transform_0(%arg0: i32, %arg1: i32) -> (i32, i32) {
    %c0_i32 = arith.constant 0 : i32
    return %arg0, %arg1 : i32, i32
  }
  func.func @transform_1(%arg0: i32, %arg1: i32) -> (i32, i32) {
    %c0_i32 = arith.constant 0 : i32
    %c0_i32_0 = arith.constant 0 : i32
    return %arg1, %c0_i32 : i32, i32
  }
  func.func @transform_2(%arg0: i32, %arg1: i32) -> (i32, i32) {
    %c0_i32 = arith.constant 0 : i32
    %c0_i32_0 = arith.constant 0 : i32
    %c0_i32_1 = arith.constant 0 : i32
    return %c0_i32, %c0_i32_0 : i32, i32
  }
  func.func @transform_3(%arg0: i32, %arg1: i32) -> (i32, i32) {
    %c0_i32 = arith.constant 0 : i32
    %c0_i32_0 = arith.constant 0 : i32
    return %arg0, %c0_i32 : i32, i32
  }
  func.func @transform_4(%arg0: i32, %arg1: i32) -> (i32, i32) {
    %c0_i32 = arith.constant 0 : i32
    %c0_i32_0 = arith.constant 0 : i32
    %c0_i32_1 = arith.constant 0 : i32
    return %c0_i32, %c0_i32_0 : i32, i32
  }
  func.func @transform_5(%arg0: i32, %arg1: i32) -> (i32, i32) {
    %c0_i32 = arith.constant 0 : i32
    %c0_i32_0 = arith.constant 0 : i32
    %c0_i32_1 = arith.constant 0 : i32
    return %c0_i32, %c0_i32_0 : i32, i32
  }
  func.func @transform_6(%arg0: i32, %arg1: i32) -> (i32, i32) {
    %c0_i32 = arith.constant 0 : i32
    %c0_i32_0 = arith.constant 0 : i32
    return %arg0, %c0_i32 : i32, i32
  }
}

module attributes {stable_mosaic.version = 11 : i64} {
  func.func @_ffn_kernel(%arg0: i32, %arg1: memref<16x32xbf16, #tpu.memory_space<vmem>>, %arg2: memref<32x16xbf16, #tpu.memory_space<vmem>>, %arg3: memref<1x16xf32, #tpu.memory_space<vmem>>, %arg4: memref<16x32xbf16, #tpu.memory_space<vmem>>, %arg5: memref<1x32xf32, #tpu.memory_space<vmem>>, %arg6: memref<1x32xf32, #tpu.memory_space<vmem>>, %arg7: memref<1x32xf32, #tpu.memory_space<vmem>>, %arg8: memref<16x32xbf16, #tpu.memory_space<vmem>>) attributes {dimension_semantics = [#tpu.dimension_semantics<parallel>], iteration_bounds = array<i64: 1>, scalar_prefetch = 0 : i64, scratch_operands = 0 : i64, tpu.core_type = #tpu.core_type<tc>, window_params = [{transform_indices = @transform_0, window_bounds = array<i64: 16, 32>}, {pipeline_mode = #tpu.pipeline_mode<synchronous>, transform_indices = @transform_1, window_bounds = array<i64: 32, 16>}, {pipeline_mode = #tpu.pipeline_mode<synchronous>, transform_indices = @transform_2, window_bounds = array<i64: 1, 16>}, {pipeline_mode = #tpu.pipeline_mode<synchronous>, transform_indices = @transform_3, window_bounds = array<i64: 16, 32>}, {pipeline_mode = #tpu.pipeline_mode<synchronous>, transform_indices = @transform_4, window_bounds = array<i64: 1, 32>}, {pipeline_mode = #tpu.pipeline_mode<synchronous>, transform_indices = @transform_5, window_bounds = array<i64: 1, 32>}, {pipeline_mode = #tpu.pipeline_mode<synchronous>, transform_indices = @transform_6, window_bounds = array<i64: 1, 32>}, {transform_indices = @transform_7, window_bounds = array<i64: 16, 32>}]} {
    %c0 = arith.constant 0 : index
    %c0_0 = arith.constant 0 : index
    %0 = vector.load %arg1[%c0, %c0_0] : memref<16x32xbf16, #tpu.memory_space<vmem>>, vector<16x32xbf16>
    %c0_1 = arith.constant 0 : index
    %c0_2 = arith.constant 0 : index
    %1 = vector.load %arg2[%c0_1, %c0_2] : memref<32x16xbf16, #tpu.memory_space<vmem>>, vector<32x16xbf16>
    %cst = arith.constant dense<0.000000e+00> : vector<16x16xf32>
    %2 = tpu.matmul %0, %1, %cst {dimension_numbers = #tpu.dot_dimension_numbers<[1], [0], [0], [1], [0, 0, 1, 1], [], []>} : vector<16x32xbf16>, vector<32x16xbf16>, vector<16x16xf32> -> vector<16x16xf32>
    %c0_3 = arith.constant 0 : index
    %c0_4 = arith.constant 0 : index
    %3 = vector.load %arg3[%c0_3, %c0_4] : memref<1x16xf32, #tpu.memory_space<vmem>>, vector<1x16xf32>
    %4 = vector.broadcast %3 : vector<1x16xf32> to vector<16x16xf32>
    %5 = arith.addf %2, %4 : vector<16x16xf32>
    %cst_5 = arith.constant 0.000000e+00 : f32
    %6 = vector.broadcast %cst_5 : f32 to vector<16x16xf32>
    %7 = arith.maximumf %5, %6 : vector<16x16xf32>
    %8 = arith.truncf %7 : vector<16x16xf32> to vector<16x16xbf16>
    %c0_6 = arith.constant 0 : index
    %c0_7 = arith.constant 0 : index
    %9 = vector.load %arg4[%c0_6, %c0_7] : memref<16x32xbf16, #tpu.memory_space<vmem>>, vector<16x32xbf16>
    %cst_8 = arith.constant dense<0.000000e+00> : vector<16x32xf32>
    %10 = tpu.matmul %8, %9, %cst_8 {dimension_numbers = #tpu.dot_dimension_numbers<[1], [0], [0], [1], [0, 0, 1, 1], [], []>} : vector<16x16xbf16>, vector<16x32xbf16>, vector<16x32xf32> -> vector<16x32xf32>
    %c0_9 = arith.constant 0 : index
    %c0_10 = arith.constant 0 : index
    %11 = vector.load %arg5[%c0_9, %c0_10] : memref<1x32xf32, #tpu.memory_space<vmem>>, vector<1x32xf32>
    %12 = vector.broadcast %11 : vector<1x32xf32> to vector<16x32xf32>
    %13 = arith.addf %10, %12 : vector<16x32xf32>
    %14 = arith.extf %0 : vector<16x32xbf16> to vector<16x32xf32>
    %15 = arith.addf %13, %14 : vector<16x32xf32>
    %c0_11 = arith.constant 0 : index
    %c0_12 = arith.constant 0 : index
    %16 = vector.load %arg6[%c0_11, %c0_12] : memref<1x32xf32, #tpu.memory_space<vmem>>, vector<1x32xf32>
    %c0_13 = arith.constant 0 : index
    %c0_14 = arith.constant 0 : index
    %17 = vector.load %arg7[%c0_13, %c0_14] : memref<1x32xf32, #tpu.memory_space<vmem>>, vector<1x32xf32>
    %cst_15 = arith.constant dense<0.000000e+00> : vector<16xf32>
    %18 = vector.multi_reduction <add>, %15, %cst_15 [1] : vector<16x32xf32> to vector<16xf32>
    %19 = vector.shape_cast %18 : vector<16xf32> to vector<16x1xf32>
    %cst_16 = arith.constant 3.200000e+01 : f32
    %20 = vector.broadcast %cst_16 : f32 to vector<16x1xf32>
    %21 = arith.divf %19, %20 : vector<16x1xf32>
    %22 = vector.broadcast %21 : vector<16x1xf32> to vector<16x32xf32>
    %23 = arith.subf %15, %22 : vector<16x32xf32>
    %24 = arith.mulf %23, %23 : vector<16x32xf32>
    %cst_17 = arith.constant dense<0.000000e+00> : vector<16xf32>
    %25 = vector.multi_reduction <add>, %24, %cst_17 [1] : vector<16x32xf32> to vector<16xf32>
    %26 = vector.shape_cast %25 : vector<16xf32> to vector<16x1xf32>
    %cst_18 = arith.constant 3.100000e+01 : f32
    %27 = vector.broadcast %cst_18 : f32 to vector<16x1xf32>
    %28 = arith.divf %26, %27 : vector<16x1xf32>
    %29 = math.sqrt %28 : vector<16x1xf32>
    %cst_19 = arith.constant 9.99999997E-7 : f32
    %30 = vector.broadcast %cst_19 : f32 to vector<16x1xf32>
    %31 = arith.addf %29, %30 : vector<16x1xf32>
    %cst_20 = arith.constant 1.000000e+00 : f32
    %32 = vector.broadcast %cst_20 : f32 to vector<16x1xf32>
    %33 = arith.divf %32, %31 : vector<16x1xf32>
    %34 = vector.broadcast %21 : vector<16x1xf32> to vector<16x32xf32>
    %35 = arith.subf %15, %34 : vector<16x32xf32>
    %36 = vector.broadcast %16 : vector<1x32xf32> to vector<16x32xf32>
    %37 = arith.mulf %36, %35 : vector<16x32xf32>
    %38 = vector.broadcast %33 : vector<16x1xf32> to vector<16x32xf32>
    %39 = arith.mulf %37, %38 : vector<16x32xf32>
    %40 = vector.broadcast %17 : vector<1x32xf32> to vector<16x32xf32>
    %41 = arith.addf %39, %40 : vector<16x32xf32>
    %42 = arith.truncf %41 : vector<16x32xf32> to vector<16x32xbf16>
    %c0_21 = arith.constant 0 : index
    %c0_22 = arith.constant 0 : index
    %43 = vector.load %arg8[%c0_21, %c0_22] : memref<16x32xbf16, #tpu.memory_space<vmem>>, vector<16x32xbf16>
    tpu.vector_store %arg8[%c0_21, %c0_22], %42 {strides = array<i32>} : memref<16x32xbf16, #tpu.memory_space<vmem>>, vector<16x32xbf16>,
    return
  }
  func.func @transform_0(%arg0: i32) -> (i32, i32) {
    %c0_i32 = arith.constant 0 : i32
    %c0_i32_0 = arith.constant 0 : i32
    return %arg0, %c0_i32 : i32, i32
  }
  func.func @transform_1(%arg0: i32) -> (i32, i32) {
    %c0_i32 = arith.constant 0 : i32
    %c0_i32_0 = arith.constant 0 : i32
    %c0_i32_1 = arith.constant 0 : i32
    return %c0_i32, %c0_i32_0 : i32, i32
  }
  func.func @transform_2(%arg0: i32) -> (i32, i32) {
    %c0_i32 = arith.constant 0 : i32
    %c0_i32_0 = arith.constant 0 : i32
    %c0_i32_1 = arith.constant 0 : i32
    return %c0_i32, %c0_i32_0 : i32, i32
  }
  func.func @transform_3(%arg0: i32) -> (i32, i32) {
    %c0_i32 = arith.constant 0 : i32
    %c0_i32_0 = arith.constant 0 : i32
    %c0_i32_1 = arith.constant 0 : i32
    return %c0_i32, %c0_i32_0 : i32, i32
  }
  func.func @transform_4(%arg0: i32) -> (i32, i32) {
    %c0_i32 = arith.constant 0 : i32
    %c0_i32_0 = arith.constant 0 : i32
    %c0_i32_1 = arith.constant 0 : i32
    return %c0_i32, %c0_i32_0 : i32, i32
  }
  func.func @transform_5(%arg0: i32) -> (i32, i32) {
    %c0_i32 = arith.constant 0 : i32
    %c0_i32_0 = arith.constant 0 : i32
    %c0_i32_1 = arith.constant 0 : i32
    return %c0_i32, %c0_i32_0 : i32, i32
  }
  func.func @transform_6(%arg0: i32) -> (i32, i32) {
    %c0_i32 = arith.constant 0 : i32
    %c0_i32_0 = arith.constant 0 : i32
    %c0_i32_1 = arith.constant 0 : i32
    return %c0_i32, %c0_i32_0 : i32, i32
  }
  func.func @transform_7(%arg0: i32) -> (i32, i32) {
    %c0_i32 = arith.constant 0 : i32
    %c0_i32_0 = arith.constant 0 : i32
    return %arg0, %c0_i32 : i32, i32
  }
}

module attributes {stable_mosaic.version = 11 : i64} {
  func.func @_matmul_bias_kernel(%arg0: i32, %arg1: i32, %arg2: i32, %arg3: memref<16x32xbf16, #tpu.memory_space<vmem>>, %arg4: memref<32x128xbf16, #tpu.memory_space<vmem>>, %arg5: memref<1x128xf32, #tpu.memory_space<vmem>>, %arg6: memref<16x128xbf16, #tpu.memory_space<vmem>>, %arg7: memref<16x128xf32, #tpu.memory_space<vmem>>) attributes {dimension_semantics = [#tpu.dimension_semantics<parallel>, #tpu.dimension_semantics<parallel>, #tpu.dimension_semantics<arbitrary>], iteration_bounds = array<i64: 1, 1, 1>, scalar_prefetch = 0 : i64, scratch_operands = 1 : i64, tpu.core_type = #tpu.core_type<tc>, window_params = [{transform_indices = @transform_0, window_bounds = array<i64: 16, 32>}, {transform_indices = @transform_1, window_bounds = array<i64: 32, 128>}, {transform_indices = @transform_2, window_bounds = array<i64: 1, 128>}, {transform_indices = @transform_3, window_bounds = array<i64: 16, 128>}]} {
    %c0_i32 = arith.constant 0 : i32
    %0 = arith.cmpi eq, %arg2, %c0_i32 : i32
    %1 = arith.extui %0 : i1 to i32
    %c0_i32_0 = arith.constant 0 : i32
    %2 = arith.cmpi ne, %1, %c0_i32_0 : i32
    scf.if %2 {
      %cst_10 = arith.constant 0.000000e+00 : f32
      %12 = vector.broadcast %cst_10 : f32 to vector<16x128xf32>
      %c0_11 = arith.constant 0 : index
      %c0_12 = arith.constant 0 : index
      %13 = vector.load %arg7[%c0_11, %c0_12] : memref<16x128xf32, #tpu.memory_space<vmem>>, vector<16x128xf32>
      tpu.vector_store %arg7[%c0_11, %c0_12], %12 {strides = array<i32>} : memref<16x128xf32, #tpu.memory_space<vmem>>, vector<16x128xf32>,
    } else {
    }
    %c0 = arith.constant 0 : index
    %c0_1 = arith.constant 0 : index
    %3 = vector.load %arg7[%c0, %c0_1] : memref<16x128xf32, #tpu.memory_space<vmem>>, vector<16x128xf32>
    %c0_2 = arith.constant 0 : index
    %c0_3 = arith.constant 0 : index
    %4 = vector.load %arg3[%c0_2, %c0_3] : memref<16x32xbf16, #tpu.memory_space<vmem>>, vector<16x32xbf16>
    %c0_4 = arith.constant 0 : index
    %c0_5 = arith.constant 0 : index
    %5 = vector.load %arg4[%c0_4, %c0_5] : memref<32x128xbf16, #tpu.memory_space<vmem>>, vector<32x128xbf16>
    %cst = arith.constant dense<0.000000e+00> : vector<16x128xf32>
    %6 = tpu.matmul %4, %5, %cst {dimension_numbers = #tpu.dot_dimension_numbers<[1], [0], [0], [1], [0, 0, 1, 1], [], []>} : vector<16x32xbf16>, vector<32x128xbf16>, vector<16x128xf32> -> vector<16x128xf32>
    %7 = arith.addf %3, %6 : vector<16x128xf32>
    %c0_6 = arith.constant 0 : index
    %c0_7 = arith.constant 0 : index
    %8 = vector.load %arg7[%c0_6, %c0_7] : memref<16x128xf32, #tpu.memory_space<vmem>>, vector<16x128xf32>
    tpu.vector_store %arg7[%c0_6, %c0_7], %7 {strides = array<i32>} : memref<16x128xf32, #tpu.memory_space<vmem>>, vector<16x128xf32>,
    %c0_i32_8 = arith.constant 0 : i32
    %9 = arith.cmpi eq, %arg2, %c0_i32_8 : i32
    %10 = arith.extui %9 : i1 to i32
    %c0_i32_9 = arith.constant 0 : i32
    %11 = arith.cmpi ne, %10, %c0_i32_9 : i32
    scf.if %11 {
      %c0_10 = arith.constant 0 : index
      %c0_11 = arith.constant 0 : index
      %12 = vector.load %arg7[%c0_10, %c0_11] : memref<16x128xf32, #tpu.memory_space<vmem>>, vector<16x128xf32>
      %c0_12 = arith.constant 0 : index
      %c0_13 = arith.constant 0 : index
      %13 = vector.load %arg5[%c0_12, %c0_13] : memref<1x128xf32, #tpu.memory_space<vmem>>, vector<1x128xf32>
      %14 = vector.broadcast %13 : vector<1x128xf32> to vector<16x128xf32>
      %15 = arith.addf %12, %14 : vector<16x128xf32>
      %16 = arith.truncf %15 : vector<16x128xf32> to vector<16x128xbf16>
      %c0_14 = arith.constant 0 : index
      %c0_15 = arith.constant 0 : index
      %17 = vector.load %arg6[%c0_14, %c0_15] : memref<16x128xbf16, #tpu.memory_space<vmem>>, vector<16x128xbf16>
      tpu.vector_store %arg6[%c0_14, %c0_15], %16 {strides = array<i32>} : memref<16x128xbf16, #tpu.memory_space<vmem>>, vector<16x128xbf16>,
    } else {
    }
    return
  }
  func.func @transform_0(%arg0: i32, %arg1: i32, %arg2: i32) -> (i32, i32) {
    %c0_i32 = arith.constant 0 : i32
    return %arg0, %arg2 : i32, i32
  }
  func.func @transform_1(%arg0: i32, %arg1: i32, %arg2: i32) -> (i32, i32) {
    %c0_i32 = arith.constant 0 : i32
    return %arg2, %arg1 : i32, i32
  }
  func.func @transform_2(%arg0: i32, %arg1: i32, %arg2: i32) -> (i32, i32) {
    %c0_i32 = arith.constant 0 : i32
    %c0_i32_0 = arith.constant 0 : i32
    return %c0_i32, %arg1 : i32, i32
  }
  func.func @transform_3(%arg0: i32, %arg1: i32, %arg2: i32) -> (i32, i32) {
    %c0_i32 = arith.constant 0 : i32
    return %arg0, %arg1 : i32, i32
  }
}

module attributes {stable_mosaic.version = 11 : i64} {
  func.func @_linear_double_ln_kernel(%arg0: i32, %arg1: i32, %arg2: memref<12x64xbf16, #tpu.memory_space<vmem>>, %arg3: memref<64x24xbf16, #tpu.memory_space<vmem>>, %arg4: memref<1x24xf32, #tpu.memory_space<vmem>>, %arg5: memref<1x24xf32, #tpu.memory_space<vmem>>, %arg6: memref<1x24xf32, #tpu.memory_space<vmem>>, %arg7: memref<12x24xf32, #tpu.memory_space<vmem>>, %arg8: memref<12x24xf32, #tpu.memory_space<vmem>>) attributes {dimension_semantics = [#tpu.dimension_semantics<parallel>, #tpu.dimension_semantics<arbitrary>], iteration_bounds = array<i64: 1, 1>, scalar_prefetch = 0 : i64, scratch_operands = 1 : i64, tpu.core_type = #tpu.core_type<tc>, window_params = [{transform_indices = @transform_0, window_bounds = array<i64: 12, 64>}, {transform_indices = @transform_1, window_bounds = array<i64: 64, 24>}, {pipeline_mode = #tpu.pipeline_mode<synchronous>, transform_indices = @transform_2, window_bounds = array<i64: 1, 24>}, {pipeline_mode = #tpu.pipeline_mode<synchronous>, transform_indices = @transform_3, window_bounds = array<i64: 1, 24>}, {pipeline_mode = #tpu.pipeline_mode<synchronous>, transform_indices = @transform_4, window_bounds = array<i64: 1, 24>}, {transform_indices = @transform_5, window_bounds = array<i64: 12, 24>}]} {
    %c0_i32 = arith.constant 0 : i32
    %0 = arith.cmpi eq, %arg1, %c0_i32 : i32
    %1 = arith.extui %0 : i1 to i32
    %c0_i32_0 = arith.constant 0 : i32
    %2 = arith.cmpi ne, %1, %c0_i32_0 : i32
    scf.if %2 {
      %cst_10 = arith.constant 0.000000e+00 : f32
      %12 = vector.broadcast %cst_10 : f32 to vector<12x24xf32>
      %c0_11 = arith.constant 0 : index
      %c0_12 = arith.constant 0 : index
      %13 = vector.load %arg8[%c0_11, %c0_12] : memref<12x24xf32, #tpu.memory_space<vmem>>, vector<12x24xf32>
      tpu.vector_store %arg8[%c0_11, %c0_12], %12 {strides = array<i32>} : memref<12x24xf32, #tpu.memory_space<vmem>>, vector<12x24xf32>,
    } else {
    }
    %c0 = arith.constant 0 : index
    %c0_1 = arith.constant 0 : index
    %3 = vector.load %arg8[%c0, %c0_1] : memref<12x24xf32, #tpu.memory_space<vmem>>, vector<12x24xf32>
    %c0_2 = arith.constant 0 : index
    %c0_3 = arith.constant 0 : index
    %4 = vector.load %arg2[%c0_2, %c0_3] : memref<12x64xbf16, #tpu.memory_space<vmem>>, vector<12x64xbf16>
    %c0_4 = arith.constant 0 : index
    %c0_5 = arith.constant 0 : index
    %5 = vector.load %arg3[%c0_4, %c0_5] : memref<64x24xbf16, #tpu.memory_space<vmem>>, vector<64x24xbf16>
    %cst = arith.constant dense<0.000000e+00> : vector<12x24xf32>
    %6 = tpu.matmul %4, %5, %cst {dimension_numbers = #tpu.dot_dimension_numbers<[1], [0], [0], [1], [0, 0, 1, 1], [], []>} : vector<12x64xbf16>, vector<64x24xbf16>, vector<12x24xf32> -> vector<12x24xf32>
    %7 = arith.addf %3, %6 : vector<12x24xf32>
    %c0_6 = arith.constant 0 : index
    %c0_7 = arith.constant 0 : index
    %8 = vector.load %arg8[%c0_6, %c0_7] : memref<12x24xf32, #tpu.memory_space<vmem>>, vector<12x24xf32>
    tpu.vector_store %arg8[%c0_6, %c0_7], %7 {strides = array<i32>} : memref<12x24xf32, #tpu.memory_space<vmem>>, vector<12x24xf32>,
    %c0_i32_8 = arith.constant 0 : i32
    %9 = arith.cmpi eq, %arg1, %c0_i32_8 : i32
    %10 = arith.extui %9 : i1 to i32
    %c0_i32_9 = arith.constant 0 : i32
    %11 = arith.cmpi ne, %10, %c0_i32_9 : i32
    scf.if %11 {
      %c0_10 = arith.constant 0 : index
      %c0_11 = arith.constant 0 : index
      %12 = vector.load %arg8[%c0_10, %c0_11] : memref<12x24xf32, #tpu.memory_space<vmem>>, vector<12x24xf32>
      %c0_12 = arith.constant 0 : index
      %c0_13 = arith.constant 0 : index
      %13 = vector.load %arg4[%c0_12, %c0_13] : memref<1x24xf32, #tpu.memory_space<vmem>>, vector<1x24xf32>
      %14 = vector.broadcast %13 : vector<1x24xf32> to vector<12x24xf32>
      %15 = arith.addf %12, %14 : vector<12x24xf32>
      %16 = arith.addf %15, %15 : vector<12x24xf32>
      %c0_14 = arith.constant 0 : index
      %c0_15 = arith.constant 0 : index
      %17 = vector.load %arg5[%c0_14, %c0_15] : memref<1x24xf32, #tpu.memory_space<vmem>>, vector<1x24xf32>
      %c0_16 = arith.constant 0 : index
      %c0_17 = arith.constant 0 : index
      %18 = vector.load %arg6[%c0_16, %c0_17] : memref<1x24xf32, #tpu.memory_space<vmem>>, vector<1x24xf32>
      %cst_18 = arith.constant dense<0.000000e+00> : vector<12xf32>
      %19 = vector.multi_reduction <add>, %16, %cst_18 [1] : vector<12x24xf32> to vector<12xf32>
      %20 = vector.shape_cast %19 : vector<12xf32> to vector<12x1xf32>
      %cst_19 = arith.constant 2.400000e+01 : f32
      %21 = vector.broadcast %cst_19 : f32 to vector<12x1xf32>
      %22 = arith.divf %20, %21 : vector<12x1xf32>
      %23 = vector.broadcast %22 : vector<12x1xf32> to vector<12x24xf32>
      %24 = arith.subf %16, %23 : vector<12x24xf32>
      %25 = arith.mulf %24, %24 : vector<12x24xf32>
      %cst_20 = arith.constant dense<0.000000e+00> : vector<12xf32>
      %26 = vector.multi_reduction <add>, %25, %cst_20 [1] : vector<12x24xf32> to vector<12xf32>
      %27 = vector.shape_cast %26 : vector<12xf32> to vector<12x1xf32>
      %cst_21 = arith.constant 2.300000e+01 : f32
      %28 = vector.broadcast %cst_21 : f32 to vector<12x1xf32>
      %29 = arith.divf %27, %28 : vector<12x1xf32>
      %30 = math.sqrt %29 : vector<12x1xf32>
      %cst_22 = arith.constant 9.99999997E-7 : f32
      %31 = vector.broadcast %cst_22 : f32 to vector<12x1xf32>
      %32 = arith.addf %30, %31 : vector<12x1xf32>
      %cst_23 = arith.constant 1.000000e+00 : f32
      %33 = vector.broadcast %cst_23 : f32 to vector<12x1xf32>
      %34 = arith.divf %33, %32 : vector<12x1xf32>
      %35 = vector.broadcast %22 : vector<12x1xf32> to vector<12x24xf32>
      %36 = arith.subf %16, %35 : vector<12x24xf32>
      %37 = vector.broadcast %17 : vector<1x24xf32> to vector<12x24xf32>
      %38 = arith.mulf %37, %36 : vector<12x24xf32>
      %39 = vector.broadcast %34 : vector<12x1xf32> to vector<12x24xf32>
      %40 = arith.mulf %38, %39 : vector<12x24xf32>
      %41 = vector.broadcast %18 : vector<1x24xf32> to vector<12x24xf32>
      %42 = arith.addf %40, %41 : vector<12x24xf32>
      %c0_24 = arith.constant 0 : index
      %c0_25 = arith.constant 0 : index
      %43 = vector.load %arg7[%c0_24, %c0_25] : memref<12x24xf32, #tpu.memory_space<vmem>>, vector<12x24xf32>
      tpu.vector_store %arg7[%c0_24, %c0_25], %42 {strides = array<i32>} : memref<12x24xf32, #tpu.memory_space<vmem>>, vector<12x24xf32>,
    } else {
    }
    return
  }
  func.func @transform_0(%arg0: i32, %arg1: i32) -> (i32, i32) {
    %c0_i32 = arith.constant 0 : i32
    return %arg0, %arg1 : i32, i32
  }
  func.func @transform_1(%arg0: i32, %arg1: i32) -> (i32, i32) {
    %c0_i32 = arith.constant 0 : i32
    %c0_i32_0 = arith.constant 0 : i32
    return %arg1, %c0_i32 : i32, i32
  }
  func.func @transform_2(%arg0: i32, %arg1: i32) -> (i32, i32) {
    %c0_i32 = arith.constant 0 : i32
    %c0_i32_0 = arith.constant 0 : i32
    %c0_i32_1 = arith.constant 0 : i32
    return %c0_i32, %c0_i32_0 : i32, i32
  }
  func.func @transform_3(%arg0: i32, %arg1: i32) -> (i32, i32) {
    %c0_i32 = arith.constant 0 : i32
    %c0_i32_0 = arith.constant 0 : i32
    %c0_i32_1 = arith.constant 0 : i32
    return %c0_i32, %c0_i32_0 : i32, i32
  }
  func.func @transform_4(%arg0: i32, %arg1: i32) -> (i32, i32) {
    %c0_i32 = arith.constant 0 : i32
    %c0_i32_0 = arith.constant 0 : i32
    %c0_i32_1 = arith.constant 0 : i32
    return %c0_i32, %c0_i32_0 : i32, i32
  }
  func.func @transform_5(%arg0: i32, %arg1: i32) -> (i32, i32) {
    %c0_i32 = arith.constant 0 : i32
    %c0_i32_0 = arith.constant 0 : i32
    return %arg0, %c0_i32 : i32, i32
  }
}

module attributes {stable_mosaic.version = 11 : i64} {
  func.func @_bidir_kernel(%arg0: i32, %arg1: memref<1x8x128xbf16, #tpu.memory_space<vmem>>, %arg2: memref<1x6x128xbf16, #tpu.memory_space<vmem>>, %arg3: memref<1x8x64xbf16, #tpu.memory_space<vmem>>, %arg4: memref<1x6x64xbf16, #tpu.memory_space<vmem>>) attributes {dimension_semantics = [#tpu.dimension_semantics<parallel>], iteration_bounds = array<i64: 2>, scalar_prefetch = 0 : i64, scratch_operands = 0 : i64, tpu.core_type = #tpu.core_type<tc>, window_params = [{transform_indices = @transform_0, window_bounds = array<i64: 1, 8, 128>}, {transform_indices = @transform_1, window_bounds = array<i64: 1, 6, 128>}, {transform_indices = @transform_2, window_bounds = array<i64: 1, 8, 64>}, {transform_indices = @transform_3, window_bounds = array<i64: 1, 6, 64>}]} {
    %c0 = arith.constant 0 : index
    %c0_0 = arith.constant 0 : index
    %c0_1 = arith.constant 0 : index
    %0 = vector.load %arg1[%c0, %c0_0, %c0_1] : memref<1x8x128xbf16, #tpu.memory_space<vmem>>, vector<1x8x128xbf16>
    %1 = vector.shape_cast %0 : vector<1x8x128xbf16> to vector<8x128xbf16>
    %c0_2 = arith.constant 0 : index
    %c0_3 = arith.constant 0 : index
    %c0_4 = arith.constant 0 : index
    %2 = vector.load %arg2[%c0_2, %c0_3, %c0_4] : memref<1x6x128xbf16, #tpu.memory_space<vmem>>, vector<1x6x128xbf16>
    %3 = vector.shape_cast %2 : vector<1x6x128xbf16> to vector<6x128xbf16>
    %4 = vector.extract_strided_slice %1 {offsets = [0, 0], sizes = [8, 16], strides = [1, 1]} : vector<8x128xbf16> to vector<8x16xbf16>
    %5 = vector.extract_strided_slice %1 {offsets = [0, 64], sizes = [8, 16], strides = [1, 1]} : vector<8x128xbf16> to vector<8x16xbf16>
    %6 = vector.extract_strided_slice %3 {offsets = [0, 0], sizes = [6, 16], strides = [1, 1]} : vector<6x128xbf16> to vector<6x16xbf16>
    %cst = arith.constant 2.500000e-01 : bf16
    %7 = vector.broadcast %cst : bf16 to vector<6x16xbf16>
    %8 = arith.mulf %6, %7 : vector<6x16xbf16>
    %9 = vector.extract_strided_slice %3 {offsets = [0, 64], sizes = [6, 16], strides = [1, 1]} : vector<6x128xbf16> to vector<6x16xbf16>
    %cst_5 = arith.constant dense<0.000000e+00> : vector<8x6xf32>
    %10 = tpu.matmul %4, %8, %cst_5 {dimension_numbers = #tpu.dot_dimension_numbers<[1], [1], [0], [0], [0, 0, 1, 0], [], []>} : vector<8x16xbf16>, vector<6x16xbf16>, vector<8x6xf32> -> vector<8x6xf32>
    %cst_6 = arith.constant dense<0xFF800000> : vector<8xf32>
    %11 = vector.multi_reduction <maximumf>, %10, %cst_6 [1] : vector<8x6xf32> to vector<8xf32>
    %cst_7 = arith.constant 0xFF800000 : f32
    %12 = vector.broadcast %cst_7 : f32 to vector<8xf32>
    %13 = arith.maximumf %12, %11 : vector<8xf32>
    %14 = vector.shape_cast %13 : vector<8xf32> to vector<8x1xf32>
    %15 = vector.broadcast %14 : vector<8x1xf32> to vector<8x6xf32>
    %16 = arith.subf %10, %15 : vector<8x6xf32>
    %17 = math.exp %16 : vector<8x6xf32>
    %cst_8 = arith.constant dense<0.000000e+00> : vector<8xf32>
    %18 = vector.multi_reduction <add>, %17, %cst_8 [1] : vector<8x6xf32> to vector<8xf32>
    %19 = vector.shape_cast %18 : vector<8xf32> to vector<8x1xf32>
    %20 = vector.broadcast %19 : vector<8x1xf32> to vector<8x6xf32>
    %21 = arith.divf %17, %20 : vector<8x6xf32>
    %22 = arith.truncf %21 : vector<8x6xf32> to vector<8x6xbf16>
    %cst_9 = arith.constant dense<0.000000e+00> : vector<8x16xf32>
    %23 = tpu.matmul %22, %9, %cst_9 {dimension_numbers = #tpu.dot_dimension_numbers<[1], [0], [0], [1], [0, 0, 1, 1], [], []>} : vector<8x6xbf16>, vector<6x16xbf16>, vector<8x16xf32> -> vector<8x16xf32>
    %cst_10 = arith.constant dense<0.000000e+00> : vector<6x8xf32>
    %24 = tpu.matmul %8, %4, %cst_10 {dimension_numbers = #tpu.dot_dimension_numbers<[1], [1], [0], [0], [0, 0, 1, 0], [], []>} : vector<6x16xbf16>, vector<8x16xbf16>, vector<6x8xf32> -> vector<6x8xf32>
    %cst_11 = arith.constant dense<0xFF800000> : vector<6xf32>
    %25 = vector.multi_reduction <maximumf>, %24, %cst_11 [1] : vector<6x8xf32> to vector<6xf32>
    %cst_12 = arith.constant 0xFF800000 : f32
    %26 = vector.broadcast %cst_12 : f32 to vector<6xf32>
    %27 = arith.maximumf %26, %25 : vector<6xf32>
    %28 = vector.shape_cast %27 : vector<6xf32> to vector<6x1xf32>
    %29 = vector.broadcast %28 : vector<6x1xf32> to vector<6x8xf32>
    %30 = arith.subf %24, %29 : vector<6x8xf32>
    %31 = math.exp %30 : vector<6x8xf32>
    %cst_13 = arith.constant dense<0.000000e+00> : vector<6xf32>
    %32 = vector.multi_reduction <add>, %31, %cst_13 [1] : vector<6x8xf32> to vector<6xf32>
    %33 = vector.shape_cast %32 : vector<6xf32> to vector<6x1xf32>
    %34 = vector.broadcast %33 : vector<6x1xf32> to vector<6x8xf32>
    %35 = arith.divf %31, %34 : vector<6x8xf32>
    %36 = arith.truncf %35 : vector<6x8xf32> to vector<6x8xbf16>
    %cst_14 = arith.constant dense<0.000000e+00> : vector<6x16xf32>
    %37 = tpu.matmul %36, %5, %cst_14 {dimension_numbers = #tpu.dot_dimension_numbers<[1], [0], [0], [1], [0, 0, 1, 1], [], []>} : vector<6x8xbf16>, vector<8x16xbf16>, vector<6x16xf32> -> vector<6x16xf32>
    %38 = vector.extract_strided_slice %1 {offsets = [0, 16], sizes = [8, 16], strides = [1, 1]} : vector<8x128xbf16> to vector<8x16xbf16>
    %39 = vector.extract_strided_slice %1 {offsets = [0, 80], sizes = [8, 16], strides = [1, 1]} : vector<8x128xbf16> to vector<8x16xbf16>
    %40 = vector.extract_strided_slice %3 {offsets = [0, 16], sizes = [6, 16], strides = [1, 1]} : vector<6x128xbf16> to vector<6x16xbf16>
    %cst_15 = arith.constant 2.500000e-01 : bf16
    %41 = vector.broadcast %cst_15 : bf16 to vector<6x16xbf16>
    %42 = arith.mulf %40, %41 : vector<6x16xbf16>
    %43 = vector.extract_strided_slice %3 {offsets = [0, 80], sizes = [6, 16], strides = [1, 1]} : vector<6x128xbf16> to vector<6x16xbf16>
    %cst_16 = arith.constant dense<0.000000e+00> : vector<8x6xf32>
    %44 = tpu.matmul %38, %42, %cst_16 {dimension_numbers = #tpu.dot_dimension_numbers<[1], [1], [0], [0], [0, 0, 1, 0], [], []>} : vector<8x16xbf16>, vector<6x16xbf16>, vector<8x6xf32> -> vector<8x6xf32>
    %cst_17 = arith.constant dense<0xFF800000> : vector<8xf32>
    %45 = vector.multi_reduction <maximumf>, %44, %cst_17 [1] : vector<8x6xf32> to vector<8xf32>
    %cst_18 = arith.constant 0xFF800000 : f32
    %46 = vector.broadcast %cst_18 : f32 to vector<8xf32>
    %47 = arith.maximumf %46, %45 : vector<8xf32>
    %48 = vector.shape_cast %47 : vector<8xf32> to vector<8x1xf32>
    %49 = vector.broadcast %48 : vector<8x1xf32> to vector<8x6xf32>
    %50 = arith.subf %44, %49 : vector<8x6xf32>
    %51 = math.exp %50 : vector<8x6xf32>
    %cst_19 = arith.constant dense<0.000000e+00> : vector<8xf32>
    %52 = vector.multi_reduction <add>, %51, %cst_19 [1] : vector<8x6xf32> to vector<8xf32>
    %53 = vector.shape_cast %52 : vector<8xf32> to vector<8x1xf32>
    %54 = vector.broadcast %53 : vector<8x1xf32> to vector<8x6xf32>
    %55 = arith.divf %51, %54 : vector<8x6xf32>
    %56 = arith.truncf %55 : vector<8x6xf32> to vector<8x6xbf16>
    %cst_20 = arith.constant dense<0.000000e+00> : vector<8x16xf32>
    %57 = tpu.matmul %56, %43, %cst_20 {dimension_numbers = #tpu.dot_dimension_numbers<[1], [0], [0], [1], [0, 0, 1, 1], [], []>} : vector<8x6xbf16>, vector<6x16xbf16>, vector<8x16xf32> -> vector<8x16xf32>
    %cst_21 = arith.constant dense<0.000000e+00> : vector<6x8xf32>
    %58 = tpu.matmul %42, %38, %cst_21 {dimension_numbers = #tpu.dot_dimension_numbers<[1], [1], [0], [0], [0, 0, 1, 0], [], []>} : vector<6x16xbf16>, vector<8x16xbf16>, vector<6x8xf32> -> vector<6x8xf32>
    %cst_22 = arith.constant dense<0xFF800000> : vector<6xf32>
    %59 = vector.multi_reduction <maximumf>, %58, %cst_22 [1] : vector<6x8xf32> to vector<6xf32>
    %cst_23 = arith.constant 0xFF800000 : f32
    %60 = vector.broadcast %cst_23 : f32 to vector<6xf32>
    %61 = arith.maximumf %60, %59 : vector<6xf32>
    %62 = vector.shape_cast %61 : vector<6xf32> to vector<6x1xf32>
    %63 = vector.broadcast %62 : vector<6x1xf32> to vector<6x8xf32>
    %64 = arith.subf %58, %63 : vector<6x8xf32>
    %65 = math.exp %64 : vector<6x8xf32>
    %cst_24 = arith.constant dense<0.000000e+00> : vector<6xf32>
    %66 = vector.multi_reduction <add>, %65, %cst_24 [1] : vector<6x8xf32> to vector<6xf32>
    %67 = vector.shape_cast %66 : vector<6xf32> to vector<6x1xf32>
    %68 = vector.broadcast %67 : vector<6x1xf32> to vector<6x8xf32>
    %69 = arith.divf %65, %68 : vector<6x8xf32>
    %70 = arith.truncf %69 : vector<6x8xf32> to vector<6x8xbf16>
    %cst_25 = arith.constant dense<0.000000e+00> : vector<6x16xf32>
    %71 = tpu.matmul %70, %39, %cst_25 {dimension_numbers = #tpu.dot_dimension_numbers<[1], [0], [0], [1], [0, 0, 1, 1], [], []>} : vector<6x8xbf16>, vector<8x16xbf16>, vector<6x16xf32> -> vector<6x16xf32>
    %72 = vector.extract_strided_slice %1 {offsets = [0, 32], sizes = [8, 16], strides = [1, 1]} : vector<8x128xbf16> to vector<8x16xbf16>
    %73 = vector.extract_strided_slice %1 {offsets = [0, 96], sizes = [8, 16], strides = [1, 1]} : vector<8x128xbf16> to vector<8x16xbf16>
    %74 = vector.extract_strided_slice %3 {offsets = [0, 32], sizes = [6, 16], strides = [1, 1]} : vector<6x128xbf16> to vector<6x16xbf16>
    %cst_26 = arith.constant 2.500000e-01 : bf16
    %75 = vector.broadcast %cst_26 : bf16 to vector<6x16xbf16>
    %76 = arith.mulf %74, %75 : vector<6x16xbf16>
    %77 = vector.extract_strided_slice %3 {offsets = [0, 96], sizes = [6, 16], strides = [1, 1]} : vector<6x128xbf16> to vector<6x16xbf16>
    %cst_27 = arith.constant dense<0.000000e+00> : vector<8x6xf32>
    %78 = tpu.matmul %72, %76, %cst_27 {dimension_numbers = #tpu.dot_dimension_numbers<[1], [1], [0], [0], [0, 0, 1, 0], [], []>} : vector<8x16xbf16>, vector<6x16xbf16>, vector<8x6xf32> -> vector<8x6xf32>
    %cst_28 = arith.constant dense<0xFF800000> : vector<8xf32>
    %79 = vector.multi_reduction <maximumf>, %78, %cst_28 [1] : vector<8x6xf32> to vector<8xf32>
    %cst_29 = arith.constant 0xFF800000 : f32
    %80 = vector.broadcast %cst_29 : f32 to vector<8xf32>
    %81 = arith.maximumf %80, %79 : vector<8xf32>
    %82 = vector.shape_cast %81 : vector<8xf32> to vector<8x1xf32>
    %83 = vector.broadcast %82 : vector<8x1xf32> to vector<8x6xf32>
    %84 = arith.subf %78, %83 : vector<8x6xf32>
    %85 = math.exp %84 : vector<8x6xf32>
    %cst_30 = arith.constant dense<0.000000e+00> : vector<8xf32>
    %86 = vector.multi_reduction <add>, %85, %cst_30 [1] : vector<8x6xf32> to vector<8xf32>
    %87 = vector.shape_cast %86 : vector<8xf32> to vector<8x1xf32>
    %88 = vector.broadcast %87 : vector<8x1xf32> to vector<8x6xf32>
    %89 = arith.divf %85, %88 : vector<8x6xf32>
    %90 = arith.truncf %89 : vector<8x6xf32> to vector<8x6xbf16>
    %cst_31 = arith.constant dense<0.000000e+00> : vector<8x16xf32>
    %91 = tpu.matmul %90, %77, %cst_31 {dimension_numbers = #tpu.dot_dimension_numbers<[1], [0], [0], [1], [0, 0, 1, 1], [], []>} : vector<8x6xbf16>, vector<6x16xbf16>, vector<8x16xf32> -> vector<8x16xf32>
    %cst_32 = arith.constant dense<0.000000e+00> : vector<6x8xf32>
    %92 = tpu.matmul %76, %72, %cst_32 {dimension_numbers = #tpu.dot_dimension_numbers<[1], [1], [0], [0], [0, 0, 1, 0], [], []>} : vector<6x16xbf16>, vector<8x16xbf16>, vector<6x8xf32> -> vector<6x8xf32>
    %cst_33 = arith.constant dense<0xFF800000> : vector<6xf32>
    %93 = vector.multi_reduction <maximumf>, %92, %cst_33 [1] : vector<6x8xf32> to vector<6xf32>
    %cst_34 = arith.constant 0xFF800000 : f32
    %94 = vector.broadcast %cst_34 : f32 to vector<6xf32>
    %95 = arith.maximumf %94, %93 : vector<6xf32>
    %96 = vector.shape_cast %95 : vector<6xf32> to vector<6x1xf32>
    %97 = vector.broadcast %96 : vector<6x1xf32> to vector<6x8xf32>
    %98 = arith.subf %92, %97 : vector<6x8xf32>
    %99 = math.exp %98 : vector<6x8xf32>
    %cst_35 = arith.constant dense<0.000000e+00> : vector<6xf32>
    %100 = vector.multi_reduction <add>, %99, %cst_35 [1] : vector<6x8xf32> to vector<6xf32>
    %101 = vector.shape_cast %100 : vector<6xf32> to vector<6x1xf32>
    %102 = vector.broadcast %101 : vector<6x1xf32> to vector<6x8xf32>
    %103 = arith.divf %99, %102 : vector<6x8xf32>
    %104 = arith.truncf %103 : vector<6x8xf32> to vector<6x8xbf16>
    %cst_36 = arith.constant dense<0.000000e+00> : vector<6x16xf32>
    %105 = tpu.matmul %104, %73, %cst_36 {dimension_numbers = #tpu.dot_dimension_numbers<[1], [0], [0], [1], [0, 0, 1, 1], [], []>} : vector<6x8xbf16>, vector<8x16xbf16>, vector<6x16xf32> -> vector<6x16xf32>
    %106 = vector.extract_strided_slice %1 {offsets = [0, 48], sizes = [8, 16], strides = [1, 1]} : vector<8x128xbf16> to vector<8x16xbf16>
    %107 = vector.extract_strided_slice %1 {offsets = [0, 112], sizes = [8, 16], strides = [1, 1]} : vector<8x128xbf16> to vector<8x16xbf16>
    %108 = vector.extract_strided_slice %3 {offsets = [0, 48], sizes = [6, 16], strides = [1, 1]} : vector<6x128xbf16> to vector<6x16xbf16>
    %cst_37 = arith.constant 2.500000e-01 : bf16
    %109 = vector.broadcast %cst_37 : bf16 to vector<6x16xbf16>
    %110 = arith.mulf %108, %109 : vector<6x16xbf16>
    %111 = vector.extract_strided_slice %3 {offsets = [0, 112], sizes = [6, 16], strides = [1, 1]} : vector<6x128xbf16> to vector<6x16xbf16>
    %cst_38 = arith.constant dense<0.000000e+00> : vector<8x6xf32>
    %112 = tpu.matmul %106, %110, %cst_38 {dimension_numbers = #tpu.dot_dimension_numbers<[1], [1], [0], [0], [0, 0, 1, 0], [], []>} : vector<8x16xbf16>, vector<6x16xbf16>, vector<8x6xf32> -> vector<8x6xf32>
    %cst_39 = arith.constant dense<0xFF800000> : vector<8xf32>
    %113 = vector.multi_reduction <maximumf>, %112, %cst_39 [1] : vector<8x6xf32> to vector<8xf32>
    %cst_40 = arith.constant 0xFF800000 : f32
    %114 = vector.broadcast %cst_40 : f32 to vector<8xf32>
    %115 = arith.maximumf %114, %113 : vector<8xf32>
    %116 = vector.shape_cast %115 : vector<8xf32> to vector<8x1xf32>
    %117 = vector.broadcast %116 : vector<8x1xf32> to vector<8x6xf32>
    %118 = arith.subf %112, %117 : vector<8x6xf32>
    %119 = math.exp %118 : vector<8x6xf32>
    %cst_41 = arith.constant dense<0.000000e+00> : vector<8xf32>
    %120 = vector.multi_reduction <add>, %119, %cst_41 [1] : vector<8x6xf32> to vector<8xf32>
    %121 = vector.shape_cast %120 : vector<8xf32> to vector<8x1xf32>
    %122 = vector.broadcast %121 : vector<8x1xf32> to vector<8x6xf32>
    %123 = arith.divf %119, %122 : vector<8x6xf32>
    %124 = arith.truncf %123 : vector<8x6xf32> to vector<8x6xbf16>
    %cst_42 = arith.constant dense<0.000000e+00> : vector<8x16xf32>
    %125 = tpu.matmul %124, %111, %cst_42 {dimension_numbers = #tpu.dot_dimension_numbers<[1], [0], [0], [1], [0, 0, 1, 1], [], []>} : vector<8x6xbf16>, vector<6x16xbf16>, vector<8x16xf32> -> vector<8x16xf32>
    %cst_43 = arith.constant dense<0.000000e+00> : vector<6x8xf32>
    %126 = tpu.matmul %110, %106, %cst_43 {dimension_numbers = #tpu.dot_dimension_numbers<[1], [1], [0], [0], [0, 0, 1, 0], [], []>} : vector<6x16xbf16>, vector<8x16xbf16>, vector<6x8xf32> -> vector<6x8xf32>
    %cst_44 = arith.constant dense<0xFF800000> : vector<6xf32>
    %127 = vector.multi_reduction <maximumf>, %126, %cst_44 [1] : vector<6x8xf32> to vector<6xf32>
    %cst_45 = arith.constant 0xFF800000 : f32
    %128 = vector.broadcast %cst_45 : f32 to vector<6xf32>
    %129 = arith.maximumf %128, %127 : vector<6xf32>
    %130 = vector.shape_cast %129 : vector<6xf32> to vector<6x1xf32>
    %131 = vector.broadcast %130 : vector<6x1xf32> to vector<6x8xf32>
    %132 = arith.subf %126, %131 : vector<6x8xf32>
    %133 = math.exp %132 : vector<6x8xf32>
    %cst_46 = arith.constant dense<0.000000e+00> : vector<6xf32>
    %134 = vector.multi_reduction <add>, %133, %cst_46 [1] : vector<6x8xf32> to vector<6xf32>
    %135 = vector.shape_cast %134 : vector<6xf32> to vector<6x1xf32>
    %136 = vector.broadcast %135 : vector<6x1xf32> to vector<6x8xf32>
    %137 = arith.divf %133, %136 : vector<6x8xf32>
    %138 = arith.truncf %137 : vector<6x8xf32> to vector<6x8xbf16>
    %cst_47 = arith.constant dense<0.000000e+00> : vector<6x16xf32>
    %139 = tpu.matmul %138, %107, %cst_47 {dimension_numbers = #tpu.dot_dimension_numbers<[1], [0], [0], [1], [0, 0, 1, 1], [], []>} : vector<6x8xbf16>, vector<8x16xbf16>, vector<6x16xf32> -> vector<6x16xf32>
    %140 = tpu.concatenate %23, %57, %91, %125 in 1 : vector<8x16xf32>, vector<8x16xf32>, vector<8x16xf32>, vector<8x16xf32> -> vector<8x64xf32>
    %141 = arith.truncf %140 : vector<8x64xf32> to vector<8x64xbf16>
    %c0_48 = arith.constant 0 : index
    %c0_49 = arith.constant 0 : index
    %c0_50 = arith.constant 0 : index
    %142 = vector.load %arg3[%c0_48, %c0_49, %c0_50] : memref<1x8x64xbf16, #tpu.memory_space<vmem>>, vector<1x8x64xbf16>
    %143 = vector.shape_cast %142 : vector<1x8x64xbf16> to vector<8x64xbf16>
    %144 = vector.shape_cast %141 : vector<8x64xbf16> to vector<1x8x64xbf16>
    tpu.vector_store %arg3[%c0_48, %c0_49, %c0_50], %144 {strides = array<i32>} : memref<1x8x64xbf16, #tpu.memory_space<vmem>>, vector<1x8x64xbf16>,
    %145 = tpu.concatenate %37, %71, %105, %139 in 1 : vector<6x16xf32>, vector<6x16xf32>, vector<6x16xf32>, vector<6x16xf32> -> vector<6x64xf32>
    %146 = arith.truncf %145 : vector<6x64xf32> to vector<6x64xbf16>
    %c0_51 = arith.constant 0 : index
    %c0_52 = arith.constant 0 : index
    %c0_53 = arith.constant 0 : index
    %147 = vector.load %arg4[%c0_51, %c0_52, %c0_53] : memref<1x6x64xbf16, #tpu.memory_space<vmem>>, vector<1x6x64xbf16>
    %148 = vector.shape_cast %147 : vector<1x6x64xbf16> to vector<6x64xbf16>
    %149 = vector.shape_cast %146 : vector<6x64xbf16> to vector<1x6x64xbf16>
    tpu.vector_store %arg4[%c0_51, %c0_52, %c0_53], %149 {strides = array<i32>} : memref<1x6x64xbf16, #tpu.memory_space<vmem>>, vector<1x6x64xbf16>,
    return
  }
  func.func @transform_0(%arg0: i32) -> (i32, i32, i32) {
    %c0_i32 = arith.constant 0 : i32
    %c0_i32_0 = arith.constant 0 : i32
    %c0_i32_1 = arith.constant 0 : i32
    return %arg0, %c0_i32, %c0_i32_0 : i32, i32, i32
  }
  func.func @transform_1(%arg0: i32) -> (i32, i32, i32) {
    %c0_i32 = arith.constant 0 : i32
    %c0_i32_0 = arith.constant 0 : i32
    %c0_i32_1 = arith.constant 0 : i32
    return %arg0, %c0_i32, %c0_i32_0 : i32, i32, i32
  }
  func.func @transform_2(%arg0: i32) -> (i32, i32, i32) {
    %c0_i32 = arith.constant 0 : i32
    %c0_i32_0 = arith.constant 0 : i32
    %c0_i32_1 = arith.constant 0 : i32
    return %arg0, %c0_i32, %c0_i32_0 : i32, i32, i32
  }
  func.func @transform_3(%arg0: i32) -> (i32, i32, i32) {
    %c0_i32 = arith.constant 0 : i32
    %c0_i32_0 = arith.constant 0 : i32
    %c0_i32_1 = arith.constant 0 : i32
    return %arg0, %c0_i32, %c0_i32_0 : i32, i32, i32
  }
}

module attributes {stable_mosaic.version = 11 : i64} {
  func.func @_linear_double_ln_kernel(%arg0: i32, %arg1: i32, %arg2: memref<16x64xbf16, #tpu.memory_space<vmem>>, %arg3: memref<64x32xbf16, #tpu.memory_space<vmem>>, %arg4: memref<1x32xf32, #tpu.memory_space<vmem>>, %arg5: memref<1x32xf32, #tpu.memory_space<vmem>>, %arg6: memref<1x32xf32, #tpu.memory_space<vmem>>, %arg7: memref<16x32xf32, #tpu.memory_space<vmem>>, %arg8: memref<16x32xf32, #tpu.memory_space<vmem>>) attributes {dimension_semantics = [#tpu.dimension_semantics<parallel>, #tpu.dimension_semantics<arbitrary>], iteration_bounds = array<i64: 1, 1>, scalar_prefetch = 0 : i64, scratch_operands = 1 : i64, tpu.core_type = #tpu.core_type<tc>, window_params = [{transform_indices = @transform_0, window_bounds = array<i64: 16, 64>}, {transform_indices = @transform_1, window_bounds = array<i64: 64, 32>}, {pipeline_mode = #tpu.pipeline_mode<synchronous>, transform_indices = @transform_2, window_bounds = array<i64: 1, 32>}, {pipeline_mode = #tpu.pipeline_mode<synchronous>, transform_indices = @transform_3, window_bounds = array<i64: 1, 32>}, {pipeline_mode = #tpu.pipeline_mode<synchronous>, transform_indices = @transform_4, window_bounds = array<i64: 1, 32>}, {transform_indices = @transform_5, window_bounds = array<i64: 16, 32>}]} {
    %c0_i32 = arith.constant 0 : i32
    %0 = arith.cmpi eq, %arg1, %c0_i32 : i32
    %1 = arith.extui %0 : i1 to i32
    %c0_i32_0 = arith.constant 0 : i32
    %2 = arith.cmpi ne, %1, %c0_i32_0 : i32
    scf.if %2 {
      %cst_10 = arith.constant 0.000000e+00 : f32
      %12 = vector.broadcast %cst_10 : f32 to vector<16x32xf32>
      %c0_11 = arith.constant 0 : index
      %c0_12 = arith.constant 0 : index
      %13 = vector.load %arg8[%c0_11, %c0_12] : memref<16x32xf32, #tpu.memory_space<vmem>>, vector<16x32xf32>
      tpu.vector_store %arg8[%c0_11, %c0_12], %12 {strides = array<i32>} : memref<16x32xf32, #tpu.memory_space<vmem>>, vector<16x32xf32>,
    } else {
    }
    %c0 = arith.constant 0 : index
    %c0_1 = arith.constant 0 : index
    %3 = vector.load %arg8[%c0, %c0_1] : memref<16x32xf32, #tpu.memory_space<vmem>>, vector<16x32xf32>
    %c0_2 = arith.constant 0 : index
    %c0_3 = arith.constant 0 : index
    %4 = vector.load %arg2[%c0_2, %c0_3] : memref<16x64xbf16, #tpu.memory_space<vmem>>, vector<16x64xbf16>
    %c0_4 = arith.constant 0 : index
    %c0_5 = arith.constant 0 : index
    %5 = vector.load %arg3[%c0_4, %c0_5] : memref<64x32xbf16, #tpu.memory_space<vmem>>, vector<64x32xbf16>
    %cst = arith.constant dense<0.000000e+00> : vector<16x32xf32>
    %6 = tpu.matmul %4, %5, %cst {dimension_numbers = #tpu.dot_dimension_numbers<[1], [0], [0], [1], [0, 0, 1, 1], [], []>} : vector<16x64xbf16>, vector<64x32xbf16>, vector<16x32xf32> -> vector<16x32xf32>
    %7 = arith.addf %3, %6 : vector<16x32xf32>
    %c0_6 = arith.constant 0 : index
    %c0_7 = arith.constant 0 : index
    %8 = vector.load %arg8[%c0_6, %c0_7] : memref<16x32xf32, #tpu.memory_space<vmem>>, vector<16x32xf32>
    tpu.vector_store %arg8[%c0_6, %c0_7], %7 {strides = array<i32>} : memref<16x32xf32, #tpu.memory_space<vmem>>, vector<16x32xf32>,
    %c0_i32_8 = arith.constant 0 : i32
    %9 = arith.cmpi eq, %arg1, %c0_i32_8 : i32
    %10 = arith.extui %9 : i1 to i32
    %c0_i32_9 = arith.constant 0 : i32
    %11 = arith.cmpi ne, %10, %c0_i32_9 : i32
    scf.if %11 {
      %c0_10 = arith.constant 0 : index
      %c0_11 = arith.constant 0 : index
      %12 = vector.load %arg8[%c0_10, %c0_11] : memref<16x32xf32, #tpu.memory_space<vmem>>, vector<16x32xf32>
      %c0_12 = arith.constant 0 : index
      %c0_13 = arith.constant 0 : index
      %13 = vector.load %arg4[%c0_12, %c0_13] : memref<1x32xf32, #tpu.memory_space<vmem>>, vector<1x32xf32>
      %14 = vector.broadcast %13 : vector<1x32xf32> to vector<16x32xf32>
      %15 = arith.addf %12, %14 : vector<16x32xf32>
      %16 = arith.addf %15, %15 : vector<16x32xf32>
      %c0_14 = arith.constant 0 : index
      %c0_15 = arith.constant 0 : index
      %17 = vector.load %arg5[%c0_14, %c0_15] : memref<1x32xf32, #tpu.memory_space<vmem>>, vector<1x32xf32>
      %c0_16 = arith.constant 0 : index
      %c0_17 = arith.constant 0 : index
      %18 = vector.load %arg6[%c0_16, %c0_17] : memref<1x32xf32, #tpu.memory_space<vmem>>, vector<1x32xf32>
      %cst_18 = arith.constant dense<0.000000e+00> : vector<16xf32>
      %19 = vector.multi_reduction <add>, %16, %cst_18 [1] : vector<16x32xf32> to vector<16xf32>
      %20 = vector.shape_cast %19 : vector<16xf32> to vector<16x1xf32>
      %cst_19 = arith.constant 3.200000e+01 : f32
      %21 = vector.broadcast %cst_19 : f32 to vector<16x1xf32>
      %22 = arith.divf %20, %21 : vector<16x1xf32>
      %23 = vector.broadcast %22 : vector<16x1xf32> to vector<16x32xf32>
      %24 = arith.subf %16, %23 : vector<16x32xf32>
      %25 = arith.mulf %24, %24 : vector<16x32xf32>
      %cst_20 = arith.constant dense<0.000000e+00> : vector<16xf32>
      %26 = vector.multi_reduction <add>, %25, %cst_20 [1] : vector<16x32xf32> to vector<16xf32>
      %27 = vector.shape_cast %26 : vector<16xf32> to vector<16x1xf32>
      %cst_21 = arith.constant 3.100000e+01 : f32
      %28 = vector.broadcast %cst_21 : f32 to vector<16x1xf32>
      %29 = arith.divf %27, %28 : vector<16x1xf32>
      %30 = math.sqrt %29 : vector<16x1xf32>
      %cst_22 = arith.constant 9.99999997E-7 : f32
      %31 = vector.broadcast %cst_22 : f32 to vector<16x1xf32>
      %32 = arith.addf %30, %31 : vector<16x1xf32>
      %cst_23 = arith.constant 1.000000e+00 : f32
      %33 = vector.broadcast %cst_23 : f32 to vector<16x1xf32>
      %34 = arith.divf %33, %32 : vector<16x1xf32>
      %35 = vector.broadcast %22 : vector<16x1xf32> to vector<16x32xf32>
      %36 = arith.subf %16, %35 : vector<16x32xf32>
      %37 = vector.broadcast %17 : vector<1x32xf32> to vector<16x32xf32>
      %38 = arith.mulf %37, %36 : vector<16x32xf32>
      %39 = vector.broadcast %34 : vector<16x1xf32> to vector<16x32xf32>
      %40 = arith.mulf %38, %39 : vector<16x32xf32>
      %41 = vector.broadcast %18 : vector<1x32xf32> to vector<16x32xf32>
      %42 = arith.addf %40, %41 : vector<16x32xf32>
      %c0_24 = arith.constant 0 : index
      %c0_25 = arith.constant 0 : index
      %43 = vector.load %arg7[%c0_24, %c0_25] : memref<16x32xf32, #tpu.memory_space<vmem>>, vector<16x32xf32>
      tpu.vector_store %arg7[%c0_24, %c0_25], %42 {strides = array<i32>} : memref<16x32xf32, #tpu.memory_space<vmem>>, vector<16x32xf32>,
    } else {
    }
    return
  }
  func.func @transform_0(%arg0: i32, %arg1: i32) -> (i32, i32) {
    %c0_i32 = arith.constant 0 : i32
    return %arg0, %arg1 : i32, i32
  }
  func.func @transform_1(%arg0: i32, %arg1: i32) -> (i32, i32) {
    %c0_i32 = arith.constant 0 : i32
    %c0_i32_0 = arith.constant 0 : i32
    return %arg1, %c0_i32 : i32, i32
  }
  func.func @transform_2(%arg0: i32, %arg1: i32) -> (i32, i32) {
    %c0_i32 = arith.constant 0 : i32
    %c0_i32_0 = arith.constant 0 : i32
    %c0_i32_1 = arith.constant 0 : i32
    return %c0_i32, %c0_i32_0 : i32, i32
  }
  func.func @transform_3(%arg0: i32, %arg1: i32) -> (i32, i32) {
    %c0_i32 = arith.constant 0 : i32
    %c0_i32_0 = arith.constant 0 : i32
    %c0_i32_1 = arith.constant 0 : i32
    return %c0_i32, %c0_i32_0 : i32, i32
  }
  func.func @transform_4(%arg0: i32, %arg1: i32) -> (i32, i32) {
    %c0_i32 = arith.constant 0 : i32
    %c0_i32_0 = arith.constant 0 : i32
    %c0_i32_1 = arith.constant 0 : i32
    return %c0_i32, %c0_i32_0 : i32, i32
  }
  func.func @transform_5(%arg0: i32, %arg1: i32) -> (i32, i32) {
    %c0_i32 = arith.constant 0 : i32
    %c0_i32_0 = arith.constant 0 : i32
    return %arg0, %c0_i32 : i32, i32
  }
}

</mosaic_0001>

<bundles_post_ra>
// kernel: sa2_forward.10
= control target key start
LH: loop header
LB: loop body
LE: loop exit
PB: predicated region body
PF: predicated region fallthrough
CT: control target
= control target key end

     0   :  { %vm19_vm0 = vcmask 261120   ;;  %v150_v0 = vmov 0.0   ;;  %vm151_vm1 = vmmov 0   ;;  %vm118_vm2 = vcmask 257024   ;;  %s195_s1 = inlined_call_operand.vmem [shape: bf16[32,32], index: 1, kind: input, shape index: {}]   ;;  %s196_s0 = inlined_call_operand.vmem [shape: bf16[16,32], index: 0, kind: input, shape index: {}]   ;;  %s197_s2 = inlined_call_operand.vmem [shape: f32[1,32], index: 2, kind: input, shape index: {}]   ;;  %s198_s3 = inlined_call_operand.vmem [shape: bf16[16,32], index: 3, kind: output, shape index: {}]  }
   0x1   :  { %137 = vmatprep.subr.bf16.mxu0 %v150_v0  ;;  %v147_v1 = vld [vmem:[%s195_s1] sm:$0xff]   ;;  %141 = vmatprep.mubr.msk.bf16.mxu0 %vm151_vm1, %v150_v0  ;;  %20 = vst.msk [vmem:[#allocation2] sm:$0xff] %vm19_vm0, %v150_v0  ;;  %21 = vst.msk [vmem:[#allocation2 + $0x8] sm:$0xff] %vm19_vm0, %v150_v0  ;;  %v148_v2 = vld [vmem:[%s195_s1 + $0x8] sm:$0xff]  }
   0x2   :  { %138 = vmatpush3.bf16.msra.mxu0 %v147_v1  ;;  %v149_v3 = vld [vmem:[%s196_s0] sm:$0xff]  }
   0x3   :  { %139 = vmatprep.subr.bf16.mxu0 %v150_v0  ;;  %v129_v12 = vld [vmem:[%s197_s2] ss:$0 sm:$0xff] }
   0x6   :  { %140 = vmatpush3.bf16.msra.mxu0 %v148_v2 }
   0x8   :  { %v22_v4 = vld [vmem:[#allocation2] sm:$0xff]  ;;  %v23_v6 = vld [vmem:[#allocation2 + $0x8] sm:$0xff] }
   0x9   :  { %142 = vmatmul.mubr.msk.bf16.vlgmr.msra.gmra.mrb[0].mxu0 %vm19_vm0, %v149_v3 }
  0xdc   :  { %v85_v5 = vpop.f32.mrb[0].mxu0 }
  0xdd   :  { %v92_v7 = vadd.f32 %v85_v5, %v22_v4  ;;  %v143_v8 = vpop.f32.mrb[1].mxu0 }
  0xde   :  { %v88_v9 = vpop.f32.mrb[2].mxu0 }
  0xdf   :  { %94 = vst.msk [vmem:[#allocation2] sm:$0xff] %vm19_vm0, %v92_v7  ;;  %v93_v10 = vadd.f32 %v88_v9, %v23_v6  ;;  %v144_v11 = vpop.f32.mrb[3].mxu0 }
  0xe1   :  { %95 = vst.msk [vmem:[#allocation2 + $0x8] sm:$0xff] %vm19_vm0, %v93_v10 }
  0xe6   :  { %v99_v13 = vld [vmem:[#allocation2] sm:$0xff] }
  0xe7   :  { %v108_v14 = vadd.f32 %v129_v12, %v99_v13 }
  0xe8   :  { %v100_v15 = vld [vmem:[#allocation2 + $0x8] sm:$0xff] }
  0xe9   :  { %v132_v16 = vpack.c.bf16 %v108_v14, %v108_v14  ;;  %v109_v17 = vadd.f32 %v129_v12, %v100_v15 }
  0xeb   :  { %119 = vst.msk [vmem:[%s198_s3] sm:$0xf] %vm118_vm2, %v132_v16  ;;  %v133_v18 = vpack.c.bf16 %v109_v17, %v109_v17 }
  0xed   :  { %120 = vst.msk [vmem:[%s198_s3 + $0x4] sm:$0xf] %vm118_vm2, %v133_v18 }

// kernel: sa2_forward.16
= control target key start
LH: loop header
LB: loop body
LE: loop exit
PB: predicated region body
PF: predicated region fallthrough
CT: control target
= control target key end

     0   :  { %v148_v0 = vmov 0.0   ;;  %vm46_vm0 = vcmask 1043456   ;;  %vm149_vm1 = vmmov 0   ;;  %vm42_vm2 = vcmask 195584   ;;  %s188_s1 = inlined_call_operand.vmem [shape: bf16[24,128], index: 1, kind: input, shape index: {}]   ;;  %s189_s0 = inlined_call_operand.vmem [shape: bf16[12,24], index: 0, kind: input, shape index: {}]   ;;  %s190_s2 = inlined_call_operand.vmem [shape: f32[1,128], index: 2, kind: input, shape index: {}]   ;;  %s191_s3 = inlined_call_operand.vmem [shape: bf16[12,128], index: 3, kind: output, shape index: {}]  }
   0x1   :  { %135 = vmatprep.subr.bf16.mxu0 %v148_v0  ;;  %20 = vst [vmem:[#allocation2 + $0x8] sm:$0xf] %v148_v0  ;;  %v145_v1 = vld [vmem:[%s188_s1] sm:$0xff]   ;;  %139 = vmatprep.mubr.msk.bf16.mxu0 %vm149_vm1, %v148_v0  ;;  %v146_v2 = vld [vmem:[%s188_s1 + $0x8] ss:$0 sps:$4 sm:$0xff]  }
   0x2   :  { %136 = vmatpush3.bf16.msra.mxu0 %v145_v1  ;;  %v48_v3 = vsel %vm46_vm0, %v146_v2, 0  ;;  %v147_v4 = vld [vmem:[%s189_s0] sm:$0x3f]  }
   0x3   :  { %137 = vmatprep.subr.bf16.mxu0 %v148_v0  ;;  %v127_v6 = vld [vmem:[%s190_s2] ss:$0 sm:$0xff] }
   0x6   :  { %138 = vmatpush3.bf16.msra.mxu0 %v48_v3 }
   0x8   :  { %v22_v7 = vld [vmem:[#allocation2 + $0x8] sm:$0xf] }
   0x9   :  { %140 = vmatmul.mubr.msk.bf16.vlgmr.msra.gmra.mrb[0].mxu0 %vm42_vm2, %v147_v4 }
  0xdc   :  { %v84_v5 = vpop.f32.mrb[0].mxu0 }
  0xdd   :  { %v141_v8 = vpop.f32.mrb[1].mxu0  ;;  %v107_v10 = vadd.f32 %v127_v6, %v84_v5 }
  0xde   :  { %v87_v9 = vpop.f32.mrb[2].mxu0 }
  0xdf   :  { %v92_v11 = vadd.f32 %v87_v9, %v22_v7  ;;  %v142_v12 = vpop.f32.mrb[3].mxu0  ;;  %v130_v13 = vpack.c.bf16 %v107_v10, %v107_v10 }
  0xe1   :  { %94 = vst [vmem:[#allocation2 + $0x8] sm:$0xf] %v92_v11  ;;  %117 = vst [vmem:[%s191_s3] sm:$0xf] %v130_v13 }
  0xe8   :  { %v99_v14 = vld [vmem:[#allocation2 + $0x8] sm:$0xf] }
  0xe9   :  { %v108_v15 = vadd.f32 %v127_v6, %v99_v14 }
  0xeb   :  { %v131_v16 = vpack.c.bf16 %v108_v15, %v108_v15 }
  0xed   :  { %118 = vst [vmem:[%s191_s3 + $0x4] sm:$0x3] %v131_v16 }

// kernel: sa2_forward.11
= control target key start
LH: loop header
LB: loop body
LE: loop exit
PB: predicated region body
PF: predicated region fallthrough
CT: control target
= control target key end

     0   :  { %vm19_vm0 = vcmask 523264   ;;  %v151_v0 = vmov 0.0   ;;  %vm152_vm1 = vmmov 0   ;;  %vm47_vm2 = vcmask 261120   ;;  %s195_s1 = inlined_call_operand.vmem [shape: bf16[32,64], index: 1, kind: input, shape index: {}]   ;;  %s196_s0 = inlined_call_operand.vmem [shape: bf16[16,32], index: 0, kind: input, shape index: {}]   ;;  %s197_s2 = inlined_call_operand.vmem [shape: f32[1,64], index: 2, kind: input, shape index: {}]   ;;  %s198_s3 = inlined_call_operand.vmem [shape: bf16[16,64], index: 3, kind: output, shape index: {}]  }
   0x1   :  { %138 = vmatprep.subr.bf16.mxu0 %v151_v0  ;;  %v148_v1 = vld [vmem:[%s195_s1] sm:$0xff]   ;;  %142 = vmatprep.mubr.msk.bf16.mxu0 %vm152_vm1, %v151_v0  ;;  %20 = vst.msk [vmem:[#allocation2] sm:$0xff] %vm19_vm0, %v151_v0  ;;  %21 = vst.msk [vmem:[#allocation2 + $0x8] sm:$0xff] %vm19_vm0, %v151_v0  ;;  %v149_v2 = vld [vmem:[%s195_s1 + $0x8] sm:$0xff]   ;;  %vm119_vm3 = vcmask 519168  }
   0x2   :  { %139 = vmatpush3.bf16.msra.mxu0 %v148_v1  ;;  %v150_v3 = vld [vmem:[%s196_s0] sm:$0xff]  }
   0x3   :  { %140 = vmatprep.subr.bf16.mxu0 %v151_v0  ;;  %v130_v12 = vld [vmem:[%s197_s2] ss:$0 sm:$0xff] }
   0x6   :  { %141 = vmatpush3.bf16.msra.mxu0 %v149_v2 }
   0x8   :  { %v22_v4 = vld [vmem:[#allocation2] sm:$0xff]  ;;  %v23_v6 = vld [vmem:[#allocation2 + $0x8] sm:$0xff] }
   0x9   :  { %143 = vmatmul.mubr.msk.bf16.vlgmr.msra.gmra.mrb[0].mxu0 %vm47_vm2, %v150_v3 }
  0xdc   :  { %v85_v5 = vpop.f32.mrb[0].mxu0 }
  0xdd   :  { %v92_v7 = vadd.f32 %v85_v5, %v22_v4  ;;  %v144_v8 = vpop.f32.mrb[1].mxu0 }
  0xde   :  { %v88_v9 = vpop.f32.mrb[2].mxu0 }
  0xdf   :  { %95 = vst.msk [vmem:[#allocation2] sm:$0xff] %vm19_vm0, %v92_v7  ;;  %v93_v10 = vadd.f32 %v88_v9, %v23_v6  ;;  %v145_v11 = vpop.f32.mrb[3].mxu0 }
  0xe1   :  { %96 = vst.msk [vmem:[#allocation2 + $0x8] sm:$0xff] %vm19_vm0, %v93_v10 }
  0xe6   :  { %v100_v13 = vld [vmem:[#allocation2] sm:$0xff] }
  0xe7   :  { %v109_v14 = vadd.f32 %v130_v12, %v100_v13 }
  0xe8   :  { %v101_v15 = vld [vmem:[#allocation2 + $0x8] sm:$0xff] }
  0xe9   :  { %v133_v16 = vpack.c.bf16 %v109_v14, %v109_v14  ;;  %v110_v17 = vadd.f32 %v130_v12, %v101_v15 }
  0xeb   :  { %120 = vst.msk [vmem:[%s198_s3] sm:$0xf] %vm119_vm3, %v133_v16  ;;  %v134_v18 = vpack.c.bf16 %v110_v17, %v110_v17 }
  0xed   :  { %121 = vst.msk [vmem:[%s198_s3 + $0x4] sm:$0xf] %vm119_vm3, %v134_v18 }

// kernel: sa2_forward.12
= control target key start
LH: loop header
LB: loop body
LE: loop exit
PB: predicated region body
PF: predicated region fallthrough
CT: control target
= control target key end

     0   :  { %s1123_s9 = smov 0   ;;  %s1125_s10 = smov 0   ;;  %s1286_s0 = inlined_call_operand.vmem [shape: bf16[2,8,32], index: 0, kind: input, shape index: {}]   ;;  %s1287_s1 = inlined_call_operand.vmem [shape: bf16[2,8,64], index: 1, kind: input, shape index: {}]   ;;  %s1288_s2 = inlined_call_operand.vmem [shape: bf16[2,8,32], index: 2, kind: output, shape index: {}]  }
   0x1   :  { %s1127_s11 = smov 0  }
   0x2 LB: > { %s31_s12 = sadd.s32 1, %s1088_s10  ;;  %p925_p0 = scmp.ge.s32.totalorder %s1092_s11, 1  ;;  %s1092_s11 = sphi %s1127_s11, %s12_s11   ;;  %s1088_s10 = sphi %s1125_s10, %s1290_s10   ;;  %s1084_s9 = sphi %s1123_s9, %s1289_s9  }
   0x3   : > { %p33_p1 = scmp.ge.s32.totalorder %s31_s12, 2  ;;  %p151_p2 = scmp.lt.s32.totalorder %s1092_s11, 3 }
   0x5   : > { %s1292_s12 = smov (%p33_p1, %s31_s12), 0  ;;  %p152_p3 = pnand %p925_p0, %p151_p2 }
   0x6   : > { %p184_p4 = scmp.lt.s32.totalorder (!%p152_p3), %s1084_s9, 1  ;;  %vm220_vm0 = vcmask (!%p152_p3), 64512   ;;  %v1094_v0 = vmov (!%p152_p3), 0.0   ;;  %vm1095_vm1 = vmmov (!%p152_p3), 0   ;;  %vm211_vm2 = vcmask (!%p152_p3), 7168   ;;  %s1098_s20 = smov (!%p152_p3), 96  }
   0x7   : > { %155 = sbr.rel (%p152_p3) target bundleno = 1465 (0x5b9), region = 28  ;;  %957 = vmatprep.subr.bf16.mxu0 (!%p152_p3), %v1094_v0  ;;  %221 = vst.msk [vmem:[#allocation4] sm:$0xff] (!%p152_p3), %vm220_vm0, %v1094_v0  ;;  %222 = vst.msk [vmem:[#allocation4 + $0x8] sm:$0xff] (!%p152_p3), %vm220_vm0, %v1094_v0  ;;  %959 = vmatprep.mubr.msk.bf16.mxu0 (!%p152_p3), %vm1095_vm1, %v1094_v0  ;;  %v1096_v5 = vmov (!%p152_p3), -inf   ;;  %v1097_v11 = vmov (!%p152_p3), 0   ;;  %s1099_s21 = smov (!%p152_p3), 120  }
   0x8   : > { %223 = vst.msk [vmem:[#allocation4 + $0x10] sm:$0xff] (!%p152_p3), %vm220_vm0, %v1094_v0  ;;  %224 = vst.msk [vmem:[#allocation4 + $0x18] sm:$0xff] (!%p152_p3), %vm220_vm0, %v1094_v0  ;;  %963 = vmatprep.subr.bf16.mxu1 (!%p152_p3), %v1094_v0  ;;  %965 = vmatprep.mubr.msk.bf16.mxu1 (!%p152_p3), %vm1095_vm1, %v1094_v0  ;;  %s1100_s22 = smov (!%p152_p3), 112   ;;  %s1101_s23 = smov (!%p152_p3), 104   ;;  %vm315_vm3 = vcmask (!%p152_p3), 1043456   ;;  %vm822_vm4 = vcmask (!%p152_p3), 130048  }
   0x9   : > { %212 = vst.msk [vmem:[#allocation2] sm:$0xff] (!%p152_p3), %vm211_vm2, %v1096_v5  ;;  %213 = vst.msk [vmem:[#allocation2 + $0x8] sm:$0xff] (!%p152_p3), %vm211_vm2, %v1096_v5  ;;  %1043 = vset.pattern.permute.xlu0 (!%p152_p3), %v1097_v11  ;;  %1044 = vset.pattern.permute.xlu1 (!%p152_p3), %v1097_v11  ;;  %s1102_s24 = smov (!%p152_p3), 88   ;;  %s1103_s25 = smov (!%p152_p3), 80   ;;  %vm824_vm5 = vcmask (!%p152_p3), 195584   ;;  %vm827_vm6 = vcmask (!%p152_p3), 257024  }
   0xa   : > { %214 = vst.msk [vmem:[#allocation2 + $0x10] sm:$0xff] (!%p152_p3), %vm211_vm2, %v1096_v5  ;;  %215 = vst.msk [vmem:[#allocation2 + $0x18] sm:$0xff] (!%p152_p3), %vm211_vm2, %v1096_v5  ;;  %s1104_s26 = smov (!%p152_p3), 72   ;;  %s1105_s27 = smov (!%p152_p3), 8  }
   0xb   : > { %216 = vst.msk [vmem:[#allocation3] sm:$0xff] (!%p152_p3), %vm211_vm2, %v1094_v0  ;;  %217 = vst.msk [vmem:[#allocation3 + $0x8] sm:$0xff] (!%p152_p3), %vm211_vm2, %v1094_v0  ;;  %s1106_s28 = smov (!%p152_p3), 16   ;;  %s1107_s29 = smov (!%p152_p3), 24  }
   0xc   : > { %218 = vst.msk [vmem:[#allocation3 + $0x10] sm:$0xff] (!%p152_p3), %vm211_vm2, %v1094_v0  ;;  %219 = vst.msk [vmem:[#allocation3 + $0x18] sm:$0xff] (!%p152_p3), %vm211_vm2, %v1094_v0 }
   0xe   : > { %s1294_s9 = smov (!%p184_p4, %s1084_s9), 1 }
   0xf   : > { %s1155_s13 = sshll.u32 %s1294_s9, 2 }
  0x10   : > { %s190_s16 = scalar_lea.vmem %s1286_s0, %s1155_s13  ;;  %s197_s19 = scalar_lea.vmem %s1287_s1, %s1155_s13  ;;  %v1189_v14 = vld [vmem:[#allocation2] sm:$0xff]  ;;  %v1225_v53 = vld [vmem:[#allocation2 + $0x8] sm:$0xff] }
  0x11   : > { %v226_v1 = vld [vmem:[%s197_s19] sm:$0xf]  ;;  %v551_v57 = vld [vmem:[#allocation2 + $0x10] sm:$0xff]  ;;  %v686_v61 = vld [vmem:[#allocation2 + $0x18] sm:$0xff]  ;;  %s204_s4 = scalar_lea.vmem %s1288_s2, %s1155_s13 }
  0x12   : > { %v233_v2 = vsel %vm220_vm0, %v226_v1, 0  ;;  %v225_v3 = vld [vmem:[%s190_s16] sm:$0xf]  ;;  %v1183_v12 = vcombine.low %v226_v1, %v226_v1 }
  0x13   : > { %958 = vmatpush3.bf16.xpose.msra.mxu0 %v233_v2  ;;  %v227_v4 = vmul.bf16 1052065461, %v225_v3 }
  0x14   : > { %975 = vmatprep.subr.bf16.mxu0 %v1094_v0  ;;  %310 = vrot.lane.b32.xlu1 %v1183_v12, %s1098_s20 }
  0x15   : > { %v932_v13 = vcombine.low %v227_v4, %v227_v4 }
  0x18   : > { %367 = vrot.lane.b32.xlu1 %v1183_v12, %s1099_s21 }
  0x1a   : > { %960 = vmatmul.mubr.msk.bf16.vlgmr.msra.gmra.mrb[0].mxu0 %vm220_vm0, %v227_v4 }
  0x1b   : > { %977 = vmatprep.mubr.msk.bf16.mxu0 %vm1095_vm1, %v1094_v0 }
  0x1c   : > { %365 = vrot.lane.b32.xlu1 %v932_v13, %s1099_s21 }
  0x20   : > { %502 = vrot.lane.b32.xlu1 %v1183_v12, %s1100_s22 }
  0x24   : > { %500 = vrot.lane.b32.xlu1 %v932_v13, %s1100_s22 }
  0x28   : > { %637 = vrot.lane.b32.xlu1 %v1183_v12, %s1101_s23 }
  0x2c   : > { %635 = vrot.lane.b32.xlu1 %v932_v13, %s1101_s23 }
  0x86   : > { %v311_v18 = vpop.permute.xlu1 %310 }
  0x87   : > { %v317_v19 = vsel %vm315_vm3, %v311_v18, 0 }
  0x88   : > { %964 = vmatpush3.bf16.msra.mxu1 %v317_v19 }
  0x89   : > { %969 = vmatprep.subr.bf16.mxu1 %v1094_v0 }
  0x8a   : > { %v368_v23 = vpop.permute.xlu1 %367 }
  0x8b   : > { %v373_v26 = vsel %vm220_vm0, %v368_v23, 0 }
  0x8e   : > { %v366_v24 = vpop.permute.xlu1 %365 }
  0x92   : > { %v503_v28 = vpop.permute.xlu1 %502 }
  0x93   : > { %v508_v30 = vsel %vm220_vm0, %v503_v28, 0 }
  0x96   : > { %v501_v29 = vpop.permute.xlu1 %500 }
  0x9a   : > { %v638_v31 = vpop.permute.xlu1 %637 }
  0x9b   : > { %v643_v32 = vsel %vm220_vm0, %v638_v31, 0 }
  0x9e   : > { %v636_v33 = vpop.permute.xlu1 %635 }
  0xed   : > { %v269_v6 = vpop.f32.mrb[0].mxu0 }
  0xee   : > { %v961_v7 = vpop.f32.mrb[1].mxu0  ;;  %v276_v8 = vsel %vm220_vm0, %v269_v6, -inf }
  0xef   : > { %277 = vmax.xlane.f32.xlu0 %v276_v8  ;;  %v272_v9 = vpop.f32.mrb[2].mxu0 }
  0xf0   : > { %v962_v10 = vpop.f32.mrb[3].mxu0 }
 0x17c   : > { %v278_v15 = vpop.xlane.xlu0 %277 }
 0x17d   : > { %v1192_v16 = vmax.f32 %v1189_v14, %v278_v15 }
 0x17f   : > { %v280_v17 = vsub.f32 %v1189_v14, %v1192_v16  ;;  %361 = vst.msk [vmem:[#allocation2] sm:$0xff] %vm211_vm2, %v1192_v16  ;;  %285 = vperm.xlu0 %1043, %v1192_v16  }
 0x1fe   : > { %v286_v20 = vpop.permute.xlu0 %285 }
 0x1ff   : > { %v288_v21 = vsub.f32 %v269_v6, %v286_v20 }
 0x201   : > { %v289_v22 = vmul.f32 1.442695, %v288_v21 }
 0x203   : > { %1046 = vpow2.f32 %v289_v22 }
 0x20d   : > { %v1201_v25 = vpop.eup %1046 }
 0x20e   : > { %v306_v27 = vpack.c.bf16 %v1201_v25, %v1201_v25  ;;  %v293_v2 = vsel %vm220_vm0, %v1201_v25, 0.0 }
 0x210   : > { %966 = vmatmul.mubr.msk.bf16.vlgmr.msra.gmra.mrb[0].mxu1 %vm220_vm0, %v306_v27 }
 0x211   : > { %970 = vmatpush3.bf16.xpose.msra.mxu1 %v373_v26  ;;  %971 = vmatprep.mubr.msk.bf16.mxu1 %vm1095_vm1, %v1094_v0 }
 0x212   : > { %981 = vmatprep.subr.bf16.mxu1 %v1094_v0 }
 0x218   : > { %972 = vmatmul.mubr.msk.bf16.vlgmr.msra.gmra.mrb[4].mxu1 %vm220_vm0, %v366_v24 }
 0x219   : > { %982 = vmatpush3.bf16.xpose.msra.mxu1 %v508_v30  ;;  %983 = vmatprep.mubr.msk.bf16.mxu1 %vm1095_vm1, %v1094_v0 }
 0x21a   : > { %993 = vmatprep.subr.bf16.mxu1 %v1094_v0 }
 0x220   : > { %984 = vmatmul.mubr.msk.bf16.vlgmr.msra.gmra.mrb[8].mxu1 %vm220_vm0, %v501_v29 }
 0x221   : > { %994 = vmatpush3.bf16.xpose.msra.mxu1 %v643_v32  ;;  %995 = vmatprep.mubr.msk.bf16.mxu1 %vm1095_vm1, %v1094_v0 }
 0x228   : > { %996 = vmatmul.mubr.msk.bf16.vlgmr.msra.gmra.mrb[12].mxu1 %vm220_vm0, %v636_v33 }
 0x2e3   : > { %v1220_v34 = vpop.f32.mrb[0].mxu1 }
 0x2e4   : > { %v967_v35 = vpop.f32.mrb[1].mxu1 }
 0x2e5   : > { %v356_v36 = vpop.f32.mrb[2].mxu1  ;;  %v291_v35 = vld [vmem:[#allocation3] sm:$0xff] }
 0x2e6   : > { %v968_v37 = vpop.f32.mrb[3].mxu1 }
 0x2eb   : > { %v409_v38 = vpop.f32.mrb[4].mxu1 }
 0x2ec   : > { %v973_v39 = vpop.f32.mrb[5].mxu1  ;;  %v417_v40 = vsel %vm220_vm0, %v409_v38, -inf }
 0x2ed   : > { %418 = vmax.xlane.f32.xlu1 %v417_v40  ;;  %v412_v41 = vpop.f32.mrb[6].mxu1 }
 0x2ee   : > { %v974_v42 = vpop.f32.mrb[7].mxu1  ;;  %v433_v41 = vld [vmem:[#allocation3 + $0x8] sm:$0xff] }
 0x2f3   : > { %v544_v43 = vpop.f32.mrb[8].mxu1 }
 0x2f4   : > { %v985_v44 = vpop.f32.mrb[9].mxu1  ;;  %v552_v45 = vsel %vm220_vm0, %v544_v43, -inf }
 0x2f5   : > { %553 = vmax.xlane.f32.xlu0 %v552_v45  ;;  %v547_v46 = vpop.f32.mrb[10].mxu1  ;;  %v299_v45 = vld [vmem:[#allocation4] sm:$0xff] }
 0x2f6   : > { %v986_v47 = vpop.f32.mrb[11].mxu1 }
 0x2f7   : > { %v568_v47 = vld [vmem:[#allocation3 + $0x10] sm:$0xff] }
 0x2fb   : > { %v679_v48 = vpop.f32.mrb[12].mxu1 }
 0x2fc   : > { %v997_v49 = vpop.f32.mrb[13].mxu1  ;;  %v687_v50 = vsel %vm220_vm0, %v679_v48, -inf }
 0x2fd   : > { %688 = vmax.xlane.f32.xlu1 %v687_v50  ;;  %v682_v51 = vpop.f32.mrb[14].mxu1 }
 0x2fe   : > { %v998_v52 = vpop.f32.mrb[15].mxu1 }
 0x37a   : > { %v419_v54 = vpop.xlane.xlu1 %418 }
 0x37b   : > { %v1228_v55 = vmax.f32 %v1225_v53, %v419_v54  ;;  %v703_v54 = vld [vmem:[#allocation3 + $0x18] sm:$0xff] }
 0x37d   : > { %v421_v56 = vsub.f32 %v1225_v53, %v1228_v55  ;;  %499 = vst.msk [vmem:[#allocation2 + $0x8] sm:$0xff] %vm211_vm2, %v1228_v55  ;;  %426 = vperm.xlu1 %1044, %v1228_v55  }
 0x37f   : > { %v422_v32 = vmul.f32 1.442695, %v421_v56 }
 0x382   : > { %v554_v58 = vpop.xlane.xlu0 %553 }
 0x383   : > { %v555_v59 = vmax.f32 %v551_v57, %v554_v58 }
 0x385   : > { %v556_v60 = vsub.f32 %v551_v57, %v555_v59  ;;  %634 = vst.msk [vmem:[#allocation2 + $0x10] sm:$0xff] %vm211_vm2, %v555_v59  ;;  %561 = vperm.xlu0 %1043, %v555_v59  }
 0x387   : > { %v557_v21 = vmul.f32 1.442695, %v556_v60 }
 0x38a   : > { %v689_v62 = vpop.xlane.xlu1 %688 }
 0x38b   : > { %v690_v63 = vmax.f32 %v686_v61, %v689_v62  ;;  %v441_v62 = vld [vmem:[#allocation4 + $0x8] sm:$0xff] }
 0x38d   : > { %v691_v1 = vsub.f32 %v686_v61, %v690_v63  ;;  %769 = vst.msk [vmem:[#allocation2 + $0x18] sm:$0xff] %vm211_vm2, %v690_v63  ;;  %696 = vperm.xlu1 %1044, %v690_v63  }
 0x38f   : > { %v692_v16 = vmul.f32 1.442695, %v691_v1 }
 0x391   : > { %449 = vrot.lane.b32.xlu1 %v1183_v12, %s1102_s24 }
 0x395   : > { %584 = vrot.lane.b32.xlu1 %v1183_v12, %s1103_s25 }
 0x399   : > { %719 = vrot.lane.b32.xlu1 %v1183_v12, %s1104_s26  ;;  %v281_v12 = vmul.f32 1.442695, %v280_v17 }
 0x3a4   : > { %294 = vadd.xlane.f32.xlu0 %v293_v2 }
 0x3fc   : > { %v427_v3 = vpop.permute.xlu1 %426 }
 0x3fd   : > { %v429_v4 = vsub.f32 %v409_v38, %v427_v3 }
 0x3ff   : > { %v430_v5 = vmul.f32 1.442695, %v429_v4 }
 0x401   : > { %1048 = vpow2.f32 %v430_v5 }
 0x404   : > { %v562_v6 = vpop.permute.xlu0 %561 }
 0x405   : > { %v564_v7 = vsub.f32 %v544_v43, %v562_v6 }
 0x407   : > { %v565_v8 = vmul.f32 1.442695, %v564_v7  ;;  %v576_v7 = vld [vmem:[#allocation4 + $0x10] sm:$0xff] }
 0x409   : > { %1050 = vpow2.f32 %v565_v8 }
 0x40b   : > { %v1049_v9 = vpop.eup %1048 }
 0x40c   : > { %v697_v10 = vpop.permute.xlu1 %696  ;;  %v435_v11 = vsel %vm220_vm0, %v1049_v9, 0.0  ;;  %v448_v22 = vpack.c.bf16 %v1049_v9, %v1049_v9 }
 0x40d   : > { %v699_v13 = vsub.f32 %v679_v48, %v697_v10  ;;  %436 = vadd.xlane.f32.xlu1 %v435_v11 }
 0x40f   : > { %v700_v15 = vmul.f32 1.442695, %v699_v13 }
 0x410   : > { %v450_v18 = vpop.permute.xlu1 %449 }
 0x411   : > { %1052 = vpow2.f32 %v700_v15  ;;  %v455_v19 = vsel %vm315_vm3, %v450_v18, 0  ;;  %v711_v18 = vld [vmem:[#allocation4 + $0x18] sm:$0xff] }
 0x412   : > { %976 = vmatpush3.bf16.msra.mxu0 %v455_v19  ;;  %1054 = vpow2.f32 %v281_v12 }
 0x413   : > { %v1051_v20 = vpop.eup %1050  ;;  %987 = vmatprep.subr.bf16.mxu0 %v1094_v0  ;;  %1056 = vpow2.f32 %v557_v21 }
 0x414   : > { %v570_v23 = vsel %vm220_vm0, %v1051_v20, 0.0  ;;  %v585_v24 = vpop.permute.xlu1 %584  ;;  %1058 = vpow2.f32 %v692_v16  ;;  %v583_v26 = vpack.c.bf16 %v1051_v20, %v1051_v20 }
 0x415   : > { %978 = vmatmul.mubr.msk.bf16.vlgmr.msra.gmra.mrb[4].mxu0 %vm220_vm0, %v448_v22  ;;  %571 = vadd.xlane.f32.xlu0 %v570_v23  ;;  %v590_v14 = vsel %vm315_vm3, %v585_v24, 0  ;;  %1060 = vpow2.f32 %v422_v32 }
 0x416   : > { %988 = vmatpush3.bf16.msra.mxu0 %v590_v14  ;;  %989 = vmatprep.mubr.msk.bf16.mxu0 %vm1095_vm1, %v1094_v0 }
 0x417   : > { %999 = vmatprep.subr.bf16.mxu0 %v1094_v0 }
 0x418   : > { %v720_v17 = vpop.permute.xlu1 %719 }
 0x419   : > { %v725_v27 = vsel %vm315_vm3, %v720_v17, 0 }
 0x41b   : > { %v1053_v25 = vpop.eup %1052 }
 0x41c   : > { %v705_v28 = vsel %vm220_vm0, %v1053_v25, 0.0  ;;  %v1055_v29 = vpop.eup %1054  ;;  %v718_v31 = vpack.c.bf16 %v1053_v25, %v1053_v25 }
 0x41d   : > { %990 = vmatmul.mubr.msk.bf16.vlgmr.msra.gmra.mrb[8].mxu0 %vm220_vm0, %v583_v26  ;;  %706 = vadd.xlane.f32.xlu0 %v705_v28  ;;  %v1057_v30 = vpop.eup %1056  ;;  %v292_v36 = vmul.f32 %v1055_v29, %v291_v35 }
 0x41e   : > { %302 = vperm.xlu1 %1044, %v1055_v29   ;;  %1000 = vmatpush3.bf16.msra.mxu0 %v725_v27  ;;  %v1059_v33 = vpop.eup %1058  ;;  %v569_v50 = vmul.f32 %v1057_v30, %v568_v47 }
 0x41f   : > { %1001 = vmatprep.mubr.msk.bf16.mxu0 %vm1095_vm1, %v1094_v0  ;;  %v1061_v38 = vpop.eup %1060  ;;  %v704_v55 = vmul.f32 %v1059_v33, %v703_v54 }
 0x420   : > { %v434_v42 = vmul.f32 %v1061_v38, %v433_v41 }
 0x422   : > { %579 = vperm.xlu1 %1044, %v1057_v30  }
 0x425   : > { %1002 = vmatmul.mubr.msk.bf16.vlgmr.msra.gmra.mrb[12].mxu0 %vm220_vm0, %v718_v31 }
 0x426   : > { %714 = vperm.xlu1 %1044, %v1059_v33  }
 0x431   : > { %v295_v37 = vpop.xlane.xlu0 %294 }
 0x432   : > { %v296_v39 = vadd.f32 %v295_v37, %v292_v36 }
 0x433   : > { %444 = vperm.xlu0 %1043, %v1061_v38  }
 0x434   : > { %298 = vst.msk [vmem:[#allocation3] sm:$0xff] %vm211_vm2, %v296_v39 }
 0x43b   : > { %v773_v0 = vld [vmem:[#allocation3] sm:$0xff] }
 0x43c   : > { %1062 = vrcp.f32 %v773_v0 }
 0x446   : > { %v1063_v40 = vpop.eup %1062 }
 0x447   : > { %778 = vperm.xlu0 %1043, %v1063_v40  }
 0x49a   : > { %v437_v43 = vpop.xlane.xlu1 %436 }
 0x49b   : > { %v438_v44 = vadd.f32 %v437_v43, %v434_v42 }
 0x49d   : > { %439 = vst.msk [vmem:[#allocation3 + $0x8] sm:$0xff] %vm211_vm2, %v438_v44 }
 0x49e   : > { %v303_v46 = vpop.permute.xlu1 %302 }
 0x49f   : > { %v305_v48 = vmul.f32 %v303_v46, %v299_v45 }
 0x4a1   : > { %v359_v49 = vadd.f32 %v1220_v34, %v305_v48 }
 0x4a2   : > { %v572_v51 = vpop.xlane.xlu0 %571  ;;  %v580_v8 = vpop.permute.xlu1 %579 }
 0x4a3   : > { %360 = vst.msk [vmem:[#allocation4] sm:$0xff] %vm220_vm0, %v359_v49  ;;  %v573_v52 = vadd.f32 %v572_v51, %v569_v50  ;;  %v582_v9 = vmul.f32 %v580_v8, %v576_v7 }
 0x4a4   : > { %v782_v53 = vld [vmem:[#allocation3 + $0x8] sm:$0xff] }
 0x4a5   : > { %574 = vst.msk [vmem:[#allocation3 + $0x10] sm:$0xff] %vm211_vm2, %v573_v52  ;;  %1064 = vrcp.f32 %v782_v53 }
 0x4a6   : > { %v715_v19 = vpop.permute.xlu1 %714 }
 0x4a7   : > { %v717_v20 = vmul.f32 %v715_v19, %v711_v18 }
 0x4aa   : > { %v707_v56 = vpop.xlane.xlu0 %706  ;;  %v775_v33 = vld [vmem:[#allocation4] sm:$0xff] }
 0x4ab   : > { %v708_v57 = vadd.f32 %v707_v56, %v704_v55 }
 0x4ac   : > { %v791_v58 = vld [vmem:[#allocation3 + $0x10] sm:$0xff] }
 0x4ad   : > { %709 = vst.msk [vmem:[#allocation3 + $0x18] sm:$0xff] %vm211_vm2, %v708_v57  ;;  %1066 = vrcp.f32 %v791_v58 }
 0x4af   : > { %v1065_v59 = vpop.eup %1064 }
 0x4b0   : > { %787 = vperm.xlu1 %1044, %v1065_v59  }
 0x4b2   : > { %v445_v63 = vpop.permute.xlu0 %444 }
 0x4b3   : > { %v447_v1 = vmul.f32 %v445_v63, %v441_v62 }
 0x4b4   : > { %v800_v34 = vld [vmem:[#allocation3 + $0x18] sm:$0xff] }
 0x4b5   : > { %1068 = vrcp.f32 %v800_v34 }
 0x4b7   : > { %v1067_v60 = vpop.eup %1066 }
 0x4b8   : > { %796 = vperm.xlu0 %1043, %v1067_v60  }
 0x4bf   : > { %v1069_v61 = vpop.eup %1068 }
 0x4c0   : > { %805 = vperm.xlu1 %1044, %v1069_v61  }
 0x4c6   : > { %v779_v26 = vpop.permute.xlu0 %778 }
 0x4c7   : > { %v781_v36 = vmul.f32 %v779_v26, %v775_v33 }
 0x4e8   : > { %v491_v2 = vpop.f32.mrb[4].mxu0 }
 0x4e9   : > { %v497_v3 = vadd.f32 %v491_v2, %v447_v1  ;;  %v979_v4 = vpop.f32.mrb[5].mxu0 }
 0x4ea   : > { %v494_v5 = vpop.f32.mrb[6].mxu0 }
 0x4eb   : > { %498 = vst.msk [vmem:[#allocation4 + $0x8] sm:$0xff] %vm220_vm0, %v497_v3  ;;  %v980_v6 = vpop.f32.mrb[7].mxu0 }
 0x4f0   : > { %v626_v10 = vpop.f32.mrb[8].mxu0 }
 0x4f1   : > { %v632_v11 = vadd.f32 %v626_v10, %v582_v9  ;;  %v991_v13 = vpop.f32.mrb[9].mxu0 }
 0x4f2   : > { %v629_v12 = vpop.f32.mrb[10].mxu0  ;;  %v784_v17 = vld [vmem:[#allocation4 + $0x8] sm:$0xff] }
 0x4f3   : > { %633 = vst.msk [vmem:[#allocation4 + $0x10] sm:$0xff] %vm220_vm0, %v632_v11  ;;  %v992_v15 = vpop.f32.mrb[11].mxu0 }
 0x4f8   : > { %v761_v21 = vpop.f32.mrb[12].mxu0 }
 0x4f9   : > { %v767_v22 = vadd.f32 %v761_v21, %v717_v20  ;;  %v1003_v23 = vpop.f32.mrb[13].mxu0 }
 0x4fa   : > { %v764_v24 = vpop.f32.mrb[14].mxu0  ;;  %v793_v28 = vld [vmem:[#allocation4 + $0x10] sm:$0xff] }
 0x4fb   : > { %768 = vst.msk [vmem:[#allocation4 + $0x18] sm:$0xff] %vm220_vm0, %v767_v22  ;;  %v1004_v14 = vpop.f32.mrb[15].mxu0 }
 0x502   : > { %v802_v31 = vld [vmem:[#allocation4 + $0x18] sm:$0xff] }
 0x52f   : > { %v788_v16 = vpop.permute.xlu1 %787 }
 0x530   : > { %v790_v25 = vmul.f32 %v788_v16, %v784_v17 }
 0x532   : > { %810 = vrot.lane.b32.xlu0 %v790_v25, %s1105_s27 }
 0x537   : > { %v797_v27 = vpop.permute.xlu0 %796 }
 0x538   : > { %v799_v29 = vmul.f32 %v797_v27, %v793_v28 }
 0x53a   : > { %814 = vrot.lane.b32.xlu1 %v799_v29, %s1106_s28 }
 0x53f   : > { %v806_v30 = vpop.permute.xlu1 %805 }
 0x540   : > { %v808_v32 = vmul.f32 %v806_v30, %v802_v31 }
 0x542   : > { %818 = vrot.lane.b32.xlu0 %v808_v32, %s1107_s29 }
 0x5a4   : > { %v811_v35 = vpop.permute.xlu0 %810 }
 0x5a5   : > { %v821_v38 = vsel %vm220_vm0, %v781_v36, %v811_v35 }
 0x5ac   : > { %v815_v37 = vpop.permute.xlu1 %814 }
 0x5ad   : > { %v823_v39 = vsel %vm822_vm4, %v821_v38, %v815_v37 }
 0x5b4   : > { %v819_v0 = vpop.permute.xlu0 %818 }
 0x5b5   : > { %v825_v40 = vsel %vm824_vm5, %v823_v39, %v819_v0 }
 0x5b6   : > { %v826_v41 = vpack.c.bf16 %v825_v40, %v825_v40 }
 0x5b8   : > { %828 = vst.msk [vmem:[%s204_s4] sm:$0xf] %vm827_vm6, %v826_v41 }
 0x5b9 PF: > { %s12_s11 = sadd.s32 1, %s1092_s11   ;;  %s1289_s9 = smov %s1088_s10 }
 0x5ba   : > { %p9_p5 = scmp.ge.s32.totalorder %s12_s11, 4   ;;  %s1290_s10 = smov %s1292_s12 }
 0x5bc   :  { %11 = sbr.rel (!%p9_p5) target bundleno = 2 (0x2), region = 78 }

// kernel: sa2_forward.15
= control target key start
LH: loop header
LB: loop body
LE: loop exit
PB: predicated region body
PF: predicated region fallthrough
CT: control target
= control target key end

     0   :  { %v153_v0 = vmov 0.0   ;;  %vm154_vm0 = vmmov 0   ;;  %vm46_vm1 = vcmask 261120   ;;  %s190_s1 = inlined_call_operand.vmem [shape: bf16[32,128], index: 1, kind: input, shape index: {}]   ;;  %s191_s0 = inlined_call_operand.vmem [shape: bf16[16,32], index: 0, kind: input, shape index: {}]   ;;  %s192_s2 = inlined_call_operand.vmem [shape: f32[1,128], index: 2, kind: input, shape index: {}]   ;;  %s193_s3 = inlined_call_operand.vmem [shape: bf16[16,128], index: 3, kind: output, shape index: {}]  }
   0x1   :  { %140 = vmatprep.subr.bf16.mxu0 %v153_v0  ;;  %v150_v1 = vld [vmem:[%s190_s1] sm:$0xff]   ;;  %144 = vmatprep.mubr.msk.bf16.mxu0 %vm154_vm0, %v153_v0  ;;  %v151_v2 = vld [vmem:[%s190_s1 + $0x8] sm:$0xff]  }
   0x2   :  { %141 = vmatpush3.bf16.msra.mxu0 %v150_v1  ;;  %v152_v3 = vld [vmem:[%s191_s0] sm:$0xff]  }
   0x3   :  { %142 = vmatprep.subr.bf16.mxu0 %v153_v0  ;;  %v127_v5 = vld [vmem:[%s192_s2] ss:$0 sm:$0xff] }
   0x6   :  { %143 = vmatpush3.bf16.msra.mxu0 %v151_v2 }
   0x9   :  { %145 = vmatmul.mubr.msk.bf16.vlgmr.msra.gmra.mrb[0].mxu0 %vm46_vm1, %v152_v3 }
  0xdc   :  { %v84_v4 = vpop.f32.mrb[0].mxu0 }
  0xdd   :  { %v146_v6 = vpop.f32.mrb[1].mxu0  ;;  %v107_v8 = vadd.f32 %v127_v5, %v84_v4 }
  0xde   :  { %v87_v7 = vpop.f32.mrb[2].mxu0 }
  0xdf   :  { %v108_v9 = vadd.f32 %v127_v5, %v87_v7  ;;  %v147_v10 = vpop.f32.mrb[3].mxu0 }
  0xe1   :  { %v135_v11 = vpack.c.bf16 %v108_v9, %v107_v8 }
  0xe3   :  { %136 = vst [vmem:[%s193_s3] sm:$0xff] %v135_v11  }

// kernel: sa2_forward.13
= control target key start
LH: loop header
LB: loop body
LE: loop exit
PB: predicated region body
PF: predicated region fallthrough
CT: control target
= control target key end

     0   :  { %vm28_vm0 = vcmask 261120   ;;  %v241_v0 = vmov 0.0   ;;  %vm242_vm1 = vmmov 0   ;;  %vm195_vm6 = vcmask 257024   ;;  %s314_s1 = inlined_call_operand.vmem [shape: bf16[32,32], index: 1, kind: input, shape index: {}]   ;;  %s315_s0 = inlined_call_operand.vmem [shape: bf16[16,32], index: 0, kind: input, shape index: {}]   ;;  %s316_s3 = inlined_call_operand.vmem [shape: bf16[16,32], index: 3, kind: input, shape index: {}]   ;;  %s317_s2 = inlined_call_operand.vmem [shape: f32[1,32], index: 2, kind: input, shape index: {}]   ;;  %s318_s4 = inlined_call_operand.vmem [shape: f32[1,32], index: 4, kind: input, shape index: {}]   ;;  %s319_s5 = inlined_call_operand.vmem [shape: f32[1,32], index: 5, kind: input, shape index: {}]   ;;  %s320_s6 = inlined_call_operand.vmem [shape: bf16[16,32], index: 6, kind: output, shape index: {}]  }
   0x1   :  { %220 = vmatprep.subr.bf16.mxu0 %v241_v0  ;;  %v230_v1 = vld [vmem:[%s314_s1] sm:$0xff]   ;;  %224 = vmatprep.mubr.msk.bf16.mxu0 %vm242_vm1, %v241_v0  ;;  %29 = vst.msk [vmem:[#allocation2] sm:$0xff] %vm28_vm0, %v241_v0  ;;  %30 = vst.msk [vmem:[#allocation2 + $0x8] sm:$0xff] %vm28_vm0, %v241_v0  ;;  %v231_v2 = vld [vmem:[%s314_s1 + $0x8] sm:$0xff]  }
   0x2   :  { %221 = vmatpush3.bf16.msra.mxu0 %v230_v1  ;;  %v232_v3 = vld [vmem:[%s315_s0] sm:$0xff]  }
   0x3   :  { %222 = vmatprep.subr.bf16.mxu0 %v241_v0  ;;  %v214_v12 = vld [vmem:[%s316_s3] sm:$0xff]  }
   0x4   :  { %v206_v13 = vld [vmem:[%s317_s2] ss:$0 sm:$0xff]  ;;  %v215_v14 = vunpack.c.l.bf16 %v214_v12  ;;  %v216_v17 = vunpack.c.h.bf16 %v214_v12 }
   0x5   :  { %v207_v50 = vld [vmem:[%s318_s4] ss:$0 sm:$0xff] }
   0x6   :  { %223 = vmatpush3.bf16.msra.mxu0 %v231_v2  ;;  %v208_v53 = vld [vmem:[%s319_s5] ss:$0 sm:$0xff] }
   0x8   :  { %v31_v4 = vld [vmem:[#allocation2] sm:$0xff]  ;;  %v32_v6 = vld [vmem:[#allocation2 + $0x8] sm:$0xff] }
   0x9   :  { %225 = vmatmul.mubr.msk.bf16.vlgmr.msra.gmra.mrb[0].mxu0 %vm28_vm0, %v232_v3 }
  0xdc   :  { %v94_v5 = vpop.f32.mrb[0].mxu0 }
  0xdd   :  { %v101_v7 = vadd.f32 %v94_v5, %v31_v4  ;;  %v226_v8 = vpop.f32.mrb[1].mxu0 }
  0xde   :  { %v97_v9 = vpop.f32.mrb[2].mxu0 }
  0xdf   :  { %103 = vst.msk [vmem:[#allocation2] sm:$0xff] %vm28_vm0, %v101_v7  ;;  %v102_v10 = vadd.f32 %v97_v9, %v32_v6  ;;  %v227_v11 = vpop.f32.mrb[3].mxu0 }
  0xe1   :  { %104 = vst.msk [vmem:[#allocation2 + $0x8] sm:$0xff] %vm28_vm0, %v102_v10 }
  0xe6   :  { %v108_v15 = vld [vmem:[#allocation2] sm:$0xff] }
  0xe7   :  { %v117_v16 = vadd.f32 %v206_v13, %v108_v15 }
  0xe8   :  { %v109_v18 = vld [vmem:[#allocation2 + $0x8] sm:$0xff] }
  0xe9   :  { %v123_v19 = vadd.f32 %v215_v14, %v117_v16  ;;  %v118_v20 = vadd.f32 %v206_v13, %v109_v18 }
  0xeb   :  { %v127_v21 = vsel %vm28_vm0, %v123_v19, 0.0  ;;  %v124_v22 = vadd.f32 %v216_v17, %v118_v20 }
  0xec   :  { %128 = vadd.xlane.f32.xlu0 %v127_v21 }
  0xed   :  { %v130_v23 = vsel %vm28_vm0, %v124_v22, 0.0 }
  0xf0   :  { %131 = vadd.xlane.f32.xlu0 %v130_v23 }
 0x179   :  { %v129_v24 = vpop.xlane.xlu0 %128 }
 0x17a   :  { %v134_v25 = vmul.f32 0.03125, %v129_v24 }
 0x17c   :  { %v136_v26 = vsub.f32 %v123_v19, %v134_v25 }
 0x17d   :  { %v132_v27 = vpop.xlane.xlu0 %131 }
 0x17e   :  { %v135_v28 = vmul.f32 0.03125, %v132_v27  ;;  %v138_v29 = vmul.f32 %v136_v26, %v136_v26  ;;  %v175_v51 = vmul.f32 %v207_v50, %v136_v26 }
 0x180   :  { %v137_v30 = vsub.f32 %v124_v22, %v135_v28  ;;  %v140_v31 = vsel %vm28_vm0, %v138_v29, 0.0 }
 0x181   :  { %141 = vadd.xlane.f32.xlu1 %v140_v31 }
 0x182   :  { %v139_v32 = vmul.f32 %v137_v30, %v137_v30  ;;  %v176_v55 = vmul.f32 %v207_v50, %v137_v30 }
 0x184   :  { %v143_v33 = vsel %vm28_vm0, %v139_v32, 0.0 }
 0x185   :  { %144 = vadd.xlane.f32.xlu1 %v143_v33 }
 0x20e   :  { %v142_v34 = vpop.xlane.xlu1 %141 }
 0x20f   :  { %v147_v35 = vmul.f32 0.032258064, %v142_v34 }
 0x211   :  { %233 = vrsqrt.f32 %v147_v35  ;;  %vm151_vm2 = vcmp.eq.f32.partialorder %v147_v35, inf  ;;  %v154_v40 = vand.u32 2147483648, %v147_v35  ;;  %vm153_vm3 = vcmp.eq.f32.partialorder %v147_v35, 0.0 }
 0x212   :  { %v145_v36 = vpop.xlane.xlu1 %144 }
 0x213   :  { %v148_v37 = vmul.f32 0.032258064, %v145_v36 }
 0x215   :  { %235 = vrsqrt.f32 %v148_v37  ;;  %vm158_vm4 = vcmp.eq.f32.partialorder %v148_v37, inf  ;;  %v161_v46 = vand.u32 2147483648, %v148_v37  ;;  %vm160_vm5 = vcmp.eq.f32.partialorder %v148_v37, 0.0 }
 0x21b   :  { %v234_v38 = vpop.eup %233 }
 0x21c   :  { %v150_v39 = vmul.f32 %v234_v38, %v147_v35 }
 0x21e   :  { %v152_v41 = vsel %vm151_vm2, %v147_v35, %v150_v39 }
 0x21f   :  { %v236_v42 = vpop.eup %235  ;;  %v155_v43 = vsel %vm153_vm3, %v154_v40, %v152_v41 }
 0x220   :  { %v163_v44 = vadd.f32 1e-06, %v155_v43  ;;  %v157_v45 = vmul.f32 %v236_v42, %v148_v37 }
 0x222   :  { %237 = vrcp.f32 %v163_v44  ;;  %v159_v47 = vsel %vm158_vm4, %v148_v37, %v157_v45 }
 0x223   :  { %v162_v48 = vsel %vm160_vm5, %v161_v46, %v159_v47 }
 0x224   :  { %v164_v49 = vadd.f32 1e-06, %v162_v48 }
 0x226   :  { %239 = vrcp.f32 %v164_v49 }
 0x22c   :  { %v238_v52 = vpop.eup %237 }
 0x22d   :  { %v177_v54 = vmul.f32 %v238_v52, %v175_v51 }
 0x22f   :  { %v185_v56 = vadd.f32 %v208_v53, %v177_v54 }
 0x230   :  { %v240_v57 = vpop.eup %239 }
 0x231   :  { %v211_v58 = vpack.c.bf16 %v185_v56, %v185_v56  ;;  %v178_v59 = vmul.f32 %v240_v57, %v176_v55 }
 0x233   :  { %196 = vst.msk [vmem:[%s320_s6] sm:$0xf] %vm195_vm6, %v211_v58  ;;  %v186_v60 = vadd.f32 %v208_v53, %v178_v59 }
 0x235   :  { %v212_v61 = vpack.c.bf16 %v186_v60, %v186_v60 }
 0x237   :  { %197 = vst.msk [vmem:[%s320_s6 + $0x4] sm:$0xf] %vm195_vm6, %v212_v61 }

// kernel: sa2_forward.14
= control target key start
LH: loop header
LB: loop body
LE: loop exit
PB: predicated region body
PF: predicated region fallthrough
CT: control target
= control target key end

     0   :  { %v294_v0 = vmov 0.0   ;;  %vm295_vm0 = vmmov 0   ;;  %vm57_vm1 = vcmask 261120   ;;  %vm120_vm2 = vcmask 130048   ;;  %s371_s1 = inlined_call_operand.vmem [shape: bf16[32,16], index: 1, kind: input, shape index: {}]   ;;  %s372_s0 = inlined_call_operand.vmem [shape: bf16[16,32], index: 0, kind: input, shape index: {}]   ;;  %s373_s3 = inlined_call_operand.vmem [shape: bf16[16,32], index: 3, kind: input, shape index: {}]   ;;  %s374_s2 = inlined_call_operand.vmem [shape: f32[1,16], index: 2, kind: input, shape index: {}]   ;;  %s375_s4 = inlined_call_operand.vmem [shape: f32[1,32], index: 4, kind: input, shape index: {}]   ;;  %s376_s5 = inlined_call_operand.vmem [shape: f32[1,32], index: 5, kind: input, shape index: {}]   ;;  %s377_s6 = inlined_call_operand.vmem [shape: f32[1,32], index: 6, kind: input, shape index: {}]   ;;  %s378_s7 = inlined_call_operand.vmem [shape: bf16[16,32], index: 7, kind: output, shape index: {}]  }
   0x1   :  { %265 = vmatprep.subr.bf16.mxu0 %v294_v0  ;;  %v281_v1 = vld [vmem:[%s371_s1] sm:$0xff]   ;;  %269 = vmatprep.mubr.msk.bf16.mxu0 %vm295_vm0, %v294_v0  ;;  %v282_v2 = vld [vmem:[%s371_s1 + $0x8] sm:$0xff]   ;;  %vm239_vm7 = vcmask 257024  }
   0x2   :  { %273 = vmatprep.subr.bf16.mxu1 %v294_v0  ;;  %275 = vmatprep.mubr.msk.bf16.mxu1 %vm295_vm0, %v294_v0  ;;  %v27_v3 = vld [vmem:[%s372_s0] sm:$0xff]  }
   0x3   :  { %266 = vmatpush3.bf16.msra.mxu0 %v281_v1  ;;  %v284_v4 = vld [vmem:[%s373_s3] sm:$0xff]   ;;  %v165_v16 = vunpack.c.l.bf16 %v27_v3  ;;  %v166_v20 = vunpack.c.h.bf16 %v27_v3 }
   0x4   :  { %267 = vmatprep.subr.bf16.mxu0 %v294_v0  ;;  %274 = vmatpush3.bf16.msra.mxu1 %v284_v4  ;;  %v246_v5 = vld [vmem:[%s374_s2] ss:$0 sm:$0xff] }
   0x5   :  { %v251_v15 = vld [vmem:[%s375_s4] ss:$0 sm:$0xff] }
   0x6   :  { %v254_v54 = vld [vmem:[%s376_s5] ss:$0 sm:$0xff] }
   0x7   :  { %268 = vmatpush3.bf16.msra.mxu0 %v282_v2  ;;  %v255_v57 = vld [vmem:[%s377_s6] ss:$0 sm:$0xff] }
   0xa   :  { %270 = vmatmul.mubr.msk.bf16.vlgmr.msra.gmra.mrb[0].mxu0 %vm57_vm1, %v27_v3 }
  0xdd   :  { %v95_v6 = vpop.f32.mrb[0].mxu0 }
  0xde   :  { %v96_v7 = vadd.f32 %v246_v5, %v95_v6  ;;  %v271_v8 = vpop.f32.mrb[1].mxu0 }
  0xdf   :  { %v98_v9 = vpop.f32.mrb[2].mxu0 }
  0xe0   :  { %v99_v10 = vadd.f32 %v246_v5, %v98_v9  ;;  %v272_v11 = vpop.f32.mrb[3].mxu0  ;;  %v102_v12 = vmax.f32 %v96_v7, 0.0 }
  0xe2   :  { %v103_v13 = vmax.f32 %v99_v10, 0.0 }
  0xe4   :  { %v104_v14 = vpack.c.bf16 %v103_v13, %v102_v12 }
  0xe6   :  { %276 = vmatmul.mubr.msk.bf16.vlgmr.msra.gmra.mrb[0].mxu1 %vm120_vm2, %v104_v14 }
 0x1b9   :  { %v158_v17 = vpop.f32.mrb[0].mxu1 }
 0x1ba   :  { %v159_v18 = vadd.f32 %v251_v15, %v158_v17  ;;  %v277_v19 = vpop.f32.mrb[1].mxu1 }
 0x1bb   :  { %v161_v21 = vpop.f32.mrb[2].mxu1 }
 0x1bc   :  { %v162_v22 = vadd.f32 %v251_v15, %v161_v21  ;;  %v278_v23 = vpop.f32.mrb[3].mxu1  ;;  %v167_v24 = vadd.f32 %v165_v16, %v159_v18 }
 0x1be   :  { %v171_v25 = vsel %vm57_vm1, %v167_v24, 0.0  ;;  %v168_v26 = vadd.f32 %v166_v20, %v162_v22 }
 0x1bf   :  { %172 = vadd.xlane.f32.xlu0 %v171_v25 }
 0x1c0   :  { %v174_v27 = vsel %vm57_vm1, %v168_v26, 0.0 }
 0x1c3   :  { %175 = vadd.xlane.f32.xlu0 %v174_v27 }
 0x24c   :  { %v173_v28 = vpop.xlane.xlu0 %172 }
 0x24d   :  { %v178_v29 = vmul.f32 0.03125, %v173_v28 }
 0x24f   :  { %v180_v30 = vsub.f32 %v167_v24, %v178_v29 }
 0x250   :  { %v176_v31 = vpop.xlane.xlu0 %175 }
 0x251   :  { %v179_v32 = vmul.f32 0.03125, %v176_v31  ;;  %v182_v33 = vmul.f32 %v180_v30, %v180_v30  ;;  %v219_v55 = vmul.f32 %v254_v54, %v180_v30 }
 0x253   :  { %v181_v34 = vsub.f32 %v168_v26, %v179_v32  ;;  %v184_v35 = vsel %vm57_vm1, %v182_v33, 0.0 }
 0x254   :  { %185 = vadd.xlane.f32.xlu1 %v184_v35 }
 0x255   :  { %v183_v36 = vmul.f32 %v181_v34, %v181_v34  ;;  %v220_v59 = vmul.f32 %v254_v54, %v181_v34 }
 0x257   :  { %v187_v37 = vsel %vm57_vm1, %v183_v36, 0.0 }
 0x258   :  { %188 = vadd.xlane.f32.xlu1 %v187_v37 }
 0x2e1   :  { %v186_v38 = vpop.xlane.xlu1 %185 }
 0x2e2   :  { %v191_v39 = vmul.f32 0.032258064, %v186_v38 }
 0x2e4   :  { %286 = vrsqrt.f32 %v191_v39  ;;  %vm195_vm3 = vcmp.eq.f32.partialorder %v191_v39, inf  ;;  %v198_v44 = vand.u32 2147483648, %v191_v39  ;;  %vm197_vm4 = vcmp.eq.f32.partialorder %v191_v39, 0.0 }
 0x2e5   :  { %v189_v40 = vpop.xlane.xlu1 %188 }
 0x2e6   :  { %v192_v41 = vmul.f32 0.032258064, %v189_v40 }
 0x2e8   :  { %288 = vrsqrt.f32 %v192_v41  ;;  %vm202_vm5 = vcmp.eq.f32.partialorder %v192_v41, inf  ;;  %v205_v50 = vand.u32 2147483648, %v192_v41  ;;  %vm204_vm6 = vcmp.eq.f32.partialorder %v192_v41, 0.0 }
 0x2ee   :  { %v287_v42 = vpop.eup %286 }
 0x2ef   :  { %v194_v43 = vmul.f32 %v287_v42, %v191_v39 }
 0x2f1   :  { %v196_v45 = vsel %vm195_vm3, %v191_v39, %v194_v43 }
 0x2f2   :  { %v289_v46 = vpop.eup %288  ;;  %v199_v47 = vsel %vm197_vm4, %v198_v44, %v196_v45 }
 0x2f3   :  { %v207_v48 = vadd.f32 1e-06, %v199_v47  ;;  %v201_v49 = vmul.f32 %v289_v46, %v192_v41 }
 0x2f5   :  { %290 = vrcp.f32 %v207_v48  ;;  %v203_v51 = vsel %vm202_vm5, %v192_v41, %v201_v49 }
 0x2f6   :  { %v206_v52 = vsel %vm204_vm6, %v205_v50, %v203_v51 }
 0x2f7   :  { %v208_v53 = vadd.f32 1e-06, %v206_v52 }
 0x2f9   :  { %292 = vrcp.f32 %v208_v53 }
 0x2ff   :  { %v291_v56 = vpop.eup %290 }
 0x300   :  { %v221_v58 = vmul.f32 %v291_v56, %v219_v55 }
 0x302   :  { %v229_v60 = vadd.f32 %v255_v57, %v221_v58 }
 0x303   :  { %v293_v61 = vpop.eup %292 }
 0x304   :  { %v258_v62 = vpack.c.bf16 %v229_v60, %v229_v60  ;;  %v222_v63 = vmul.f32 %v293_v61, %v220_v59 }
 0x306   :  { %240 = vst.msk [vmem:[%s378_s7] sm:$0xf] %vm239_vm7, %v258_v62  ;;  %v230_v0 = vadd.f32 %v255_v57, %v222_v63 }
 0x308   :  { %v259_v1 = vpack.c.bf16 %v230_v0, %v230_v0 }
 0x30a   :  { %241 = vst.msk [vmem:[%s378_s7 + $0x4] sm:$0xf] %vm239_vm7, %v259_v1 }

// kernel: sa2_forward.19
= control target key start
LH: loop header
LB: loop body
LE: loop exit
PB: predicated region body
PF: predicated region fallthrough
CT: control target
= control target key end

     0   :  { %vm25_vm0 = vcmask 195584   ;;  %v246_v0 = vmov 0.0   ;;  %vm247_vm1 = vmmov 0   ;;  %vm70_vm2 = vcmask 523264   ;;  %s318_s1 = inlined_call_operand.vmem [shape: bf16[64,24], index: 1, kind: input, shape index: {}]   ;;  %s319_s0 = inlined_call_operand.vmem [shape: bf16[12,64], index: 0, kind: input, shape index: {}]   ;;  %s320_s2 = inlined_call_operand.vmem [shape: f32[1,24], index: 2, kind: input, shape index: {}]   ;;  %s321_s3 = inlined_call_operand.vmem [shape: f32[1,24], index: 3, kind: input, shape index: {}]   ;;  %s322_s4 = inlined_call_operand.vmem [shape: f32[1,24], index: 4, kind: input, shape index: {}]   ;;  %s323_s5 = inlined_call_operand.vmem [shape: f32[12,24], index: 5, kind: output, shape index: {}]  }
   0x1   :  { %219 = vmatprep.subr.bf16.mxu0 %v246_v0  ;;  %v233_v1 = vld [vmem:[%s318_s1] sm:$0xff]   ;;  %227 = vmatprep.mubr.msk.bf16.mxu0 %vm247_vm1, %v246_v0  ;;  %26 = vst.msk [vmem:[#allocation2] sm:$0xff] %vm25_vm0, %v246_v0  ;;  %v234_v2 = vld [vmem:[%s318_s1 + $0x8] sm:$0xff]   ;;  %v235_v3 = vld [vmem:[%s318_s1 + $0x10] sm:$0xff]   ;;  %vm27_vm3 = vcmask 191488  }
   0x2   :  { %220 = vmatpush3.bf16.msra.mxu0 %v233_v1  ;;  %v236_v4 = vld [vmem:[%s318_s1 + $0x18] sm:$0xff]   ;;  %v237_v5 = vld [vmem:[%s319_s0] sm:$0x3f]   ;;  %28 = vst.msk [vmem:[#allocation2 + $0x8] sm:$0xf] %vm27_vm3, %v246_v0 }
   0x3   :  { %221 = vmatprep.subr.bf16.mxu0 %v246_v0  ;;  %v211_v14 = vld [vmem:[%s320_s2] ss:$0 sm:$0xff] }
   0x4   :  { %v212_v49 = vld [vmem:[%s321_s3] ss:$0 sm:$0xff] }
   0x5   :  { %v213_v52 = vld [vmem:[%s322_s4] ss:$0 sm:$0xff] }
   0x6   :  { %222 = vmatpush3.bf16.msra.mxu0 %v234_v2 }
   0x7   :  { %223 = vmatprep.subr.bf16.mxu0 %v246_v0 }
   0x8   :  { %v29_v6 = vld [vmem:[#allocation2] sm:$0xff] }
   0x9   :  { %v30_v8 = vld [vmem:[#allocation2 + $0x8] sm:$0xf] }
   0xa   :  { %224 = vmatpush3.bf16.msra.mxu0 %v235_v3 }
   0xb   :  { %225 = vmatprep.subr.bf16.mxu0 %v246_v0 }
   0xe   :  { %226 = vmatpush3.bf16.msra.mxu0 %v236_v4 }
  0x11   :  { %228 = vmatmul.mubr.msk.bf16.vlgmr.msra.gmra.mrb[0].mxu0 %vm70_vm2, %v237_v5 }
  0xe4   :  { %v108_v7 = vpop.f32.mrb[0].mxu0 }
  0xe5   :  { %v115_v9 = vadd.f32 %v108_v7, %v29_v6  ;;  %v229_v10 = vpop.f32.mrb[1].mxu0 }
  0xe6   :  { %v111_v11 = vpop.f32.mrb[2].mxu0 }
  0xe7   :  { %118 = vst.msk [vmem:[#allocation2] sm:$0xff] %vm25_vm0, %v115_v9  ;;  %v116_v12 = vadd.f32 %v111_v11, %v30_v8  ;;  %v230_v13 = vpop.f32.mrb[3].mxu0 }
  0xe9   :  { %120 = vst.msk [vmem:[#allocation2 + $0x8] sm:$0xf] %vm27_vm3, %v116_v12 }
  0xee   :  { %v124_v15 = vld [vmem:[#allocation2] sm:$0xff] }
  0xef   :  { %v133_v16 = vadd.f32 %v211_v14, %v124_v15 }
  0xf0   :  { %v125_v17 = vld [vmem:[#allocation2 + $0x8] sm:$0xf] }
  0xf1   :  { %v135_v18 = vadd.f32 %v133_v16, %v133_v16  ;;  %v134_v19 = vadd.f32 %v211_v14, %v125_v17 }
  0xf3   :  { %v139_v20 = vsel %vm25_vm0, %v135_v18, 0.0  ;;  %v136_v21 = vadd.f32 %v134_v19, %v134_v19 }
  0xf4   :  { %140 = vadd.xlane.f32.xlu0 %v139_v20 }
  0xf5   :  { %v142_v22 = vsel %vm27_vm3, %v136_v21, 0.0 }
  0xf8   :  { %143 = vadd.xlane.f32.xlu0 %v142_v22 }
 0x181   :  { %v141_v23 = vpop.xlane.xlu0 %140 }
 0x182   :  { %v146_v24 = vmul.f32 0.041666668, %v141_v23 }
 0x184   :  { %v148_v25 = vsub.f32 %v135_v18, %v146_v24 }
 0x185   :  { %v144_v26 = vpop.xlane.xlu0 %143 }
 0x186   :  { %v147_v27 = vmul.f32 0.041666668, %v144_v26  ;;  %v150_v28 = vmul.f32 %v148_v25, %v148_v25  ;;  %v187_v50 = vmul.f32 %v212_v49, %v148_v25 }
 0x188   :  { %v149_v29 = vsub.f32 %v136_v21, %v147_v27  ;;  %v152_v30 = vsel %vm25_vm0, %v150_v28, 0.0 }
 0x189   :  { %153 = vadd.xlane.f32.xlu1 %v152_v30 }
 0x18a   :  { %v151_v31 = vmul.f32 %v149_v29, %v149_v29  ;;  %v188_v54 = vmul.f32 %v212_v49, %v149_v29 }
 0x18c   :  { %v155_v32 = vsel %vm27_vm3, %v151_v31, 0.0 }
 0x18d   :  { %156 = vadd.xlane.f32.xlu1 %v155_v32 }
 0x216   :  { %v154_v33 = vpop.xlane.xlu1 %153 }
 0x217   :  { %v159_v34 = vmul.f32 0.04347826, %v154_v33 }
 0x219   :  { %238 = vrsqrt.f32 %v159_v34  ;;  %vm163_vm4 = vcmp.eq.f32.partialorder %v159_v34, inf  ;;  %v166_v39 = vand.u32 2147483648, %v159_v34  ;;  %vm165_vm5 = vcmp.eq.f32.partialorder %v159_v34, 0.0 }
 0x21a   :  { %v157_v35 = vpop.xlane.xlu1 %156 }
 0x21b   :  { %v160_v36 = vmul.f32 0.04347826, %v157_v35 }
 0x21d   :  { %240 = vrsqrt.f32 %v160_v36  ;;  %vm170_vm6 = vcmp.eq.f32.partialorder %v160_v36, inf  ;;  %v173_v45 = vand.u32 2147483648, %v160_v36  ;;  %vm172_vm7 = vcmp.eq.f32.partialorder %v160_v36, 0.0 }
 0x223   :  { %v239_v37 = vpop.eup %238 }
 0x224   :  { %v162_v38 = vmul.f32 %v239_v37, %v159_v34 }
 0x226   :  { %v164_v40 = vsel %vm163_vm4, %v159_v34, %v162_v38 }
 0x227   :  { %v241_v41 = vpop.eup %240  ;;  %v167_v42 = vsel %vm165_vm5, %v166_v39, %v164_v40 }
 0x228   :  { %v175_v43 = vadd.f32 1e-06, %v167_v42  ;;  %v169_v44 = vmul.f32 %v241_v41, %v160_v36 }
 0x22a   :  { %242 = vrcp.f32 %v175_v43  ;;  %v171_v46 = vsel %vm170_vm6, %v160_v36, %v169_v44 }
 0x22b   :  { %v174_v47 = vsel %vm172_vm7, %v173_v45, %v171_v46 }
 0x22c   :  { %v176_v48 = vadd.f32 1e-06, %v174_v47 }
 0x22e   :  { %244 = vrcp.f32 %v176_v48 }
 0x234   :  { %v243_v51 = vpop.eup %242 }
 0x235   :  { %v189_v53 = vmul.f32 %v243_v51, %v187_v50 }
 0x237   :  { %v197_v55 = vadd.f32 %v213_v52, %v189_v53 }
 0x238   :  { %v245_v56 = vpop.eup %244 }
 0x239   :  { %199 = vst.msk [vmem:[%s323_s5] sm:$0xff] %vm25_vm0, %v197_v55  ;;  %v190_v57 = vmul.f32 %v245_v56, %v188_v54 }
 0x23b   :  { %v198_v58 = vadd.f32 %v213_v52, %v190_v57 }
 0x23d   :  { %200 = vst.msk [vmem:[%s323_s5 + $0x8] sm:$0xf] %vm27_vm3, %v198_v58 }

// kernel: sa2_forward.18
= control target key start
LH: loop header
LB: loop body
LE: loop exit
PB: predicated region body
PF: predicated region fallthrough
CT: control target
= control target key end

     0   :  { %v284_v1 = vmov 0.0   ;;  %vm285_vm0 = vmmov 0   ;;  %vm26_vm1 = vcmask 261120   ;;  %s365_s0 = inlined_call_operand.vmem [shape: bf16[16,64], index: 0, kind: input, shape index: {}]   ;;  %s366_s1 = inlined_call_operand.vmem [shape: bf16[64,32], index: 1, kind: input, shape index: {}]   ;;  %s367_s2 = inlined_call_operand.vmem [shape: f32[1,32], index: 2, kind: input, shape index: {}]   ;;  %s368_s3 = inlined_call_operand.vmem [shape: f32[1,32], index: 3, kind: input, shape index: {}]   ;;  %s369_s4 = inlined_call_operand.vmem [shape: f32[1,32], index: 4, kind: input, shape index: {}]   ;;  %s370_s5 = inlined_call_operand.hbm [shape: f32[16,32], index: 5, kind: output, shape index: {}]  }
   0x1   :  { %v247_v0 = vld [vmem:[%s366_s1] sm:$0xff]   ;;  %230 = vmatprep.subr.bf16.mxu0 %v284_v1  ;;  %v248_v2 = vld [vmem:[%s366_s1 + $0x8] sm:$0xff]   ;;  %238 = vmatprep.mubr.msk.bf16.mxu0 %vm285_vm0, %v284_v1  ;;  %27 = vst.msk [vmem:[#allocation2] sm:$0xff] %vm26_vm1, %v284_v1  ;;  %28 = vst.msk [vmem:[#allocation2 + $0x8] sm:$0xff] %vm26_vm1, %v284_v1 }
   0x2   :  { %231 = vmatpush3.bf16.msra.mxu0 %v247_v0 }
   0x3   :  { %232 = vmatprep.subr.bf16.mxu0 %v284_v1 }
   0x4   :  { %10 = vsyncpa [#allocation4], 0  ;;  %v249_v3 = vld [vmem:[%s366_s1 + $0x10] sm:$0xff]   ;;  %v250_v4 = vld [vmem:[%s366_s1 + $0x18] sm:$0xff]   ;;  %vm70_vm2 = vcmask 523264   ;;  %s286_s6 = smov [#allocation3]  }
   0x5   :  { %v251_v5 = vld [vmem:[%s365_s0] sm:$0xff]   ;;  %s205_s7 = sshll.u32 %s286_s6, 4  ;;  %s206_s7 = int_to_ptr.vmem [resolvable:$true] %s205_s7 }
   0x6   :  { %233 = vmatpush3.bf16.msra.mxu0 %v248_v2  ;;  %v222_v14 = vld [vmem:[%s367_s2] ss:$0 sm:$0xff]  ;;  %p265_p1 = scmp.lt.s32.totalorder %s206_s7, %s206_s7 }
   0x7   :  { %234 = vmatprep.subr.bf16.mxu0 %v284_v1  ;;  %v223_v49 = vld [vmem:[%s368_s3] ss:$0 sm:$0xff]  ;;  %s260_s3 = scalar_lea.vmem %s206_s7, 256 }
   0x8   :  { %v29_v6 = vld [vmem:[#allocation2] sm:$0xff]  ;;  %v30_v8 = vld [vmem:[#allocation2 + $0x8] sm:$0xff]  ;;  %p261_p0 = scmp.ne.s32.totalorder %s206_s7, %s260_s3  ;;  %p266_p2 = scmp.lt.s32.totalorder %s260_s3, %s260_s3 }
   0x9   :  { %v224_v52 = vld [vmem:[%s369_s4] ss:$0 sm:$0xff] }
   0xa   :  { %235 = vmatpush3.bf16.msra.mxu0 %v249_v3  ;;  %p267_p3 = por %p266_p2, %p265_p1 }
   0xb   :  { %236 = vmatprep.subr.bf16.mxu0 %v284_v1 }
   0xc   :  { %p268_p4 = pnand %p267_p3, %p261_p0 }
   0xe   :  { %237 = vmatpush3.bf16.msra.mxu0 %v250_v4 }
  0x11   :  { %239 = vmatmul.mubr.msk.bf16.vlgmr.msra.gmra.mrb[0].mxu0 %vm70_vm2, %v251_v5 }
  0xe4   :  { %v108_v7 = vpop.f32.mrb[0].mxu0 }
  0xe5   :  { %v115_v9 = vadd.f32 %v108_v7, %v29_v6  ;;  %v240_v10 = vpop.f32.mrb[1].mxu0 }
  0xe6   :  { %v111_v11 = vpop.f32.mrb[2].mxu0 }
  0xe7   :  { %118 = vst.msk [vmem:[#allocation2] sm:$0xff] %vm26_vm1, %v115_v9  ;;  %v116_v12 = vadd.f32 %v111_v11, %v30_v8  ;;  %v241_v13 = vpop.f32.mrb[3].mxu0 }
  0xe9   :  { %119 = vst.msk [vmem:[#allocation2 + $0x8] sm:$0xff] %vm26_vm1, %v116_v12 }
  0xee   :  { %v123_v15 = vld [vmem:[#allocation2] sm:$0xff] }
  0xef   :  { %v132_v16 = vadd.f32 %v222_v14, %v123_v15 }
  0xf0   :  { %v124_v17 = vld [vmem:[#allocation2 + $0x8] sm:$0xff] }
  0xf1   :  { %v134_v18 = vadd.f32 %v132_v16, %v132_v16  ;;  %v133_v19 = vadd.f32 %v222_v14, %v124_v17 }
  0xf3   :  { %v138_v20 = vsel %vm26_vm1, %v134_v18, 0.0  ;;  %v135_v21 = vadd.f32 %v133_v19, %v133_v19 }
  0xf4   :  { %139 = vadd.xlane.f32.xlu0 %v138_v20 }
  0xf5   :  { %v141_v22 = vsel %vm26_vm1, %v135_v21, 0.0 }
  0xf8   :  { %142 = vadd.xlane.f32.xlu0 %v141_v22 }
 0x181   :  { %v140_v23 = vpop.xlane.xlu0 %139 }
 0x182   :  { %v145_v24 = vmul.f32 0.03125, %v140_v23 }
 0x184   :  { %v147_v25 = vsub.f32 %v134_v18, %v145_v24 }
 0x185   :  { %v143_v26 = vpop.xlane.xlu0 %142 }
 0x186   :  { %v146_v27 = vmul.f32 0.03125, %v143_v26  ;;  %v149_v28 = vmul.f32 %v147_v25, %v147_v25  ;;  %v186_v50 = vmul.f32 %v223_v49, %v147_v25 }
 0x188   :  { %v148_v29 = vsub.f32 %v135_v21, %v146_v27  ;;  %v151_v30 = vsel %vm26_vm1, %v149_v28, 0.0 }
 0x189   :  { %152 = vadd.xlane.f32.xlu1 %v151_v30 }
 0x18a   :  { %v150_v31 = vmul.f32 %v148_v29, %v148_v29  ;;  %v187_v54 = vmul.f32 %v223_v49, %v148_v29 }
 0x18c   :  { %v154_v32 = vsel %vm26_vm1, %v150_v31, 0.0 }
 0x18d   :  { %155 = vadd.xlane.f32.xlu1 %v154_v32 }
 0x216   :  { %v153_v33 = vpop.xlane.xlu1 %152 }
 0x217   :  { %v158_v34 = vmul.f32 0.032258064, %v153_v33 }
 0x219   :  { %252 = vrsqrt.f32 %v158_v34  ;;  %vm162_vm3 = vcmp.eq.f32.partialorder %v158_v34, inf  ;;  %v165_v39 = vand.u32 2147483648, %v158_v34  ;;  %vm164_vm4 = vcmp.eq.f32.partialorder %v158_v34, 0.0 }
 0x21a   :  { %v156_v35 = vpop.xlane.xlu1 %155 }
 0x21b   :  { %v159_v36 = vmul.f32 0.032258064, %v156_v35 }
 0x21d   :  { %254 = vrsqrt.f32 %v159_v36  ;;  %vm169_vm5 = vcmp.eq.f32.partialorder %v159_v36, inf  ;;  %v172_v45 = vand.u32 2147483648, %v159_v36  ;;  %vm171_vm6 = vcmp.eq.f32.partialorder %v159_v36, 0.0 }
 0x223   :  { %v253_v37 = vpop.eup %252 }
 0x224   :  { %v161_v38 = vmul.f32 %v253_v37, %v158_v34 }
 0x226   :  { %v163_v40 = vsel %vm162_vm3, %v158_v34, %v161_v38 }
 0x227   :  { %v255_v41 = vpop.eup %254  ;;  %v166_v42 = vsel %vm164_vm4, %v165_v39, %v163_v40 }
 0x228   :  { %v174_v43 = vadd.f32 1e-06, %v166_v42  ;;  %v168_v44 = vmul.f32 %v255_v41, %v159_v36 }
 0x22a   :  { %256 = vrcp.f32 %v174_v43  ;;  %v170_v46 = vsel %vm169_vm5, %v159_v36, %v168_v44 }
 0x22b   :  { %v173_v47 = vsel %vm171_vm6, %v172_v45, %v170_v46 }
 0x22c   :  { %v175_v48 = vadd.f32 1e-06, %v173_v47 }
 0x22e   :  { %258 = vrcp.f32 %v175_v48 }
 0x234   :  { %v257_v51 = vpop.eup %256 }
 0x235   :  { %v188_v53 = vmul.f32 %v257_v51, %v186_v50 }
 0x237   :  { %v196_v55 = vadd.f32 %v224_v52, %v188_v53 }
 0x238   :  { %v259_v56 = vpop.eup %258 }
 0x239   :  { %v189_v57 = vmul.f32 %v259_v56, %v187_v54  ;;  %198 = vst.msk [vmem:[#allocation3] sm:$0xff] %vm26_vm1, %v196_v55 }
 0x23b   :  { %v197_v58 = vadd.f32 %v224_v52, %v189_v57 }
 0x23d   :  { %199 = vst.msk [vmem:[#allocation3 + $0x8] sm:$0xff] %vm26_vm1, %v197_v58 }
 0x23e   :  { %271 = shalt.err (!%p268_p4)
}
 0x23f   :  { %s272_s9 = scalar_lea.hbm %s370_s5, 256 }
 0x240   :  { %p273_p5 = scmp.ne.s32.totalorder %s370_s5, %s272_s9  ;;  %p276_p6 = scmp.lt.u32.totalorder %s272_s9, %s370_s5 }
 0x242   :  { %p278_p7 = pnand %p276_p6, %p273_p5 }
 0x244   :  { %281 = shalt.err (!%p278_p7)
}
 0x245   :  { %s287_s14 = smov 128   ;;  %s288_s15 = smov 8  }
 0x246   :  { %211 = dma.vmem_to_hbm [thread:$0]  %s206_s7, 256, %s370_s5, [#allocation4], %s287_s14, %s287_s14, %s288_s15  }
 0x247   :  { %282 = dma.done.wait [#allocation4], 256  }
 0x248   :  { %283 = vsyncadd [#allocation4], 4294967040 }
 0x249   :  { %215 = vsyncpa [#allocation4], 1 }

// kernel: sa2_forward.17
= control target key start
LH: loop header
LB: loop body
LE: loop exit
PB: predicated region body
PF: predicated region fallthrough
CT: control target
= control target key end

     0   :  { %s1445_s12 = smov 0   ;;  %s1621_s0 = inlined_call_operand.vmem [shape: bf16[2,8,128], index: 0, kind: input, shape index: {}]   ;;  %s1622_s1 = inlined_call_operand.vmem [shape: bf16[2,6,128], index: 1, kind: input, shape index: {}]   ;;  %s1623_s2 = inlined_call_operand.vmem [shape: bf16[2,8,64], index: 2, kind: output, shape index: {0}]   ;;  %s1624_s3 = inlined_call_operand.vmem [shape: bf16[2,6,64], index: 3, kind: output, shape index: {1}]  }
   0x1 LB: > { %s1184_s13 = sadd.s32 4294967295, %s1414_s12   ;;  %p1188_p0 = scmp.ge.s32.totalorder %s1414_s12, 1  ;;  %s1414_s12 = sphi %s1445_s12, %s14_s12  }
   0x2   : > { %p148_p1 = scmp.lt.s32.totalorder %s1414_s12, 3 }
   0x4   : > { %p149_p2 = pnand %p1188_p0, %p148_p1 }
   0x5   : > { %p178_p3 = scmp.lt.s32.totalorder (!%p149_p2), %s1184_s13, 1  ;;  %v1416_v0 = vmov (!%p149_p2), 0.0   ;;  %vm1417_vm0 = vmmov (!%p149_p2), 0   ;;  %vm199_vm1 = vcmask (!%p149_p2), 130048   ;;  %vm246_vm2 = vcmask (!%p149_p2), 48128   ;;  %s1418_s21 = smov (!%p149_p2), 64  }
   0x6   : > { %152 = sbr.rel (%p149_p2) target bundleno = 1521 (0x5f1), region = 28  ;;  %1246 = vmatprep.subr.bf16.mxu0 (!%p149_p2), %v1416_v0  ;;  %1248 = vmatprep.mubr.msk.bf16.mxu0 (!%p149_p2), %vm1417_vm0, %v1416_v0  ;;  %s1419_s22 = smov (!%p149_p2), 112   ;;  %vm267_vm3 = vcmask (!%p149_p2), 1042432   ;;  %vm351_vm4 = vcmask (!%p149_p2), 62464   ;;  %vm373_vm5 = vcmask (!%p149_p2), 1043456   ;;  %vm369_vm6 = vcmask (!%p149_p2), 64512  }
   0x7   : > { %1252 = vmatprep.subr.bf16.mxu1 (!%p149_p2), %v1416_v0  ;;  %1254 = vmatprep.mubr.msk.bf16.mxu1 (!%p149_p2), %vm1417_vm0, %v1416_v0  ;;  %s1420_s23 = smov (!%p149_p2), 96   ;;  %s1421_s24 = smov (!%p149_p2), 80   ;;  %vm1063_vm7 = vcmask (!%p149_p2), 261120   ;;  %vm1065_vm8 = vcmask (!%p149_p2), 392192   ;;  %vm1068_vm9 = vcmask (!%p149_p2), 519168   ;;  %vm1086_vm10 = vcmask (!%p149_p2), 518144  }
   0x8   : > { %s1422_s25 = smov (!%p149_p2), 48   ;;  %s1423_s26 = smov (!%p149_p2), 32  }
   0x9   : > { %s1424_s27 = smov (!%p149_p2), 16  }
   0xd   : > { %s1626_s13 = smov (!%p178_p3, %s1184_s13), 1 }
   0xe   : > { %s1459_s14 = sshll.u32 %s1626_s13, 2 }
   0xf   : > { %s185_s17 = scalar_lea.vmem %s1622_s1, %s1459_s14  ;;  %s181_s20 = scalar_lea.vmem %s1621_s0, %s1459_s14 }
  0x10   : > { %v197_v1 = vld [vmem:[%s185_s17] sm:$0x7]  ;;  %s189_s30 = scalar_lea.vmem %s1623_s2, %s1459_s14  ;;  %s193_s6 = scalar_lea.vmem %s1624_s3, %s1459_s14 }
  0x11   : > { %v198_v2 = vmul.bf16 1048592000, %v197_v1  ;;  %v196_v4 = vld [vmem:[%s181_s20] sm:$0xf]  ;;  %v1475_v10 = vcombine.low %v197_v1, %v197_v1 }
  0x12   : > { %v1479_v12 = vcombine.low %v196_v4, %v196_v4  ;;  %v201_v24 = vsel %vm199_vm1, %v196_v4, 0 }
  0x13   : > { %v204_v3 = vsel %vm199_vm1, %v198_v2, 0  ;;  %262 = vrot.lane.b32.xlu1 %v1475_v10, %s1418_s21  ;;  %v1199_v11 = vcombine.low %v198_v2, %v198_v2 }
  0x14   : > { %1247 = vmatpush3.bf16.xpose.msra.mxu0 %v204_v3 }
  0x15   : > { %1264 = vmatprep.subr.bf16.mxu0 %v1416_v0 }
  0x17   : > { %422 = vrot.lane.b32.xlu1 %v1199_v11, %s1419_s22 }
  0x1b   : > { %1249 = vmatmul.mubr.msk.bf16.vlgmr.msra.gmra.mrb[0].mxu0 %vm199_vm1, %v196_v4  ;;  %632 = vrot.lane.b32.xlu1 %v1199_v11, %s1420_s23 }
  0x1c   : > { %1266 = vmatprep.mubr.msk.bf16.mxu0 %vm1417_vm0, %v1416_v0 }
  0x1f   : > { %630 = vrot.lane.b32.xlu1 %v1479_v12, %s1420_s23 }
  0x23   : > { %842 = vrot.lane.b32.xlu1 %v1199_v11, %s1421_s24 }
  0x27   : > { %840 = vrot.lane.b32.xlu1 %v1479_v12, %s1421_s24 }
  0x85   : > { %v263_v18 = vpop.permute.xlu1 %262 }
  0x86   : > { %v269_v19 = vsel %vm267_vm3, %v263_v18, 0 }
  0x87   : > { %1253 = vmatpush3.bf16.msra.mxu1 %v269_v19 }
  0x88   : > { %1258 = vmatprep.subr.bf16.mxu1 %v1416_v0 }
  0x89   : > { %v423_v25 = vpop.permute.xlu1 %422 }
  0x8a   : > { %v428_v26 = vsel %vm199_vm1, %v423_v25, 0 }
  0x8d   : > { %v633_v29 = vpop.permute.xlu1 %632 }
  0x8e   : > { %v638_v30 = vsel %vm199_vm1, %v633_v29, 0 }
  0x91   : > { %v631_v31 = vpop.permute.xlu1 %630 }
  0x92   : > { %v635_v32 = vsel %vm199_vm1, %v631_v31, 0 }
  0x95   : > { %v843_v33 = vpop.permute.xlu1 %842 }
  0x96   : > { %v848_v34 = vsel %vm199_vm1, %v843_v33, 0 }
  0x99   : > { %v841_v35 = vpop.permute.xlu1 %840 }
  0x9a   : > { %v845_v36 = vsel %vm199_vm1, %v841_v35, 0 }
  0xee   : > { %v240_v5 = vpop.f32.mrb[0].mxu0 }
  0xef   : > { %v1250_v6 = vpop.f32.mrb[1].mxu0  ;;  %v247_v7 = vsel %vm246_vm2, %v240_v5, -inf }
  0xf0   : > { %248 = vmax.xlane.f32.xlu0 %v247_v7  ;;  %v243_v8 = vpop.f32.mrb[2].mxu0 }
  0xf1   : > { %v1251_v9 = vpop.f32.mrb[3].mxu0 }
 0x17d   : > { %v249_v13 = vpop.xlane.xlu0 %248 }
 0x17e   : > { %v250_v14 = vsub.f32 %v240_v5, %v249_v13 }
 0x180   : > { %v251_v15 = vmul.f32 1.442695, %v250_v14 }
 0x182   : > { %1376 = vpow2.f32 %v251_v15 }
 0x18c   : > { %v1377_v16 = vpop.eup %1376 }
 0x18d   : > { %v253_v17 = vsel %vm246_vm2, %v1377_v16, 0.0 }
 0x18e   : > { %254 = vadd.xlane.f32.xlu0 %v253_v17 }
 0x1a4   : > { %417 = vrot.lane.b32.xlu0 %v1479_v12, %s1419_s22 }
 0x21b   : > { %v255_v20 = vpop.xlane.xlu0 %254 }
 0x21c   : > { %1378 = vrcp.f32 %v255_v20 }
 0x21f   : > { %v418_v27 = vpop.permute.xlu0 %417 }
 0x220   : > { %v425_v28 = vsel %vm199_vm1, %v418_v27, 0 }
 0x226   : > { %v1379_v21 = vpop.eup %1378 }
 0x227   : > { %v257_v22 = vmul.f32 %v1379_v21, %v1377_v16 }
 0x229   : > { %v258_v23 = vpack.c.bf16 %v257_v22, %v257_v22 }
 0x22b   : > { %1255 = vmatmul.mubr.msk.bf16.vlgmr.msra.gmra.mrb[0].mxu1 %vm246_vm2, %v258_v23 }
 0x22c   : > { %1259 = vmatpush3.bf16.xpose.msra.mxu1 %v201_v24  ;;  %1260 = vmatprep.mubr.msk.bf16.mxu1 %vm1417_vm0, %v1416_v0 }
 0x22d   : > { %1270 = vmatprep.subr.bf16.mxu1 %v1416_v0 }
 0x233   : > { %1261 = vmatmul.mubr.msk.bf16.vlgmr.msra.gmra.mrb[4].mxu1 %vm199_vm1, %v198_v2 }
 0x234   : > { %1271 = vmatpush3.bf16.xpose.msra.mxu1 %v428_v26  ;;  %1272 = vmatprep.mubr.msk.bf16.mxu1 %vm1417_vm0, %v1416_v0 }
 0x235   : > { %1282 = vmatprep.subr.bf16.mxu1 %v1416_v0 }
 0x23b   : > { %1273 = vmatmul.mubr.msk.bf16.vlgmr.msra.gmra.mrb[8].mxu1 %vm199_vm1, %v418_v27 }
 0x23c   : > { %1283 = vmatpush3.bf16.xpose.msra.mxu1 %v425_v28  ;;  %1284 = vmatprep.mubr.msk.bf16.mxu1 %vm1417_vm0, %v1416_v0 }
 0x23d   : > { %1294 = vmatprep.subr.bf16.mxu1 %v1416_v0 }
 0x243   : > { %1285 = vmatmul.mubr.msk.bf16.vlgmr.msra.gmra.mrb[12].mxu1 %vm199_vm1, %v423_v25 }
 0x244   : > { %1295 = vmatpush3.bf16.xpose.msra.mxu1 %v638_v30  ;;  %1296 = vmatprep.mubr.msk.bf16.mxu1 %vm1417_vm0, %v1416_v0 }
 0x245   : > { %1306 = vmatprep.subr.bf16.mxu1 %v1416_v0 }
 0x24b   : > { %1297 = vmatmul.mubr.msk.bf16.vlgmr.msra.gmra.mrb[16].mxu1 %vm199_vm1, %v631_v31 }
 0x24c   : > { %1307 = vmatpush3.bf16.xpose.msra.mxu1 %v635_v32  ;;  %1308 = vmatprep.mubr.msk.bf16.mxu1 %vm1417_vm0, %v1416_v0 }
 0x24d   : > { %1318 = vmatprep.subr.bf16.mxu1 %v1416_v0 }
 0x253   : > { %1309 = vmatmul.mubr.msk.bf16.vlgmr.msra.gmra.mrb[20].mxu1 %vm199_vm1, %v633_v29 }
 0x254   : > { %1319 = vmatpush3.bf16.xpose.msra.mxu1 %v848_v34  ;;  %1320 = vmatprep.mubr.msk.bf16.mxu1 %vm1417_vm0, %v1416_v0 }
 0x255   : > { %1330 = vmatprep.subr.bf16.mxu1 %v1416_v0 }
 0x25b   : > { %1321 = vmatmul.mubr.msk.bf16.vlgmr.msra.gmra.mrb[24].mxu1 %vm199_vm1, %v841_v35 }
 0x25c   : > { %1331 = vmatpush3.bf16.xpose.msra.mxu1 %v845_v36  ;;  %1332 = vmatprep.mubr.msk.bf16.mxu1 %vm1417_vm0, %v1416_v0 }
 0x263   : > { %1333 = vmatmul.mubr.msk.bf16.vlgmr.msra.gmra.mrb[28].mxu1 %vm199_vm1, %v843_v33 }
 0x2fe   : > { %v1522_v37 = vpop.f32.mrb[0].mxu1 }
 0x2ff   : > { %v1256_v38 = vpop.f32.mrb[1].mxu1 }
 0x300   : > { %v308_v39 = vpop.f32.mrb[2].mxu1 }
 0x301   : > { %v1257_v40 = vpop.f32.mrb[3].mxu1 }
 0x306   : > { %v345_v41 = vpop.f32.mrb[4].mxu1 }
 0x307   : > { %v1262_v42 = vpop.f32.mrb[5].mxu1  ;;  %v352_v43 = vsel %vm351_vm4, %v345_v41, -inf }
 0x308   : > { %353 = vmax.xlane.f32.xlu1 %v352_v43  ;;  %v348_v44 = vpop.f32.mrb[6].mxu1 }
 0x309   : > { %v1263_v45 = vpop.f32.mrb[7].mxu1 }
 0x30e   : > { %v464_v46 = vpop.f32.mrb[8].mxu1 }
 0x30f   : > { %v1274_v47 = vpop.f32.mrb[9].mxu1  ;;  %v470_v48 = vsel %vm246_vm2, %v464_v46, -inf }
 0x310   : > { %471 = vmax.xlane.f32.xlu0 %v470_v48  ;;  %v467_v49 = vpop.f32.mrb[10].mxu1 }
 0x311   : > { %v1275_v50 = vpop.f32.mrb[11].mxu1 }
 0x316   : > { %v564_v51 = vpop.f32.mrb[12].mxu1 }
 0x317   : > { %v1286_v52 = vpop.f32.mrb[13].mxu1  ;;  %v570_v53 = vsel %vm351_vm4, %v564_v51, -inf }
 0x318   : > { %571 = vmax.xlane.f32.xlu1 %v570_v53  ;;  %v567_v54 = vpop.f32.mrb[14].mxu1 }
 0x319   : > { %v1287_v55 = vpop.f32.mrb[15].mxu1 }
 0x31e   : > { %v674_v56 = vpop.f32.mrb[16].mxu1 }
 0x31f   : > { %v1298_v57 = vpop.f32.mrb[17].mxu1  ;;  %v680_v58 = vsel %vm246_vm2, %v674_v56, -inf }
 0x320   : > { %681 = vmax.xlane.f32.xlu0 %v680_v58  ;;  %v677_v59 = vpop.f32.mrb[18].mxu1 }
 0x321   : > { %v1299_v60 = vpop.f32.mrb[19].mxu1 }
 0x326   : > { %v774_v61 = vpop.f32.mrb[20].mxu1 }
 0x327   : > { %v1310_v62 = vpop.f32.mrb[21].mxu1  ;;  %v780_v63 = vsel %vm351_vm4, %v774_v61, -inf }
 0x328   : > { %781 = vmax.xlane.f32.xlu1 %v780_v63  ;;  %v777_v1 = vpop.f32.mrb[22].mxu1 }
 0x329   : > { %v1311_v2 = vpop.f32.mrb[23].mxu1 }
 0x32e   : > { %v884_v3 = vpop.f32.mrb[24].mxu1 }
 0x32f   : > { %v890_v4 = vsel %vm246_vm2, %v884_v3, -inf  ;;  %v1322_v5 = vpop.f32.mrb[25].mxu1 }
 0x330   : > { %891 = vmax.xlane.f32.xlu0 %v890_v4  ;;  %v887_v6 = vpop.f32.mrb[26].mxu1 }
 0x331   : > { %v1323_v7 = vpop.f32.mrb[27].mxu1 }
 0x336   : > { %v984_v8 = vpop.f32.mrb[28].mxu1 }
 0x337   : > { %v1334_v9 = vpop.f32.mrb[29].mxu1  ;;  %v990_v14 = vsel %vm351_vm4, %v984_v8, -inf }
 0x338   : > { %v987_v11 = vpop.f32.mrb[30].mxu1 }
 0x339   : > { %482 = vrot.lane.b32.xlu1 %v1475_v10, %s1422_s25  ;;  %v1335_v13 = vpop.f32.mrb[31].mxu1 }
 0x346   : > { %367 = vrot.lane.b32.xlu0 %v1479_v12, %s1418_s21 }
 0x35d   : > { %991 = vmax.xlane.f32.xlu1 %v990_v14 }
 0x395   : > { %v354_v15 = vpop.xlane.xlu1 %353 }
 0x396   : > { %v355_v16 = vsub.f32 %v345_v41, %v354_v15 }
 0x398   : > { %v356_v17 = vmul.f32 1.442695, %v355_v16 }
 0x39a   : > { %1380 = vpow2.f32 %v356_v17 }
 0x39d   : > { %v472_v18 = vpop.xlane.xlu0 %471 }
 0x39e   : > { %v473_v19 = vsub.f32 %v464_v46, %v472_v18 }
 0x3a0   : > { %v474_v20 = vmul.f32 1.442695, %v473_v19 }
 0x3a2   : > { %1382 = vpow2.f32 %v474_v20 }
 0x3a4   : > { %v1381_v21 = vpop.eup %1380 }
 0x3a5   : > { %v572_v22 = vpop.xlane.xlu1 %571  ;;  %v358_v23 = vsel %vm351_vm4, %v1381_v21, 0.0 }
 0x3a6   : > { %v573_v24 = vsub.f32 %v564_v51, %v572_v22  ;;  %359 = vadd.xlane.f32.xlu0 %v358_v23 }
 0x3a8   : > { %v574_v25 = vmul.f32 1.442695, %v573_v24 }
 0x3aa   : > { %1384 = vpow2.f32 %v574_v25 }
 0x3ac   : > { %v1536_v26 = vpop.eup %1382 }
 0x3ad   : > { %v476_v27 = vsel %vm246_vm2, %v1536_v26, 0.0  ;;  %v682_v30 = vpop.xlane.xlu0 %681 }
 0x3ae   : > { %477 = vadd.xlane.f32.xlu1 %v476_v27  ;;  %v683_v34 = vsub.f32 %v674_v56, %v682_v30 }
 0x3b0   : > { %v684_v36 = vmul.f32 1.442695, %v683_v34 }
 0x3b2   : > { %1386 = vpow2.f32 %v684_v36 }
 0x3b4   : > { %v1540_v28 = vpop.eup %1384 }
 0x3b5   : > { %v576_v29 = vsel %vm351_vm4, %v1540_v28, 0.0  ;;  %v782_v35 = vpop.xlane.xlu1 %781 }
 0x3b6   : > { %577 = vadd.xlane.f32.xlu0 %v576_v29  ;;  %v783_v38 = vsub.f32 %v774_v61, %v782_v35 }
 0x3b8   : > { %v784_v39 = vmul.f32 1.442695, %v783_v38 }
 0x3b9   : > { %v483_v45 = vpop.permute.xlu1 %482 }
 0x3ba   : > { %1388 = vpow2.f32 %v784_v39  ;;  %v488_v59 = vsel %vm267_vm3, %v483_v45, 0 }
 0x3bc   : > { %v1387_v42 = vpop.eup %1386 }
 0x3bd   : > { %v892_v31 = vpop.xlane.xlu0 %891  ;;  %v686_v43 = vsel %vm246_vm2, %v1387_v42, 0.0 }
 0x3be   : > { %v893_v40 = vsub.f32 %v884_v3, %v892_v31 }
 0x3bf   : > { %582 = vrot.lane.b32.xlu1 %v1479_v12, %s1422_s25 }
 0x3c0   : > { %v894_v41 = vmul.f32 1.442695, %v893_v40 }
 0x3c1   : > { %v368_v32 = vpop.permute.xlu0 %367 }
 0x3c2   : > { %v375_v33 = vsel %vm373_vm5, %v368_v32, 0  ;;  %1390 = vpow2.f32 %v894_v41 }
 0x3c3   : > { %1265 = vmatpush3.bf16.msra.mxu0 %v375_v33 }
 0x3c4   : > { %1276 = vmatprep.subr.bf16.mxu0 %v1416_v0  ;;  %v1551_v44 = vpop.eup %1388 }
 0x3c5   : > { %v786_v46 = vsel %vm351_vm4, %v1551_v44, 0.0 }
 0x3cc   : > { %692 = vrot.lane.b32.xlu0 %v1475_v10, %s1423_s26  ;;  %v1555_v47 = vpop.eup %1390 }
 0x3cd   : > { %v896_v49 = vsel %vm246_vm2, %v1555_v47, 0.0 }
 0x3e3   : > { %687 = vadd.xlane.f32.xlu1 %v686_v43 }
 0x3e7   : > { %787 = vadd.xlane.f32.xlu1 %v786_v46 }
 0x3ea   : > { %v992_v48 = vpop.xlane.xlu1 %991 }
 0x3eb   : > { %v993_v50 = vsub.f32 %v984_v8, %v992_v48  ;;  %897 = vadd.xlane.f32.xlu0 %v896_v49 }
 0x3ed   : > { %v994_v51 = vmul.f32 1.442695, %v993_v50 }
 0x3ef   : > { %1392 = vpow2.f32 %v994_v51 }
 0x3f9   : > { %v1559_v52 = vpop.eup %1392 }
 0x3fa   : > { %v996_v53 = vsel %vm351_vm4, %v1559_v52, 0.0 }
 0x3fb   : > { %997 = vadd.xlane.f32.xlu1 %v996_v53 }
 0x401   : > { %902 = vrot.lane.b32.xlu0 %v1475_v10, %s1424_s27 }
 0x405   : > { %1002 = vrot.lane.b32.xlu0 %v1479_v12, %s1424_s27 }
 0x40c   : > { %792 = vrot.lane.b32.xlu1 %v1479_v12, %s1423_s26 }
 0x433   : > { %v360_v54 = vpop.xlane.xlu0 %359 }
 0x434   : > { %1394 = vrcp.f32 %v360_v54 }
 0x43b   : > { %v478_v55 = vpop.xlane.xlu1 %477 }
 0x43c   : > { %1396 = vrcp.f32 %v478_v55 }
 0x43e   : > { %v1395_v56 = vpop.eup %1394 }
 0x43f   : > { %v362_v57 = vmul.f32 %v1395_v56, %v1381_v21  ;;  %v583_v61 = vpop.permute.xlu1 %582 }
 0x440   : > { %v588_v63 = vsel %vm373_vm5, %v583_v61, 0 }
 0x441   : > { %v363_v58 = vpack.c.bf16 %v362_v57, %v362_v57 }
 0x443   : > { %1267 = vmatmul.mubr.msk.bf16.vlgmr.msra.gmra.mrb[4].mxu0 %vm369_vm6, %v363_v58  ;;  %v578_v60 = vpop.xlane.xlu0 %577 }
 0x444   : > { %1277 = vmatpush3.bf16.msra.mxu0 %v488_v59  ;;  %1398 = vrcp.f32 %v578_v60  ;;  %1278 = vmatprep.mubr.msk.bf16.mxu0 %vm1417_vm0, %v1416_v0 }
 0x445   : > { %1288 = vmatprep.subr.bf16.mxu0 %v1416_v0 }
 0x446   : > { %v1397_v10 = vpop.eup %1396 }
 0x447   : > { %v480_v12 = vmul.f32 %v1397_v10, %v1536_v26  ;;  %v693_v3 = vpop.permute.xlu0 %692 }
 0x448   : > { %v698_v5 = vsel %vm267_vm3, %v693_v3, 0 }
 0x449   : > { %v481_v62 = vpack.c.bf16 %v480_v12, %v480_v12 }
 0x44b   : > { %1279 = vmatmul.mubr.msk.bf16.vlgmr.msra.gmra.mrb[8].mxu0 %vm246_vm2, %v481_v62 }
 0x44c   : > { %1289 = vmatpush3.bf16.msra.mxu0 %v588_v63  ;;  %1290 = vmatprep.mubr.msk.bf16.mxu0 %vm1417_vm0, %v1416_v0 }
 0x44d   : > { %1300 = vmatprep.subr.bf16.mxu0 %v1416_v0 }
 0x44e   : > { %v1399_v1 = vpop.eup %1398 }
 0x44f   : > { %v580_v2 = vmul.f32 %v1399_v1, %v1540_v28 }
 0x451   : > { %v581_v4 = vpack.c.bf16 %v580_v2, %v580_v2 }
 0x453   : > { %1291 = vmatmul.mubr.msk.bf16.vlgmr.msra.gmra.mrb[12].mxu0 %vm369_vm6, %v581_v4 }
 0x454   : > { %1301 = vmatpush3.bf16.msra.mxu0 %v698_v5  ;;  %1302 = vmatprep.mubr.msk.bf16.mxu0 %vm1417_vm0, %v1416_v0 }
 0x455   : > { %1312 = vmatprep.subr.bf16.mxu0 %v1416_v0 }
 0x470   : > { %v688_v6 = vpop.xlane.xlu1 %687 }
 0x471   : > { %1400 = vrcp.f32 %v688_v6 }
 0x474   : > { %v788_v8 = vpop.xlane.xlu1 %787 }
 0x475   : > { %1402 = vrcp.f32 %v788_v8 }
 0x478   : > { %v898_v13 = vpop.xlane.xlu0 %897 }
 0x479   : > { %1404 = vrcp.f32 %v898_v13 }
 0x47b   : > { %v1401_v7 = vpop.eup %1400 }
 0x47c   : > { %v690_v9 = vmul.f32 %v1401_v7, %v1387_v42  ;;  %v903_v18 = vpop.permute.xlu0 %902 }
 0x47d   : > { %v908_v21 = vsel %vm267_vm3, %v903_v18, 0 }
 0x47e   : > { %v691_v11 = vpack.c.bf16 %v690_v9, %v690_v9 }
 0x47f   : > { %v1403_v14 = vpop.eup %1402 }
 0x480   : > { %1303 = vmatmul.mubr.msk.bf16.vlgmr.msra.gmra.mrb[16].mxu0 %vm246_vm2, %v691_v11  ;;  %v790_v16 = vmul.f32 %v1403_v14, %v1551_v44  ;;  %v1003_v24 = vpop.permute.xlu0 %1002 }
 0x481   : > { %1314 = vmatprep.mubr.msk.bf16.mxu0 %vm1417_vm0, %v1416_v0  ;;  %v1008_v26 = vsel %vm373_vm5, %v1003_v24, 0 }
 0x482   : > { %v791_v20 = vpack.c.bf16 %v790_v16, %v790_v16 }
 0x483   : > { %v1405_v22 = vpop.eup %1404 }
 0x484   : > { %v900_v23 = vmul.f32 %v1405_v22, %v1555_v47 }
 0x486   : > { %v901_v25 = vpack.c.bf16 %v900_v23, %v900_v23 }
 0x488   : > { %v998_v15 = vpop.xlane.xlu1 %997 }
 0x489   : > { %1406 = vrcp.f32 %v998_v15 }
 0x48c   : > { %v793_v17 = vpop.permute.xlu1 %792 }
 0x48d   : > { %v798_v19 = vsel %vm373_vm5, %v793_v17, 0 }
 0x48e   : > { %1313 = vmatpush3.bf16.msra.mxu0 %v798_v19 }
 0x48f   : > { %1324 = vmatprep.subr.bf16.mxu0 %v1416_v0 }
 0x491   : > { %1315 = vmatmul.mubr.msk.bf16.vlgmr.msra.gmra.mrb[20].mxu0 %vm369_vm6, %v791_v20 }
 0x492   : > { %1325 = vmatpush3.bf16.msra.mxu0 %v908_v21  ;;  %1326 = vmatprep.mubr.msk.bf16.mxu0 %vm1417_vm0, %v1416_v0 }
 0x493   : > { %1336 = vmatprep.subr.bf16.mxu0 %v1416_v0  ;;  %v1407_v27 = vpop.eup %1406 }
 0x494   : > { %v1000_v28 = vmul.f32 %v1407_v27, %v1559_v52 }
 0x496   : > { %v1001_v29 = vpack.c.bf16 %v1000_v28, %v1000_v28 }
 0x499   : > { %1327 = vmatmul.mubr.msk.bf16.vlgmr.msra.gmra.mrb[24].mxu0 %vm246_vm2, %v901_v25 }
 0x49a   : > { %1337 = vmatpush3.bf16.msra.mxu0 %v1008_v26  ;;  %1338 = vmatprep.mubr.msk.bf16.mxu0 %vm1417_vm0, %v1416_v0 }
 0x4a1   : > { %1339 = vmatmul.mubr.msk.bf16.vlgmr.msra.gmra.mrb[28].mxu0 %vm369_vm6, %v1001_v29 }
 0x516   : > { %v411_v30 = vpop.f32.mrb[4].mxu0 }
 0x517   : > { %v1268_v31 = vpop.f32.mrb[5].mxu0 }
 0x518   : > { %v414_v32 = vpop.f32.mrb[6].mxu0 }
 0x519   : > { %v1269_v33 = vpop.f32.mrb[7].mxu0 }
 0x51e   : > { %v524_v34 = vpop.f32.mrb[8].mxu0 }
 0x51f   : > { %v1280_v35 = vpop.f32.mrb[9].mxu0 }
 0x520   : > { %v527_v36 = vpop.f32.mrb[10].mxu0 }
 0x521   : > { %v1281_v38 = vpop.f32.mrb[11].mxu0 }
 0x526   : > { %v624_v39 = vpop.f32.mrb[12].mxu0 }
 0x527   : > { %v1359_v40 = vpack.i.bf16 %v624_v39, %v524_v34  ;;  %v1292_v41 = vpop.f32.mrb[13].mxu0 }
 0x528   : > { %v627_v42 = vpop.f32.mrb[14].mxu0 }
 0x529   : > { %1360 = vrot.lane.b32.xlu1 %v1359_v40, %s1424_s27  ;;  %v1293_v0 = vpop.f32.mrb[15].mxu0 }
 0x553   : > { %v734_v43 = vpop.f32.mrb[16].mxu0 }
 0x554   : > { %v1304_v44 = vpop.f32.mrb[17].mxu0 }
 0x555   : > { %v737_v45 = vpop.f32.mrb[18].mxu0 }
 0x556   : > { %v1305_v46 = vpop.f32.mrb[19].mxu0 }
 0x564   : > { %v834_v47 = vpop.f32.mrb[20].mxu0 }
 0x565   : > { %v1364_v48 = vpack.i.bf16 %v834_v47, %v734_v43  ;;  %v1316_v49 = vpop.f32.mrb[21].mxu0 }
 0x566   : > { %v837_v50 = vpop.f32.mrb[22].mxu0 }
 0x567   : > { %1365 = vrot.lane.b32.xlu0 %v1364_v48, %s1423_s26  ;;  %v1317_v51 = vpop.f32.mrb[23].mxu0 }
 0x56c   : > { %v944_v52 = vpop.f32.mrb[24].mxu0 }
 0x56d   : > { %v1328_v53 = vpop.f32.mrb[25].mxu0 }
 0x56e   : > { %v947_v54 = vpop.f32.mrb[26].mxu0 }
 0x56f   : > { %v1329_v55 = vpop.f32.mrb[27].mxu0 }
 0x574   : > { %v1044_v56 = vpop.f32.mrb[28].mxu0 }
 0x575   : > { %v1369_v57 = vpack.i.bf16 %v1044_v56, %v944_v52  ;;  %v1340_v58 = vpop.f32.mrb[29].mxu0 }
 0x576   : > { %v1047_v59 = vpop.f32.mrb[30].mxu0 }
 0x577   : > { %1370 = vrot.lane.b32.xlu1 %v1369_v57, %s1422_s25  ;;  %v1341_v60 = vpop.f32.mrb[31].mxu0 }
 0x59b   : > { %v1361_v10 = vpop.permute.xlu1 %1360 }
 0x59c   : > { %v1363_v61 = vunpack.i.h.bf16 %v1361_v10  ;;  %v1362_v62 = vunpack.i.l.bf16 %v1361_v10 }
 0x59e   : > { %v1082_v3 = vsel %vm199_vm1, %v411_v30, %v1363_v61  ;;  %v1062_v4 = vsel %vm199_vm1, %v1522_v37, %v1362_v62 }
 0x5d9   : > { %v1366_v12 = vpop.permute.xlu0 %1365 }
 0x5da   : > { %v1368_v63 = vunpack.i.h.bf16 %v1366_v12  ;;  %v1367_v1 = vunpack.i.l.bf16 %v1366_v12 }
 0x5dc   : > { %v1064_v7 = vsel %vm1063_vm7, %v1062_v4, %v1367_v1  ;;  %v1083_v8 = vsel %vm1063_vm7, %v1082_v3, %v1368_v63 }
 0x5e9   : > { %v1371_v2 = vpop.permute.xlu1 %1370 }
 0x5ea   : > { %v1373_v5 = vunpack.i.h.bf16 %v1371_v2  ;;  %v1372_v6 = vunpack.i.l.bf16 %v1371_v2 }
 0x5ec   : > { %v1066_v9 = vsel %vm1065_vm8, %v1064_v7, %v1372_v6  ;;  %v1084_v11 = vsel %vm1065_vm8, %v1083_v8, %v1373_v5 }
 0x5ed   : > { %v1067_v13 = vpack.c.bf16 %v1066_v9, %v1066_v9  ;;  %v1085_v14 = vpack.c.bf16 %v1084_v11, %v1084_v11 }
 0x5ef   : > { %1069 = vst.msk [vmem:[%s189_s30] sm:$0xf] %vm1068_vm9, %v1067_v13 }
 0x5f0   : > { %1087 = vst.msk [vmem:[%s193_s6] sm:$0x7] %vm1086_vm10, %v1085_v14 }
 0x5f1 PF: > { %s14_s12 = sadd.s32 1, %s1414_s12  }
 0x5f2   : > { %p11_p4 = scmp.ge.s32.totalorder %s14_s12, 4  }
 0x5f4   :  { %13 = sbr.rel (!%p11_p4) target bundleno = 1 (0x1), region = 73 }

</bundles_post_ra>
